<compile_context>
chip_gen: v7x
topology: tpu7x:2x2x1
jax: 0.10.0
libtpu: 0.0.40
codegen_flags: <defaults>
</compile_context>

<pallas_src>
import jax
import jax.numpy as jnp
from jax.experimental import pallas as pl
from jax.experimental.pallas import tpu as pltpu

# ----- model dims (consistent with the module's forward) -----
BATCH = 256
C_IMG = 1
L_IMG = 8
OBS_DIM = C_IMG * L_IMG * L_IMG       # p = 64
LATENT_DIM = 16                       # n
INPUT_DIM = 10                        # m (one-hot of digits 0..9)
HIDDEN = [32, 32]                     # hidden_layer_sizes

# The fused enc+prior packing relies on a uniform 64-lane stage width.
assert HIDDEN[0] == HIDDEN[1] == 2 * LATENT_DIM

H = HIDDEN[0]                                   # 32
EPW = 2 * H                                     # 64: fused enc+prior lane width
XCPAD = ((OBS_DIM + INPUT_DIM + 7) // 8) * 8    # 80: padded [x|c] feature dim
assert 4 * LATENT_DIM == EPW                    # carrier width == EPW

TB = 128                 # batch tile (M rows per grid step; MXU-height on v5e)
ACT_W = 192              # activation slab lanes: [x|c|0] in [0,128), carrier in [128,192)
CARRIER_OFF = 128
OUT_W = 192              # output slab lanes: [mu_d|var_d] in [0,128), [mu_e|var_e|mu_p|var_p] in [128,192)

# ----- row offsets inside the single packed weight slab (128 lanes wide) -----
EP_W0 = 0                       # (XCPAD, :64)  enc+prior first layer
EP_W1 = EP_W0 + XCPAD           # (64, :64)     second layer (block-diagonal)
EP_WO = EP_W1 + EPW             # (64, :64)     output layer (block-diagonal)
EP_B = EP_WO + EPW              # 8 bias rows: b0, b1, bo
D_WZ = EP_B + 8                 # (4n, :32)     decoder fc0 carrier block (z dup + c)
D_W1 = D_WZ + 4 * LATENT_DIM    # (32, :32)     decoder fc1
D_B = D_W1 + H                  # 8 bias rows: b0, b1
DO_WO = D_B + 8                 # (32, :128)    decoder output layer
DO_B = DO_WO + H                # 8 bias rows: bo
W_ROWS = DO_B + 8               # 360
assert all(o % 8 == 0 for o in (EP_W0, EP_W1, EP_WO, EP_B, D_WZ, D_W1, D_B, DO_WO, DO_B))


def _softplus2(v):
    # torch.nn.Softplus(beta=2, threshold=20): v when 2v > 20 else 0.5*log(1+exp(2v)).
    # Clamp the exp argument so the discarded branch never produces inf.
    t = 2.0 * v
    return jnp.where(t > 20.0, v, 0.5 * jnp.log1p(jnp.exp(jnp.minimum(t, 20.0))))


def _cvae_kernel(act_ref, w_ref, o_ref):
    f32 = jnp.float32
    n, p, h = LATENT_DIM, OBS_DIM, H
    tb = act_ref.shape[0]

    def dot(a, b):
        return jnp.dot(a, b, preferred_element_type=f32)

    # ---- fused encoder + prior MLP (block-diagonal packed weights) ----
    xc = act_ref[:, :XCPAD]                                    # (TB, 80) [x|c|0]
    a = _softplus2(dot(xc, w_ref[EP_W0:EP_W0 + XCPAD, :EPW]) +
                   w_ref[EP_B:EP_B + 1, :EPW])
    a = _softplus2(dot(a, w_ref[EP_W1:EP_W1 + EPW, :EPW]) +
                   w_ref[EP_B + 1:EP_B + 2, :EPW])
    out_ep = dot(a, w_ref[EP_WO:EP_WO + EPW, :EPW]) + w_ref[EP_B + 2:EP_B + 3, :EPW]

    # exp on the variance halves via a full-vreg lane mask (no lane slicing)
    lane = jax.lax.broadcasted_iota(jnp.int32, (tb, EPW), 1)
    is_var = (lane % (2 * n)) >= n                 # lanes [n,2n) and [3n,4n)
    o_ep = jnp.where(is_var, jnp.exp(jnp.minimum(out_ep, 80.0)) + 1e-6, out_ep)

    # ---- reparameterization + c-fold, no cross-lane movement ----
    # carrier input lanes: [0,n)=0, [n,2n)=eps, [2n,2n+m)=c, rest 0.
    # v lanes: [0,n)=mu_e, [n,2n)=sqrt(var_e)*eps, [2n,2n+m)=c (std==1 there).
    # The packed D_WZ block stores dw0[:n] on BOTH row blocks [0,n) and [n,2n)
    # and dw0[n:n+m] on rows [2n,2n+m), so one matmul of v reproduces
    # [z|c] @ dw0 exactly.
    carrier = act_ref[:, CARRIER_OFF:CARRIER_OFF + EPW]        # (TB, 64)
    noise_lane = (lane >= n) & (lane < 2 * n)
    std = jnp.sqrt(jnp.where(noise_lane, o_ep, 1.0))
    v = jnp.where(lane < n, o_ep, std * carrier)

    # ---- decoder MLP ----
    b = _softplus2(dot(v, w_ref[D_WZ:D_WZ + 4 * n, :h]) + w_ref[D_B:D_B + 1, :h])
    b = _softplus2(dot(b, w_ref[D_W1:D_W1 + h, :h]) + w_ref[D_B + 1:D_B + 2, :h])
    out_d = dot(b, w_ref[DO_WO:DO_WO + h, :]) + w_ref[DO_B:DO_B + 1, :]   # (TB,128)

    lane_d = jax.lax.broadcasted_iota(jnp.int32, (tb, 2 * p), 1)
    o_ref[:, :2 * p] = jnp.where(lane_d >= p,
                                 jnp.exp(jnp.minimum(out_d, 80.0)) + 1e-6, out_d)
    o_ref[:, 2 * p:2 * p + EPW] = o_ep


# ------------------- parameter packing (done once, outside kernel) ---------
def pack_cvae_params(params):
    """Pack all 18 weight/bias arrays into ONE (360, 128) f32 slab."""
    (pw0, pb0, pw1, pb1, pwo, pbo,
     ew0, eb0, ew1, eb1, ewo, ebo,
     dw0, db0, dw1, db1, dwo, dbo) = params
    n, p, m, h = LATENT_DIM, OBS_DIM, INPUT_DIM, H
    W = jnp.zeros((W_ROWS, 2 * p), jnp.float32)

    # fused encoder+prior (lanes [0,64)): encoder lanes [0,32), prior [32,64)
    W = W.at[EP_W0:EP_W0 + p + m, :h].set(ew0)            # encoder fc0 (reads [x|c])
    W = W.at[EP_W0 + p:EP_W0 + p + m, h:2 * h].set(pw0)   # prior fc0 (reads c lanes)
    W = W.at[EP_W1:EP_W1 + h, :h].set(ew1)
    W = W.at[EP_W1 + h:EP_W1 + 2 * h, h:2 * h].set(pw1)
    W = W.at[EP_WO:EP_WO + h, :h].set(ewo)
    W = W.at[EP_WO + h:EP_WO + 2 * h, h:2 * h].set(pwo)
    W = W.at[EP_B + 0, :h].set(eb0.reshape(-1)).at[EP_B + 0, h:2 * h].set(pb0.reshape(-1))
    W = W.at[EP_B + 1, :h].set(eb1.reshape(-1)).at[EP_B + 1, h:2 * h].set(pb1.reshape(-1))
    W = W.at[EP_B + 2, :h].set(ebo.reshape(-1)).at[EP_B + 2, h:2 * h].set(pbo.reshape(-1))

    # decoder fc0 carrier block (lanes [0,32)): z weights duplicated + c weights
    W = W.at[D_WZ:D_WZ + n, :h].set(dw0[:n])              # mu_e lanes
    W = W.at[D_WZ + n:D_WZ + 2 * n, :h].set(dw0[:n])      # sqrt(var_e)*eps lanes
    W = W.at[D_WZ + 2 * n:D_WZ + 2 * n + m, :h].set(dw0[n:n + m])   # c lanes
    W = W.at[D_W1:D_W1 + h, :h].set(dw1)
    W = W.at[D_B + 0, :h].set(db0.reshape(-1))
    W = W.at[D_B + 1, :h].set(db1.reshape(-1))

    # decoder output layer (lanes [0,128))
    W = W.at[DO_WO:DO_WO + h, :].set(dwo)
    W = W.at[DO_B, :].set(dbo.reshape(-1))
    return W


# ------------------- forward wrapper ---------------------------------------
def cvae_forward_pallas(x, c, eps, w_packed):
    """x: (B, C, L, L); c: (B, m); eps: (B, n) standard-normal noise."""
    n, p, m = LATENT_DIM, OBS_DIM, INPUT_DIM
    B = x.shape[0]
    x_flat = x.reshape(B, p).astype(jnp.float32)

    # pad batch to a multiple of the batch tile
    Bp = ((B + TB - 1) // TB) * TB

    # single lane-packed activation slab
    act = jnp.zeros((Bp, ACT_W), jnp.float32)
    act = act.at[:B, :p].set(x_flat)
    act = act.at[:B, p:p + m].set(c)
    act = act.at[:B, CARRIER_OFF + n:CARRIER_OFF + 2 * n].set(eps)
    act = act.at[:B, CARRIER_OFF + 2 * n:CARRIER_OFF + 2 * n + m].set(c)

    out = pl.pallas_call(
        _cvae_kernel,
        out_shape=jax.ShapeDtypeStruct((Bp, OUT_W), jnp.float32),
        grid=(Bp // TB,),
        in_specs=[pl.BlockSpec((TB, ACT_W), lambda i: (i, 0)),
                  pl.BlockSpec((W_ROWS, 2 * p), lambda i: (0, 0))],
        out_specs=pl.BlockSpec((TB, OUT_W), lambda i: (i, 0)),
        compiler_params=pltpu.CompilerParams(
            dimension_semantics=("parallel",)),
    )(act, w_packed)

    out = out[:B]
    mu_d, var_d = out[:, :p], out[:, p:2 * p]
    mu_e = out[:, 2 * p:2 * p + n]
    var_e = out[:, 2 * p + n:2 * p + 2 * n]
    mu_p = out[:, 2 * p + 2 * n:2 * p + 3 * n]
    var_p = out[:, 2 * p + 3 * n:2 * p + 4 * n]
    return mu_e, var_e, mu_p, var_p, mu_d, var_d


# ------------------- deterministic parameter init --------------------------
def _init_linear(key, fan_in, fan_out):
    kw, kb = jax.random.split(key)
    bound = 1.0 / jnp.sqrt(float(fan_in))
    w = jax.random.uniform(kw, (fan_in, fan_out), jnp.float32, -bound, bound)
    b = jax.random.uniform(kb, (1, fan_out), jnp.float32, -bound, bound)
    return w, b


def _init_mlp(key, in_dim, out_dim, hidden):
    ks = jax.random.split(key, len(hidden) + 1)
    w0, b0 = _init_linear(ks[0], in_dim, hidden[0])
    w1, b1 = _init_linear(ks[1], hidden[0], hidden[1])
    wo, bo = _init_linear(ks[2], hidden[1], out_dim)
    return (w0, b0, w1, b1, wo, bo)


# ------------------- pure-JAX reference (for sanity check) -----------------
def _mlp_ref(x, w0, b0, w1, b1, wo, bo):
    h = _softplus2(x @ w0 + b0)
    h = _softplus2(h @ w1 + b1)
    return h @ wo + bo


def cvae_forward_ref(x, c, eps, params):
    (pw0, pb0, pw1, pb1, pwo, pbo,
     ew0, eb0, ew1, eb1, ewo, ebo,
     dw0, db0, dw1, db1, dwo, dbo) = params
    n, p = LATENT_DIM, OBS_DIM
    B = x.shape[0]
    x_flat = x.reshape(B, p)

    out_p = _mlp_ref(c, pw0, pb0, pw1, pb1, pwo, pbo)
    mu_p, var_p = out_p[:, :n], jnp.exp(out_p[:, n:]) + 1e-6

    out_e = _mlp_ref(jnp.concatenate([x_flat, c], axis=-1),
                     ew0, eb0, ew1, eb1, ewo, ebo)
    mu_e, var_e = out_e[:, :n], jnp.exp(out_e[:, n:]) + 1e-6

    z = mu_e + jnp.sqrt(var_e) * eps
    out_d = _mlp_ref(jnp.concatenate([z, c], axis=-1),
                     dw0, db0, dw1, db1, dwo, dbo)
    mu_d, var_d = out_d[:, :p], jnp.exp(out_d[:, p:]) + 1e-6
    return mu_e, var_e, mu_p, var_p, mu_d, var_d


if __name__ == "__main__":
    key = jax.random.PRNGKey(0)
    k_x, k_c, k_eps, k_prior, k_enc, k_dec = jax.random.split(key, 6)

    # inputs
    x = jax.random.normal(k_x, (BATCH, C_IMG, L_IMG, L_IMG), jnp.float32)
    c_idx = jax.random.randint(k_c, (BATCH,), 0, 10)
    c = jax.nn.one_hot(c_idx, INPUT_DIM, dtype=jnp.float32)      # (B, m)
    # reparameterization noise drawn outside the kernel for determinism
    eps = jax.random.normal(k_eps, (BATCH, LATENT_DIM), jnp.float32)

    # parameters (prior: m->2n, encoder: p+m->2n, decoder: n+m->2p)
    params = (_init_mlp(k_prior, INPUT_DIM, 2 * LATENT_DIM, HIDDEN)
              + _init_mlp(k_enc, OBS_DIM + INPUT_DIM, 2 * LATENT_DIM, HIDDEN)
              + _init_mlp(k_dec, LATENT_DIM + INPUT_DIM, 2 * OBS_DIM, HIDDEN))

    w_packed = pack_cvae_params(params)   # one-time packing into a single VMEM slab
    # TODO(synk): for v6e/v7x, optionally store w_packed in bf16 and cast
    # activations before each dot to cut MXU pass count (needs looser tolerance).

    fwd = jax.jit(cvae_forward_pallas)
    outs = jax.block_until_ready(fwd(x, c, eps, w_packed))

    refs = cvae_forward_ref(x, c, eps, params)
    for o, r in zip(outs, refs):
        assert o.shape == r.shape and o.dtype == r.dtype
        assert jnp.allclose(o, r, atol=1e-4, rtol=1e-4), "mismatch vs reference"

    print("KERNEL_OK")
</pallas_src>

<mosaic_0001>
module attributes {stable_mosaic.version = 11 : i64} {
  func.func @_cvae_kernel(%arg0: i32, %arg1: memref<128x192xf32, #tpu.memory_space<vmem>>, %arg2: memref<360x128xf32, #tpu.memory_space<vmem>>, %arg3: memref<128x192xf32, #tpu.memory_space<vmem>>) attributes {dimension_semantics = [#tpu.dimension_semantics<parallel>], iteration_bounds = array<i64: 2>, scalar_prefetch = 0 : i64, scratch_operands = 0 : i64, tpu.core_type = #tpu.core_type<tc>, window_params = [{transform_indices = @transform_0, window_bounds = array<i64: 128, 192>}, {pipeline_mode = #tpu.pipeline_mode<synchronous>, transform_indices = @transform_1, window_bounds = array<i64: 360, 128>}, {transform_indices = @transform_2, window_bounds = array<i64: 128, 192>}]} {
    %c0 = arith.constant 0 : index
    %c0_0 = arith.constant 0 : index
    %0 = vector.load %arg1[%c0, %c0_0] : memref<128x192xf32, #tpu.memory_space<vmem>>, vector<128x80xf32>
    %c0_1 = arith.constant 0 : index
    %c0_2 = arith.constant 0 : index
    %1 = vector.load %arg2[%c0_1, %c0_2] : memref<360x128xf32, #tpu.memory_space<vmem>>, vector<80x64xf32>
    %cst = arith.constant dense<0.000000e+00> : vector<128x64xf32>
    %2 = tpu.matmul %0, %1, %cst {dimension_numbers = #tpu.dot_dimension_numbers<[1], [0], [0], [1], [0, 0, 1, 1], [], []>} : vector<128x80xf32>, vector<80x64xf32>, vector<128x64xf32> -> vector<128x64xf32>
    %c208 = arith.constant 208 : index
    %c0_3 = arith.constant 0 : index
    %3 = vector.load %arg2[%c208, %c0_3] : memref<360x128xf32, #tpu.memory_space<vmem>>, vector<1x64xf32>
    %4 = vector.broadcast %3 : vector<1x64xf32> to vector<128x64xf32>
    %5 = arith.addf %2, %4 : vector<128x64xf32>
    %cst_4 = arith.constant 2.000000e+00 : f32
    %6 = vector.broadcast %cst_4 : f32 to vector<128x64xf32>
    %7 = arith.mulf %6, %5 : vector<128x64xf32>
    %cst_5 = arith.constant 2.000000e+01 : f32
    %8 = vector.broadcast %cst_5 : f32 to vector<128x64xf32>
    %9 = arith.cmpf ogt, %7, %8 : vector<128x64xf32>
    %cst_6 = arith.constant 2.000000e+01 : f32
    %10 = vector.broadcast %cst_6 : f32 to vector<128x64xf32>
    %11 = arith.minimumf %7, %10 : vector<128x64xf32>
    %12 = math.exp %11 : vector<128x64xf32>
    %13 = math.log1p %12 : vector<128x64xf32>
    %cst_7 = arith.constant 5.000000e-01 : f32
    %14 = vector.broadcast %cst_7 : f32 to vector<128x64xf32>
    %15 = arith.mulf %14, %13 : vector<128x64xf32>
    %16 = arith.select %9, %5, %15 : vector<128x64xi1>, vector<128x64xf32>
    %c80 = arith.constant 80 : index
    %c0_8 = arith.constant 0 : index
    %17 = vector.load %arg2[%c80, %c0_8] : memref<360x128xf32, #tpu.memory_space<vmem>>, vector<64x64xf32>
    %cst_9 = arith.constant dense<0.000000e+00> : vector<128x64xf32>
    %18 = tpu.matmul %16, %17, %cst_9 {dimension_numbers = #tpu.dot_dimension_numbers<[1], [0], [0], [1], [0, 0, 1, 1], [], []>} : vector<128x64xf32>, vector<64x64xf32>, vector<128x64xf32> -> vector<128x64xf32>
    %c209 = arith.constant 209 : index
    %c0_10 = arith.constant 0 : index
    %19 = vector.load %arg2[%c209, %c0_10] : memref<360x128xf32, #tpu.memory_space<vmem>>, vector<1x64xf32>
    %20 = vector.broadcast %19 : vector<1x64xf32> to vector<128x64xf32>
    %21 = arith.addf %18, %20 : vector<128x64xf32>
    %cst_11 = arith.constant 2.000000e+00 : f32
    %22 = vector.broadcast %cst_11 : f32 to vector<128x64xf32>
    %23 = arith.mulf %22, %21 : vector<128x64xf32>
    %cst_12 = arith.constant 2.000000e+01 : f32
    %24 = vector.broadcast %cst_12 : f32 to vector<128x64xf32>
    %25 = arith.cmpf ogt, %23, %24 : vector<128x64xf32>
    %cst_13 = arith.constant 2.000000e+01 : f32
    %26 = vector.broadcast %cst_13 : f32 to vector<128x64xf32>
    %27 = arith.minimumf %23, %26 : vector<128x64xf32>
    %28 = math.exp %27 : vector<128x64xf32>
    %29 = math.log1p %28 : vector<128x64xf32>
    %cst_14 = arith.constant 5.000000e-01 : f32
    %30 = vector.broadcast %cst_14 : f32 to vector<128x64xf32>
    %31 = arith.mulf %30, %29 : vector<128x64xf32>
    %32 = arith.select %25, %21, %31 : vector<128x64xi1>, vector<128x64xf32>
    %c144 = arith.constant 144 : index
    %c0_15 = arith.constant 0 : index
    %33 = vector.load %arg2[%c144, %c0_15] : memref<360x128xf32, #tpu.memory_space<vmem>>, vector<64x64xf32>
    %cst_16 = arith.constant dense<0.000000e+00> : vector<128x64xf32>
    %34 = tpu.matmul %32, %33, %cst_16 {dimension_numbers = #tpu.dot_dimension_numbers<[1], [0], [0], [1], [0, 0, 1, 1], [], []>} : vector<128x64xf32>, vector<64x64xf32>, vector<128x64xf32> -> vector<128x64xf32>
    %c210 = arith.constant 210 : index
    %c0_17 = arith.constant 0 : index
    %35 = vector.load %arg2[%c210, %c0_17] : memref<360x128xf32, #tpu.memory_space<vmem>>, vector<1x64xf32>
    %36 = vector.broadcast %35 : vector<1x64xf32> to vector<128x64xf32>
    %37 = arith.addf %34, %36 : vector<128x64xf32>
    %38 = tpu.iota {dimensions = array<i32: 1>} : vector<128x64xi32>
    %c32_i32 = arith.constant 32 : i32
    %c0_i32 = arith.constant 0 : i32
    %39 = arith.cmpi eq, %c32_i32, %c0_i32 : i32
    %c1_i32 = arith.constant 1 : i32
    %40 = arith.select %39, %c1_i32, %c32_i32 : i32
    %41 = vector.broadcast %40 : i32 to vector<128x64xi32>
    %42 = arith.remsi %38, %41 : vector<128x64xi32>
    %c0_i32_18 = arith.constant 0 : i32
    %43 = vector.broadcast %c0_i32_18 : i32 to vector<128x64xi32>
    %44 = arith.cmpi ne, %42, %43 : vector<128x64xi32>
    %c0_i32_19 = arith.constant 0 : i32
    %45 = vector.broadcast %c0_i32_19 : i32 to vector<128x64xi32>
    %46 = arith.cmpi slt, %42, %45 : vector<128x64xi32>
    %c0_i32_20 = arith.constant 0 : i32
    %47 = arith.cmpi slt, %40, %c0_i32_20 : i32
    %48 = vector.broadcast %47 : i1 to vector<128x64xi1>
    %49 = vector.broadcast %48 : vector<128x64xi1> to vector<128x64xi1>
    %50 = arith.xori %46, %49 : vector<128x64xi1>
    %51 = arith.andi %50, %44 : vector<128x64xi1>
    %52 = vector.broadcast %40 : i32 to vector<128x64xi32>
    %53 = arith.addi %42, %52 : vector<128x64xi32>
    %54 = arith.select %51, %53, %42 : vector<128x64xi1>, vector<128x64xi32>
    %c16_i32 = arith.constant 16 : i32
    %55 = vector.broadcast %c16_i32 : i32 to vector<128x64xi32>
    %56 = arith.cmpi sge, %54, %55 : vector<128x64xi32>
    %cst_21 = arith.constant 8.000000e+01 : f32
    %57 = vector.broadcast %cst_21 : f32 to vector<128x64xf32>
    %58 = arith.minimumf %37, %57 : vector<128x64xf32>
    %59 = math.exp %58 : vector<128x64xf32>
    %cst_22 = arith.constant 9.99999997E-7 : f32
    %60 = vector.broadcast %cst_22 : f32 to vector<128x64xf32>
    %61 = arith.addf %59, %60 : vector<128x64xf32>
    %62 = arith.select %56, %61, %37 : vector<128x64xi1>, vector<128x64xf32>
    %c0_23 = arith.constant 0 : index
    %c128 = arith.constant 128 : index
    %63 = vector.load %arg1[%c0_23, %c128] : memref<128x192xf32, #tpu.memory_space<vmem>>, vector<128x64xf32>
    %c16_i32_24 = arith.constant 16 : i32
    %64 = vector.broadcast %c16_i32_24 : i32 to vector<128x64xi32>
    %65 = arith.cmpi sge, %38, %64 : vector<128x64xi32>
    %c32_i32_25 = arith.constant 32 : i32
    %66 = vector.broadcast %c32_i32_25 : i32 to vector<128x64xi32>
    %67 = arith.cmpi slt, %38, %66 : vector<128x64xi32>
    %68 = arith.andi %65, %67 : vector<128x64xi1>
    %cst_26 = arith.constant 1.000000e+00 : f32
    %69 = vector.broadcast %cst_26 : f32 to vector<128x64xf32>
    %70 = arith.select %68, %62, %69 : vector<128x64xi1>, vector<128x64xf32>
    %71 = math.sqrt %70 : vector<128x64xf32>
    %c16_i32_27 = arith.constant 16 : i32
    %72 = vector.broadcast %c16_i32_27 : i32 to vector<128x64xi32>
    %73 = arith.cmpi slt, %38, %72 : vector<128x64xi32>
    %74 = arith.mulf %71, %63 : vector<128x64xf32>
    %75 = arith.select %73, %62, %74 : vector<128x64xi1>, vector<128x64xf32>
    %c216 = arith.constant 216 : index
    %c0_28 = arith.constant 0 : index
    %76 = vector.load %arg2[%c216, %c0_28] : memref<360x128xf32, #tpu.memory_space<vmem>>, vector<64x32xf32>
    %cst_29 = arith.constant dense<0.000000e+00> : vector<128x32xf32>
    %77 = tpu.matmul %75, %76, %cst_29 {dimension_numbers = #tpu.dot_dimension_numbers<[1], [0], [0], [1], [0, 0, 1, 1], [], []>} : vector<128x64xf32>, vector<64x32xf32>, vector<128x32xf32> -> vector<128x32xf32>
    %c312 = arith.constant 312 : index
    %c0_30 = arith.constant 0 : index
    %78 = vector.load %arg2[%c312, %c0_30] : memref<360x128xf32, #tpu.memory_space<vmem>>, vector<1x32xf32>
    %79 = vector.broadcast %78 : vector<1x32xf32> to vector<128x32xf32>
    %80 = arith.addf %77, %79 : vector<128x32xf32>
    %cst_31 = arith.constant 2.000000e+00 : f32
    %81 = vector.broadcast %cst_31 : f32 to vector<128x32xf32>
    %82 = arith.mulf %81, %80 : vector<128x32xf32>
    %cst_32 = arith.constant 2.000000e+01 : f32
    %83 = vector.broadcast %cst_32 : f32 to vector<128x32xf32>
    %84 = arith.cmpf ogt, %82, %83 : vector<128x32xf32>
    %cst_33 = arith.constant 2.000000e+01 : f32
    %85 = vector.broadcast %cst_33 : f32 to vector<128x32xf32>
    %86 = arith.minimumf %82, %85 : vector<128x32xf32>
    %87 = math.exp %86 : vector<128x32xf32>
    %88 = math.log1p %87 : vector<128x32xf32>
    %cst_34 = arith.constant 5.000000e-01 : f32
    %89 = vector.broadcast %cst_34 : f32 to vector<128x32xf32>
    %90 = arith.mulf %89, %88 : vector<128x32xf32>
    %91 = arith.select %84, %80, %90 : vector<128x32xi1>, vector<128x32xf32>
    %c280 = arith.constant 280 : index
    %c0_35 = arith.constant 0 : index
    %92 = vector.load %arg2[%c280, %c0_35] : memref<360x128xf32, #tpu.memory_space<vmem>>, vector<32x32xf32>
    %cst_36 = arith.constant dense<0.000000e+00> : vector<128x32xf32>
    %93 = tpu.matmul %91, %92, %cst_36 {dimension_numbers = #tpu.dot_dimension_numbers<[1], [0], [0], [1], [0, 0, 1, 1], [], []>} : vector<128x32xf32>, vector<32x32xf32>, vector<128x32xf32> -> vector<128x32xf32>
    %c313 = arith.constant 313 : index
    %c0_37 = arith.constant 0 : index
    %94 = vector.load %arg2[%c313, %c0_37] : memref<360x128xf32, #tpu.memory_space<vmem>>, vector<1x32xf32>
    %95 = vector.broadcast %94 : vector<1x32xf32> to vector<128x32xf32>
    %96 = arith.addf %93, %95 : vector<128x32xf32>
    %cst_38 = arith.constant 2.000000e+00 : f32
    %97 = vector.broadcast %cst_38 : f32 to vector<128x32xf32>
    %98 = arith.mulf %97, %96 : vector<128x32xf32>
    %cst_39 = arith.constant 2.000000e+01 : f32
    %99 = vector.broadcast %cst_39 : f32 to vector<128x32xf32>
    %100 = arith.cmpf ogt, %98, %99 : vector<128x32xf32>
    %cst_40 = arith.constant 2.000000e+01 : f32
    %101 = vector.broadcast %cst_40 : f32 to vector<128x32xf32>
    %102 = arith.minimumf %98, %101 : vector<128x32xf32>
    %103 = math.exp %102 : vector<128x32xf32>
    %104 = math.log1p %103 : vector<128x32xf32>
    %cst_41 = arith.constant 5.000000e-01 : f32
    %105 = vector.broadcast %cst_41 : f32 to vector<128x32xf32>
    %106 = arith.mulf %105, %104 : vector<128x32xf32>
    %107 = arith.select %100, %96, %106 : vector<128x32xi1>, vector<128x32xf32>
    %c320 = arith.constant 320 : index
    %c0_42 = arith.constant 0 : index
    %108 = vector.load %arg2[%c320, %c0_42] : memref<360x128xf32, #tpu.memory_space<vmem>>, vector<32x128xf32>
    %cst_43 = arith.constant dense<0.000000e+00> : vector<128x128xf32>
    %109 = tpu.matmul %107, %108, %cst_43 {dimension_numbers = #tpu.dot_dimension_numbers<[1], [0], [0], [1], [0, 0, 1, 1], [], []>} : vector<128x32xf32>, vector<32x128xf32>, vector<128x128xf32> -> vector<128x128xf32>
    %c352 = arith.constant 352 : index
    %c0_44 = arith.constant 0 : index
    %110 = vector.load %arg2[%c352, %c0_44] : memref<360x128xf32, #tpu.memory_space<vmem>>, vector<1x128xf32>
    %111 = vector.broadcast %110 : vector<1x128xf32> to vector<128x128xf32>
    %112 = arith.addf %109, %111 : vector<128x128xf32>
    %113 = tpu.iota {dimensions = array<i32: 1>} : vector<128x128xi32>
    %c64_i32 = arith.constant 64 : i32
    %114 = vector.broadcast %c64_i32 : i32 to vector<128x128xi32>
    %115 = arith.cmpi sge, %113, %114 : vector<128x128xi32>
    %cst_45 = arith.constant 8.000000e+01 : f32
    %116 = vector.broadcast %cst_45 : f32 to vector<128x128xf32>
    %117 = arith.minimumf %112, %116 : vector<128x128xf32>
    %118 = math.exp %117 : vector<128x128xf32>
    %cst_46 = arith.constant 9.99999997E-7 : f32
    %119 = vector.broadcast %cst_46 : f32 to vector<128x128xf32>
    %120 = arith.addf %118, %119 : vector<128x128xf32>
    %121 = arith.select %115, %120, %112 : vector<128x128xi1>, vector<128x128xf32>
    %c0_47 = arith.constant 0 : index
    %c0_48 = arith.constant 0 : index
    %122 = vector.load %arg3[%c0_47, %c0_48] : memref<128x192xf32, #tpu.memory_space<vmem>>, vector<128x128xf32>
    tpu.vector_store %arg3[%c0_47, %c0_48], %121 {strides = array<i32>} : memref<128x192xf32, #tpu.memory_space<vmem>>, vector<128x128xf32>,
    %c0_49 = arith.constant 0 : index
    %c128_50 = arith.constant 128 : index
    %123 = vector.load %arg3[%c0_49, %c128_50] : memref<128x192xf32, #tpu.memory_space<vmem>>, vector<128x64xf32>
    tpu.vector_store %arg3[%c0_49, %c128_50], %62 {strides = array<i32>} : memref<128x192xf32, #tpu.memory_space<vmem>>, vector<128x64xf32>,
    return
  }
  func.func @transform_0(%arg0: i32) -> (i32, i32) {
    %c0_i32 = arith.constant 0 : i32
    %c0_i32_0 = arith.constant 0 : i32
    return %arg0, %c0_i32 : i32, i32
  }
  func.func @transform_1(%arg0: i32) -> (i32, i32) {
    %c0_i32 = arith.constant 0 : i32
    %c0_i32_0 = arith.constant 0 : i32
    %c0_i32_1 = arith.constant 0 : i32
    return %c0_i32, %c0_i32_0 : i32, i32
  }
  func.func @transform_2(%arg0: i32) -> (i32, i32) {
    %c0_i32 = arith.constant 0 : i32
    %c0_i32_0 = arith.constant 0 : i32
    return %arg0, %c0_i32 : i32, i32
  }
}

</mosaic_0001>

<bundles_post_ra>
// kernel: cvae_forward_pallas.1
= control target key start
LH: loop header
LB: loop body
LE: loop exit
PB: predicated region body
PF: predicated region fallthrough
CT: control target
= control target key end

     0   :  { %s3821_s9 = smov 0   ;;  %s5840_s0 = inlined_call_operand.vmem [shape: f32[256,192], index: 0, kind: input, shape index: {}]   ;;  %s5841_s1 = inlined_call_operand.vmem [shape: f32[360,128], index: 1, kind: input, shape index: {}]   ;;  %s5842_s2 = inlined_call_operand.vmem [shape: f32[256,192], index: 2, kind: output, shape index: {}]  }
   0x1 LB: > { %s2871_s10 = sadd.s32 4294967295, %s3804_s9   ;;  %p2875_p0 = scmp.ge.s32.totalorder %s3804_s9, 1  ;;  %s3804_s9 = sphi %s3821_s9, %s12_s9  }
   0x2   : > { %p114_p1 = scmp.lt.s32.totalorder %s3804_s9, 3 }
   0x4   : > { %p115_p2 = pnand %p2875_p0, %p114_p1 }
   0x5   : > { %v168_v0 = vld [vmem:[%s5841_s1] sm:$0xff] (!%p115_p2)  ;;  %v169_v1 = vld [vmem:[%s5841_s1 + $0x8] sm:$0xff] (!%p115_p2)  ;;  %v170_v2 = vld [vmem:[%s5841_s1 + $0x10] sm:$0xff] (!%p115_p2)  ;;  %s2876_s17 = sshll.u32 (!%p115_p2), %s2871_s10, 4  ;;  %vm183_vm0 = vcmask (!%p115_p2), 654336   ;;  %vm646_vm1 = vcmask (!%p115_p2), 523264  }
   0x6   : > { %118 = sbr.rel (%p115_p2) target bundleno = 1584 (0x630), region = 28  ;;  %v3354_v3 = vpack.c.bf16 (!%p115_p2), %v169_v1, %v168_v0  ;;  %v171_v4 = vld [vmem:[%s5841_s1 + $0x18] sm:$0xff] (!%p115_p2)  ;;  %p139_p3 = scmp.lt.s32.totalorder (!%p115_p2), %s2876_s17, 31  ;;  %v172_v6 = vld [vmem:[%s5841_s1 + $0x20] sm:$0xff] (!%p115_p2)  ;;  %v173_v7 = vld [vmem:[%s5841_s1 + $0x28] sm:$0xff] (!%p115_p2) }
   0x7   : > { %v3358_v5 = vpack.c.bf16 (!%p115_p2), %v171_v4, %v170_v2  ;;  %v3362_v8 = vpack.c.bf16 (!%p115_p2), %v173_v7, %v172_v6  ;;  %v174_v9 = vld [vmem:[%s5841_s1 + $0x30] sm:$0xff] (!%p115_p2)  ;;  %v175_v10 = vld [vmem:[%s5841_s1 + $0x38] sm:$0xff] (!%p115_p2)  ;;  %v176_v13 = vld [vmem:[%s5841_s1 + $0x40] sm:$0xff] (!%p115_p2) }
   0x8   : > { %3355 = vmatprep.subr.bf16.mxu0 (!%p115_p2), %v3354_v3  ;;  %v3366_v12 = vpack.c.bf16 (!%p115_p2), %v175_v10, %v174_v9  ;;  %v177_v14 = vld [vmem:[%s5841_s1 + $0x48] sm:$0xff] (!%p115_p2)  ;;  %v633_v31 = vld [vmem:[%s5841_s1 + $0x50] sm:$0xff] (!%p115_p2)  ;;  %v634_v32 = vld [vmem:[%s5841_s1 + $0x58] sm:$0xff] (!%p115_p2) }
   0x9   : > { %3357 = vmatpush3.bf16.msra.mxu0 (!%p115_p2), %v3354_v3  ;;  %v3370_v15 = vpack.c.bf16 (!%p115_p2), %v177_v14, %v176_v13  ;;  %v3374_v33 = vpack.c.bf16 (!%p115_p2), %v634_v32, %v633_v31  ;;  %v635_v34 = vld [vmem:[%s5841_s1 + $0x60] sm:$0xff] (!%p115_p2)  ;;  %v636_v35 = vld [vmem:[%s5841_s1 + $0x68] sm:$0xff] (!%p115_p2)  ;;  %v637_v37 = vld [vmem:[%s5841_s1 + $0x70] sm:$0xff] (!%p115_p2) }
   0xa   : > { %3359 = vmatprep.subr.bf16.mxu0 (!%p115_p2), %v3358_v5  ;;  %v3378_v36 = vpack.c.bf16 (!%p115_p2), %v636_v35, %v635_v34  ;;  %v638_v38 = vld [vmem:[%s5841_s1 + $0x78] sm:$0xff] (!%p115_p2)  ;;  %v639_v40 = vld [vmem:[%s5841_s1 + $0x80] sm:$0xff] (!%p115_p2)  ;;  %v640_v41 = vld [vmem:[%s5841_s1 + $0x88] sm:$0xff] (!%p115_p2) }
   0xb   : > { %3375 = vmatprep.subr.bf16.mxu1 (!%p115_p2), %v3374_v33  ;;  %v3382_v39 = vpack.c.bf16 (!%p115_p2), %v638_v38, %v637_v37  ;;  %v3386_v42 = vpack.c.bf16 (!%p115_p2), %v640_v41, %v639_v40  ;;  %v3928_v43 = vld [vmem:[%s5841_s1 + $0xd0] ss:$0 sm:$0xff] (!%p115_p2) }
   0xc   : > { %3377 = vmatpush3.bf16.msra.mxu1 (!%p115_p2), %v3374_v33 }
   0xd   : > { %s5922_s17 = smov (!%p139_p3, %s2876_s17), 31  ;;  %3361 = vmatpush3.bf16.msra.mxu0 %v3358_v5  ;;  %3379 = vmatprep.subr.bf16.mxu1 %v3378_v36 }
   0xe   : > { %s2986_s24 = sshll.u32 %s5922_s17, 4  ;;  %3363 = vmatprep.subr.bf16.mxu0 %v3362_v8 }
   0xf   : > { %s3861_s3 = scalar_lea.vmem %s5840_s0, %s2986_s24  ;;  %s4664_s18 = scalar_lea.vmem %s5842_s2, %s2986_s24 }
  0x10   : > { %v152_v11 = vld [vmem:[%s3861_s3] sm:$0xff]  ;;  %v153_v16 = vld [vmem:[%s3861_s3 + $0x10] sm:$0xff]  ;;  %3381 = vmatpush3.bf16.msra.mxu1 %v3378_v36 }
  0x11   : > { %3146 = vmatprep.mubr.msk.f32.mxu0 %vm183_vm0, %v152_v11  ;;  %3365 = vmatpush3.bf16.msra.mxu0 %v3362_v8  ;;  %v154_v17 = vld [vmem:[%s3861_s3 + $0x20] sm:$0xff]  ;;  %v155_v18 = vld [vmem:[%s3861_s3 + $0x30] sm:$0xff] }
  0x12   : > { %3367 = vmatprep.subr.bf16.mxu0 %v3366_v12  ;;  %v156_v19 = vld [vmem:[%s3861_s3 + $0x40] sm:$0xff]  ;;  %v157_v20 = vld [vmem:[%s3861_s3 + $0x50] sm:$0xff]  ;;  %3383 = vmatprep.subr.bf16.mxu1 %v3382_v39 }
  0x13   : > { %v158_v21 = vld [vmem:[%s3861_s3 + $0x60] sm:$0xff]  ;;  %v159_v22 = vld [vmem:[%s3861_s3 + $0x70] sm:$0xff] }
  0x14   : > { %v160_v23 = vld [vmem:[%s3861_s3 + $0x80] sm:$0xff]  ;;  %v161_v24 = vld [vmem:[%s3861_s3 + $0x90] sm:$0xff]  ;;  %3385 = vmatpush3.bf16.msra.mxu1 %v3382_v39 }
  0x15   : > { %3369 = vmatpush3.bf16.msra.mxu0 %v3366_v12  ;;  %v162_v25 = vld [vmem:[%s3861_s3 + $0xa0] sm:$0xff]  ;;  %v163_v26 = vld [vmem:[%s3861_s3 + $0xb0] sm:$0xff]  ;;  %3387 = vmatprep.subr.bf16.mxu1 %v3386_v42 }
  0x16   : > { %3371 = vmatprep.subr.bf16.mxu0 %v3370_v15  ;;  %v164_v27 = vld [vmem:[%s3861_s3 + $0xc0] sm:$0xff]  ;;  %v165_v28 = vld [vmem:[%s3861_s3 + $0xd0] sm:$0xff] }
  0x17   : > { %v166_v29 = vld [vmem:[%s3861_s3 + $0xe0] sm:$0xff]  ;;  %v167_v30 = vld [vmem:[%s3861_s3 + $0xf0] sm:$0xff] }
  0x18   : > { %3389 = vmatpush3.bf16.msra.mxu1 %v3386_v42 }
  0x19   : > { %3373 = vmatpush3.bf16.msra.mxu0 %v3370_v15 }
  0x1c   : > { %3147 = vmatmul.mubr.msk.f32.vlgmr.msra.gmra.mrb[0].mxu0 %vm183_vm0, %v153_v16 }
  0x1d   : > { %3149 = vmatprep.mubr.msk.f32.mxu0 %vm183_vm0, %v154_v17 }
  0x20   : > { %3150 = vmatmul.mubr.msk.f32.gmra.mrb[2].mxu0 %vm183_vm0, %v155_v18 }
  0x21   : > { %3152 = vmatprep.mubr.msk.f32.mxu0 %vm183_vm0, %v156_v19 }
  0x24   : > { %3153 = vmatmul.mubr.msk.f32.gmra.mrb[4].mxu0 %vm183_vm0, %v157_v20 }
  0x25   : > { %3155 = vmatprep.mubr.msk.f32.mxu0 %vm183_vm0, %v158_v21 }
  0x28   : > { %3156 = vmatmul.mubr.msk.f32.gmra.mrb[6].mxu0 %vm183_vm0, %v159_v22 }
  0x29   : > { %3158 = vmatprep.mubr.msk.f32.mxu0 %vm183_vm0, %v160_v23 }
  0x2c   : > { %3159 = vmatmul.mubr.msk.f32.gmra.mrb[8].mxu0 %vm183_vm0, %v161_v24 }
  0x2d   : > { %3161 = vmatprep.mubr.msk.f32.mxu0 %vm183_vm0, %v162_v25 }
  0x30   : > { %3162 = vmatmul.mubr.msk.f32.gmra.mrb[10].mxu0 %vm183_vm0, %v163_v26 }
  0x31   : > { %3164 = vmatprep.mubr.msk.f32.mxu0 %vm183_vm0, %v164_v27 }
  0x34   : > { %3165 = vmatmul.mubr.msk.f32.gmra.mrb[12].mxu0 %vm183_vm0, %v165_v28 }
  0x35   : > { %3167 = vmatprep.mubr.msk.f32.mxu0 %vm183_vm0, %v166_v29 }
  0x38   : > { %3168 = vmatmul.mubr.msk.f32.gmra.mrb[14].mxu0 %vm183_vm0, %v167_v30 }
  0xef   : > { %v3148_v44 = vpop.f32.mrb[0].mxu0 }
  0xf0   : > { %v3931_v45 = vadd.f32 %v3148_v44, %v3928_v43  ;;  %v298_v46 = vpop.f32.mrb[1].mxu0 }
  0xf1   : > { %v3934_v47 = vadd.f32 %v3928_v43, %v298_v46 }
  0xf2   : > { %v3937_v48 = vmul.f32 2.0, %v3931_v45 }
  0xf3   : > { %v3940_v49 = vmul.f32 2.0, %v3934_v47  ;;  %v3151_v50 = vpop.f32.mrb[2].mxu0 }
  0xf4   : > { %v410_v51 = vmin.f32 %v3937_v48, 20.0  ;;  %v308_v52 = vpop.f32.mrb[3].mxu0  ;;  %v3945_v54 = vadd.f32 %v3151_v50, %v3928_v43  ;;  %vm394_vm2 = vcmp.gt.f32.partialorder %v3937_v48, 20.0 }
  0xf5   : > { %v409_v53 = vmin.f32 %v3940_v49, 20.0  ;;  %v3948_v55 = vadd.f32 %v3928_v43, %v308_v52  ;;  %vm393_vm4 = vcmp.gt.f32.partialorder %v3940_v49, 20.0 }
  0xf6   : > { %v427_v56 = vmul.f32 1.442695, %v410_v51  ;;  %v3957_v62 = vmul.f32 2.0, %v3945_v54 }
  0xf7   : > { %v425_v57 = vmul.f32 1.442695, %v409_v53  ;;  %v3951_v58 = vmul.f32 2.0, %v3948_v55  ;;  %v3154_v59 = vpop.f32.mrb[4].mxu0 }
  0xf8   : > { %3446 = vpow2.f32 %v427_v56  ;;  %v3954_v60 = vadd.f32 %v3154_v59, %v3928_v43  ;;  %v318_v61 = vpop.f32.mrb[5].mxu0  ;;  %v412_v6 = vmin.f32 %v3957_v62, 20.0  ;;  %vm396_vm8 = vcmp.gt.f32.partialorder %v3957_v62, 20.0 }
  0xf9   : > { %3448 = vpow2.f32 %v425_v57  ;;  %v3960_v63 = vadd.f32 %v3928_v43, %v318_v61  ;;  %v411_v0 = vmin.f32 %v3951_v58, 20.0  ;;  %vm395_vm6 = vcmp.gt.f32.partialorder %v3951_v58, 20.0 }
  0xfa   : > { %v3964_v1 = vmul.f32 2.0, %v3954_v60  ;;  %v431_v16 = vmul.f32 1.442695, %v412_v6 }
  0xfb   : > { %v3157_v2 = vpop.f32.mrb[6].mxu0  ;;  %v3967_v3 = vmul.f32 2.0, %v3960_v63  ;;  %v429_v8 = vmul.f32 1.442695, %v411_v0 }
  0xfc   : > { %v3970_v4 = vadd.f32 %v3157_v2, %v3928_v43  ;;  %v328_v5 = vpop.f32.mrb[7].mxu0  ;;  %v414_v9 = vmin.f32 %v3964_v1, 20.0  ;;  %vm398_vm13 = vcmp.gt.f32.partialorder %v3964_v1, 20.0 }
  0xfd   : > { %v3974_v7 = vadd.f32 %v3928_v43, %v328_v5  ;;  %v413_v13 = vmin.f32 %v3967_v3, 20.0  ;;  %3450 = vpow2.f32 %v429_v8  ;;  %vm397_vm11 = vcmp.gt.f32.partialorder %v3967_v3, 20.0 }
  0xfe   : > { %v3978_v10 = vmul.f32 2.0, %v3970_v4  ;;  %v435_v20 = vmul.f32 1.442695, %v414_v9  ;;  %3452 = vpow2.f32 %v431_v16 }
  0xff   : > { %v3981_v11 = vmul.f32 2.0, %v3974_v7  ;;  %v3160_v12 = vpop.f32.mrb[8].mxu0  ;;  %v433_v27 = vmul.f32 1.442695, %v413_v13 }
 0x100   : > { %v3985_v14 = vadd.f32 %v3160_v12, %v3928_v43  ;;  %v338_v15 = vpop.f32.mrb[9].mxu0  ;;  %v416_v17 = vmin.f32 %v3978_v10, 20.0  ;;  %3454 = vpow2.f32 %v435_v20  ;;  %vm400_vm0 = vcmp.gt.f32.partialorder %v3978_v10, 20.0 }
 0x101   : > { %v3989_v18 = vadd.f32 %v3928_v43, %v338_v15  ;;  %v415_v23 = vmin.f32 %v3981_v11, 20.0  ;;  %vm399_vm14 = vcmp.gt.f32.partialorder %v3981_v11, 20.0 }
 0x102   : > { %v3991_v19 = vpop.eup %3446  ;;  %v3994_v21 = vmul.f32 2.0, %v3985_v14  ;;  %v439_v30 = vmul.f32 1.442695, %v416_v17 }
 0x103   : > { %v3996_v22 = vpop.eup %3448  ;;  %v4000_v24 = vmul.f32 2.0, %v3989_v18  ;;  %v3163_v25 = vpop.f32.mrb[10].mxu0  ;;  %v466_v26 = vadd.f32 1.0, %v3991_v19  ;;  %v437_v36 = vmul.f32 1.442695, %v415_v23  ;;  %v469_v52 = vmul.f32 -0.5, %v3991_v19 }
 0x104   : > { %v4004_v28 = vadd.f32 %v3163_v25, %v3928_v43  ;;  %v348_v29 = vpop.f32.mrb[11].mxu0  ;;  %v418_v31 = vmin.f32 %v3994_v21, 20.0  ;;  %v457_v35 = vadd.f32 1.0, %v3996_v22  ;;  %v460_v5 = vmul.f32 -0.5, %v3996_v22 }
 0x105   : > { %v4008_v32 = vadd.f32 %v3928_v43, %v348_v29  ;;  %v417_v33 = vmin.f32 %v4000_v24, 20.0  ;;  %3456 = vlog2.f32 %v466_v26  ;;  %v470_v13 = vadd.f32 1.0, %v469_v52 }
 0x106   : > { %v4012_v34 = vmul.f32 2.0, %v4004_v28  ;;  %3458 = vpow2.f32 %v433_v27  ;;  %v443_v42 = vmul.f32 1.442695, %v418_v31  ;;  %v472_v20 = vand.u32 2147483647, %v3991_v19 }
 0x107   : > { %v4016_v37 = vmul.f32 2.0, %v4008_v32  ;;  %v3166_v38 = vpop.f32.mrb[12].mxu0  ;;  %3460 = vpow2.f32 %v439_v30  ;;  %v441_v50 = vmul.f32 1.442695, %v417_v33  ;;  %v4033_v57 = vpop.eup %3450  ;;  %v461_v30 = vadd.f32 1.0, %v460_v5 }
 0x108   : > { %v420_v39 = vmin.f32 %v4012_v34, 20.0  ;;  %v4020_v40 = vadd.f32 %v3166_v38, %v3928_v43  ;;  %v358_v41 = vpop.f32.mrb[13].mxu0  ;;  %3462 = vlog2.f32 %v457_v35  ;;  %v4047_v15 = vpop.eup %3452  ;;  %v475_v23 = vadd.f32 1.0, %v4033_v57 }
 0x109   : > { %v419_v44 = vmin.f32 %v4016_v37, 20.0  ;;  %v4024_v46 = vadd.f32 %v3928_v43, %v358_v41  ;;  %3464 = vpow2.f32 %v437_v36  ;;  %v463_v31 = vand.u32 2147483647, %v3996_v22 }
 0x10a   : > { %v4027_v51 = vmul.f32 2.0, %v4020_v40  ;;  %v447_v59 = vmul.f32 1.442695, %v420_v39  ;;  %3466 = vpow2.f32 %v443_v42  ;;  %v4054_v25 = vpop.eup %3454  ;;  %v471_v38 = vmul.f32 %v3991_v19, %v470_v13 }
 0x10b   : > { %v4031_v53 = vmul.f32 2.0, %v4024_v46  ;;  %v3169_v56 = vpop.f32.mrb[14].mxu0  ;;  %v445_v6 = vmul.f32 1.442695, %v419_v44  ;;  %3468 = vpow2.f32 %v441_v50  ;;  %vm4065_vm3 = vcmp.lt.f32.partialorder %v472_v20, 0.0004427343 }
 0x10c   : > { %v422_v61 = vmin.f32 %v4027_v51, 20.0  ;;  %v4037_v0 = vadd.f32 %v3169_v56, %v3928_v43  ;;  %v368_v2 = vpop.f32.mrb[15].mxu0  ;;  %3470 = vpow2.f32 %v447_v59  ;;  %v484_v42 = vadd.f32 1.0, %v4047_v15 }
 0x10d   : > { %v421_v8 = vmin.f32 %v4031_v53, 20.0  ;;  %v4042_v9 = vadd.f32 %v3928_v43, %v368_v2  ;;  %3472 = vpow2.f32 %v445_v6  ;;  %v478_v19 = vmul.f32 -0.5, %v4033_v57 }
 0x10e   : > { %v4045_v12 = vmul.f32 2.0, %v4037_v0  ;;  %v451_v16 = vmul.f32 1.442695, %v422_v61  ;;  %3474 = vlog2.f32 %v475_v23  ;;  %v462_v61 = vmul.f32 %v3996_v22, %v461_v30 }
 0x10f   : > { %v4050_v17 = vmul.f32 2.0, %v4042_v9  ;;  %v449_v43 = vmul.f32 1.442695, %v421_v8  ;;  %v3457_v27 = vpop.eup %3456  ;;  %v487_v2 = vmul.f32 -0.5, %v4047_v15  ;;  %vm464_vm5 = vcmp.lt.f32.partialorder %v463_v31, 0.0004427343 }
 0x110   : > { %v424_v26 = vmin.f32 %v4045_v12, 20.0  ;;  %v4059_v33 = vpop.eup %3458  ;;  %v468_v36 = vmul.f32 0.6931472, %v3457_v27  ;;  %3476 = vpow2.f32 %v451_v16  ;;  %v481_v5 = vand.u32 2147483647, %v4033_v57 }
 0x111   : > { %v423_v29 = vmin.f32 %v4050_v17, 20.0  ;;  %v4062_v39 = vpop.eup %3460  ;;  %3478 = vpow2.f32 %v449_v43  ;;  %v493_v16 = vadd.f32 1.0, %v4059_v33  ;;  %v496_v20 = vmul.f32 -0.5, %v4059_v33 }
 0x112   : > { %v455_v35 = vmul.f32 1.442695, %v424_v26  ;;  %v3463_v44 = vpop.eup %3462  ;;  %v474_v52 = vsel %vm4065_vm3, %v471_v38, %v468_v36  ;;  %v479_v43 = vadd.f32 1.0, %v478_v19  ;;  %v502_v26 = vadd.f32 1.0, %v4054_v25 }
 0x113   : > { %v453_v50 = vmul.f32 1.442695, %v423_v29  ;;  %v4073_v56 = vpop.eup %3464  ;;  %v459_v59 = vmul.f32 0.6931472, %v3463_v44  ;;  %v602_v13 = vmul.f32 0.5, %v474_v52  ;;  %v488_v27 = vadd.f32 1.0, %v487_v2 }
 0x114   : > { %3480 = vpow2.f32 %v455_v35  ;;  %v4079_v6 = vpop.eup %3466  ;;  %v490_v29 = vand.u32 2147483647, %v4047_v15  ;;  %v499_v30 = vand.u32 2147483647, %v4059_v33  ;;  %v505_v36 = vmul.f32 -0.5, %v4054_v25 }
 0x115   : > { %3482 = vlog2.f32 %v484_v42  ;;  %v465_v8 = vsel %vm464_vm5, %v462_v61, %v459_v59  ;;  %v4083_v23 = vpop.eup %3468  ;;  %v511_v38 = vadd.f32 1.0, %v4073_v56  ;;  %v618_v42 = vsel %vm394_vm2, %v3931_v45, %v602_v13 }
 0x116   : > { %3484 = vpow2.f32 %v453_v50  ;;  %v601_v22 = vmul.f32 0.5, %v465_v8  ;;  %v4089_v31 = vpop.eup %3470  ;;  %vm4102_vm7 = vcmp.lt.f32.partialorder %v481_v5, 0.0004427343  ;;  %v497_v50 = vadd.f32 1.0, %v496_v20 }
 0x117   : > { %3486 = vlog2.f32 %v493_v16  ;;  %v4096_v41 = vpop.eup %3472  ;;  %v480_v52 = vmul.f32 %v4033_v57, %v479_v43  ;;  %v508_v19 = vand.u32 2147483647, %v4054_v25  ;;  %v520_v59 = vadd.f32 1.0, %v4062_v39 }
 0x118   : > { %v617_v35 = vsel %vm393_vm4, %v3934_v47, %v601_v22  ;;  %3488 = vlog2.f32 %v502_v26  ;;  %v514_v47 = vmul.f32 -0.5, %v4073_v56  ;;  %v3475_v49 = vpop.eup %3474  ;;  %v489_v48 = vmul.f32 %v4047_v15, %v488_v27 }
 0x119   : > { %3186 = vmatprep.mubr.msk.f32.mxu1 %vm646_vm1, %v617_v35  ;;  %3490 = vlog2.f32 %v511_v38  ;;  %v477_v45 = vmul.f32 0.6931472, %v3475_v49  ;;  %vm4115_vm9 = vcmp.lt.f32.partialorder %v490_v29, 0.0004427343  ;;  %v523_v5 = vmul.f32 -0.5, %v4062_v39 }
 0x11a   : > { %3187 = vmatmul.mubr.msk.f32.vlgmr.msra.gmra.mrb[0].mxu1 %vm646_vm1, %v618_v42  ;;  %v4111_v61 = vpop.eup %3476  ;;  %vm4122_vm10 = vcmp.lt.f32.partialorder %v499_v30, 0.0004427343  ;;  %v506_v13 = vadd.f32 1.0, %v505_v36  ;;  %3492 = vlog2.f32 %v520_v59  ;;  %v529_v16 = vadd.f32 1.0, %v4083_v23 }
 0x11b   : > { %v4120_v8 = vpop.eup %3478  ;;  %v483_v15 = vsel %vm4102_vm7, %v480_v52, %v477_v45  ;;  %v498_v22 = vmul.f32 %v4059_v33, %v497_v50  ;;  %v515_v43 = vadd.f32 1.0, %v514_v47  ;;  %v517_v26 = vand.u32 2147483647, %v4073_v56 }
 0x11c   : > { %v603_v29 = vmul.f32 0.5, %v483_v15  ;;  %vm4134_vm12 = vcmp.lt.f32.partialorder %v508_v19, 0.0004427343  ;;  %v526_v35 = vand.u32 2147483647, %v4062_v39  ;;  %3494 = vlog2.f32 %v529_v16 }
 0x11d   : > { %v524_v38 = vadd.f32 1.0, %v523_v5  ;;  %v532_v33 = vmul.f32 -0.5, %v4083_v23  ;;  %v538_v42 = vadd.f32 1.0, %v4079_v6  ;;  %v507_v47 = vmul.f32 %v4054_v25, %v506_v13 }
 0x11e   : > { %v4127_v20 = vpop.eup %3480  ;;  %v619_v50 = vsel %vm395_vm6, %v3948_v55, %v603_v29  ;;  %v535_v49 = vand.u32 2147483647, %v4083_v23  ;;  %v547_v52 = vadd.f32 1.0, %v4096_v41  ;;  %v516_v45 = vmul.f32 %v4073_v56, %v515_v43 }
 0x11f   : > { %v3483_v27 = vpop.eup %3482  ;;  %3189 = vmatprep.mubr.msk.f32.mxu1 %vm646_vm1, %v619_v50  ;;  %vm4155_vm15 = vcmp.lt.f32.partialorder %v517_v26, 0.0004427343  ;;  %3496 = vlog2.f32 %v538_v42  ;;  %v541_v13 = vmul.f32 -0.5, %v4079_v6  ;;  %v525_v15 = vmul.f32 %v4062_v39, %v524_v38 }
 0x120   : > { %v486_v36 = vmul.f32 0.6931472, %v3483_v27  ;;  %v4142_v44 = vpop.eup %3484  ;;  %3498 = vlog2.f32 %v547_v52  ;;  %vm4162_vm2 = vcmp.lt.f32.partialorder %v526_v35, 0.0004427343  ;;  %v533_v56 = vadd.f32 1.0, %v532_v33 }
 0x121   : > { %v3487_v19 = vpop.eup %3486  ;;  %vm4171_vm3 = vcmp.lt.f32.partialorder %v535_v49, 0.0004427343  ;;  %v556_v29 = vadd.f32 1.0, %v4089_v31  ;;  %vm401_vm4 = vcmp.gt.f32.partialorder %v4000_v24, 20.0  ;;  %v544_v38 = vand.u32 2147483647, %v4079_v6 }
 0x122   : > { %v492_v59 = vsel %vm4115_vm9, %v489_v48, %v486_v36  ;;  %v3489_v55 = vpop.eup %3488  ;;  %v495_v25 = vmul.f32 0.6931472, %v3487_v19  ;;  %v553_v30 = vand.u32 2147483647, %v4096_v41  ;;  %v534_v19 = vmul.f32 %v4083_v23, %v533_v56 }
 0x123   : > { %v604_v58 = vmul.f32 0.5, %v492_v59  ;;  %v504_v16 = vmul.f32 0.6931472, %v3489_v55  ;;  %v3491_v2 = vpop.eup %3490  ;;  %3500 = vlog2.f32 %v556_v29  ;;  %v559_v59 = vmul.f32 -0.5, %v4089_v31 }
 0x124   : > { %v501_v26 = vsel %vm4122_vm10, %v498_v22, %v495_v25  ;;  %v513_v36 = vmul.f32 0.6931472, %v3491_v2  ;;  %v3493_v62 = vpop.eup %3492  ;;  %v542_v22 = vadd.f32 1.0, %v541_v13  ;;  %v565_v5 = vadd.f32 1.0, %v4120_v8 }
 0x125   : > { %v620_v43 = vsel %vm396_vm8, %v3945_v54, %v604_v58  ;;  %v605_v39 = vmul.f32 0.5, %v501_v26  ;;  %v510_v35 = vsel %vm4134_vm12, %v507_v47, %v504_v16  ;;  %v550_v54 = vmul.f32 -0.5, %v4096_v41 }
 0x126   : > { %3190 = vmatmul.mubr.msk.f32.gmra.mrb[2].mxu1 %vm646_vm1, %v620_v43  ;;  %v606_v57 = vmul.f32 0.5, %v510_v35  ;;  %v519_v42 = vsel %vm4155_vm15, %v516_v45, %v513_v36  ;;  %v522_v50 = vmul.f32 0.6931472, %v3493_v62  ;;  %v3495_v47 = vpop.eup %3494  ;;  %vm4202_vm5 = vcmp.lt.f32.partialorder %v544_v38, 0.0004427343 }
 0x127   : > { %v621_v33 = vsel %vm397_vm11, %v3960_v63, %v605_v39  ;;  %v607_v52 = vmul.f32 0.5, %v519_v42  ;;  %v531_v3 = vmul.f32 0.6931472, %v3495_v47  ;;  %v551_v45 = vadd.f32 1.0, %v550_v54 }
 0x128   : > { %3192 = vmatprep.mubr.msk.f32.mxu1 %vm646_vm1, %v621_v33  ;;  %v622_v49 = vsel %vm398_vm13, %v3954_v60, %v606_v57  ;;  %v528_v63 = vsel %vm4162_vm2, %v525_v15, %v522_v50  ;;  %v543_v60 = vmul.f32 %v4079_v6, %v542_v22  ;;  %vm4209_vm6 = vcmp.lt.f32.partialorder %v553_v30, 0.0004427343 }
 0x129   : > { %v623_v55 = vsel %vm399_vm14, %v3974_v7, %v607_v52  ;;  %v608_v1 = vmul.f32 0.5, %v528_v63  ;;  %v3497_v58 = vpop.eup %3496  ;;  %v537_v25 = vsel %vm4171_vm3, %v534_v19, %v531_v3  ;;  %3502 = vlog2.f32 %v565_v5 }
 0x12a   : > { %3193 = vmatmul.mubr.msk.f32.gmra.mrb[4].mxu1 %vm646_vm1, %v622_v49  ;;  %v574_v7 = vadd.f32 1.0, %v4111_v61  ;;  %v3499_v11 = vpop.eup %3498  ;;  %v609_v16 = vmul.f32 0.5, %v537_v25  ;;  %v540_v15 = vmul.f32 0.6931472, %v3497_v58  ;;  %v560_v48 = vadd.f32 1.0, %v559_v59 }
 0x12b   : > { %3195 = vmatprep.mubr.msk.f32.mxu1 %vm646_vm1, %v623_v55  ;;  %v624_v6 = vsel %vm400_vm0, %v3970_v4, %v608_v1  ;;  %v549_v56 = vmul.f32 0.6931472, %v3499_v11  ;;  %v552_v2 = vmul.f32 %v4096_v41, %v551_v45  ;;  %v562_v43 = vand.u32 2147483647, %v4089_v31 }
 0x12c   : > { %3504 = vlog2.f32 %v574_v7  ;;  %v625_v26 = vsel %vm401_vm4, %v3989_v18, %v609_v16  ;;  %v546_v27 = vsel %vm4202_vm5, %v543_v60, %v540_v15  ;;  %v568_v4 = vmul.f32 -0.5, %v4120_v8  ;;  %v1101_v16 = vld [vmem:[%s5841_s1 + $0xb8] sm:$0xff] }
 0x12d   : > { %v583_v10 = vadd.f32 1.0, %v4142_v44  ;;  %vm402_vm7 = vcmp.gt.f32.partialorder %v3994_v21, 20.0  ;;  %v610_v29 = vmul.f32 0.5, %v546_v27  ;;  %v555_v41 = vsel %vm4209_vm6, %v552_v2, %v549_v56  ;;  %v3501_v39 = vpop.eup %3500  ;;  %v1103_v56 = vld [vmem:[%s5841_s1 + $0xc8] sm:$0xff] }
 0x12e   : > { %3196 = vmatmul.mubr.msk.f32.gmra.mrb[6].mxu1 %vm646_vm1, %v624_v6  ;;  %vm403_vm8 = vcmp.gt.f32.partialorder %v4016_v37, 20.0  ;;  %v611_v24 = vmul.f32 0.5, %v555_v41  ;;  %v577_v18 = vmul.f32 -0.5, %v4111_v61  ;;  %v558_v36 = vmul.f32 0.6931472, %v3501_v39  ;;  %v1100_v6 = vld [vmem:[%s5841_s1 + $0xb0] sm:$0xff] }
 0x12f   : > { %3198 = vmatprep.mubr.msk.f32.mxu1 %vm646_vm1, %v625_v26  ;;  %3506 = vlog2.f32 %v583_v10  ;;  %v626_v35 = vsel %vm402_vm7, %v3985_v14, %v610_v29  ;;  %v561_v54 = vmul.f32 %v4089_v31, %v560_v48  ;;  %vm563_vm9 = vcmp.lt.f32.partialorder %v562_v43, 0.0004427343  ;;  %v1102_v48 = vld [vmem:[%s5841_s1 + $0xc0] sm:$0xff]  ;;  %v4291_v43 = vld [vmem:[%s5841_s1 + $0xd1] ss:$0 sm:$0xff] }
 0x130   : > { %v627_v21 = vsel %vm403_vm8, %v4008_v32, %v611_v24  ;;  %v569_v62 = vadd.f32 1.0, %v568_v4  ;;  %v586_v57 = vmul.f32 -0.5, %v4142_v44  ;;  %v592_v22 = vadd.f32 1.0, %v4127_v20 }
 0x131   : > { %v564_v37 = vsel %vm563_vm9, %v561_v54, %v558_v36  ;;  %v571_v38 = vand.u32 2147483647, %v4120_v8  ;;  %v578_v14 = vadd.f32 1.0, %v577_v18  ;;  %vm404_vm10 = vcmp.gt.f32.partialorder %v4012_v34, 20.0 }
 0x132   : > { %3199 = vmatmul.mubr.msk.f32.gmra.mrb[8].mxu1 %vm646_vm1, %v626_v35  ;;  %v612_v33 = vmul.f32 0.5, %v564_v37  ;;  %3508 = vlog2.f32 %v592_v22  ;;  %v580_v31 = vand.u32 2147483647, %v4111_v61  ;;  %v570_v30 = vmul.f32 %v4120_v8, %v569_v62 }
 0x133   : > { %3201 = vmatprep.mubr.msk.f32.mxu1 %vm646_vm1, %v627_v21  ;;  %v3503_v42 = vpop.eup %3502  ;;  %v587_v47 = vadd.f32 1.0, %v586_v57  ;;  %vm572_vm11 = vcmp.lt.f32.partialorder %v571_v38, 0.0004427343  ;;  %v595_v52 = vmul.f32 -0.5, %v4127_v20  ;;  %v579_v63 = vmul.f32 %v4111_v61, %v578_v14 }
 0x134   : > { %v628_v32 = vsel %vm404_vm10, %v4004_v28, %v612_v33  ;;  %v567_v50 = vmul.f32 0.6931472, %v3503_v42  ;;  %v589_v34 = vand.u32 2147483647, %v4142_v44  ;;  %vm581_vm12 = vcmp.lt.f32.partialorder %v580_v31, 0.0004427343 }
 0x135   : > { %vm405_vm13 = vcmp.gt.f32.partialorder %v4031_v53, 20.0  ;;  %v588_v8 = vmul.f32 %v4142_v44, %v587_v47  ;;  %v596_v60 = vadd.f32 1.0, %v595_v52  ;;  %vm406_vm14 = vcmp.gt.f32.partialorder %v4027_v51, 20.0 }
 0x136   : > { %v3505_v49 = vpop.eup %3504  ;;  %3202 = vmatmul.mubr.msk.f32.gmra.mrb[10].mxu1 %vm646_vm1, %v628_v32  ;;  %v573_v19 = vsel %vm572_vm11, %v570_v30, %v567_v50  ;;  %vm590_vm15 = vcmp.lt.f32.partialorder %v589_v34, 0.0004427343  ;;  %v598_v61 = vand.u32 2147483647, %v4127_v20  ;;  %vm407_vm0 = vcmp.gt.f32.partialorder %v4050_v17, 20.0  ;;  %v1096_v17 = vld [vmem:[%s5841_s1 + $0x90] sm:$0xff] }
 0x137   : > { %v576_v59 = vmul.f32 0.6931472, %v3505_v49  ;;  %v613_v3 = vmul.f32 0.5, %v573_v19  ;;  %v597_v44 = vmul.f32 %v4127_v20, %v596_v60  ;;  %vm408_vm3 = vcmp.gt.f32.partialorder %v4045_v12, 20.0  ;;  %v1097_v20 = vld [vmem:[%s5841_s1 + $0x98] sm:$0xff]  ;;  %v1099_v12 = vld [vmem:[%s5841_s1 + $0xa8] sm:$0xff] }
 0x138   : > { %vm599_vm2 = vcmp.lt.f32.partialorder %v598_v61, 0.0004427343  ;;  %v3390_v11 = vpack.c.bf16 %v1097_v20, %v1096_v17  ;;  %v3398_v15 = vpack.c.bf16 %v1101_v16, %v1100_v6  ;;  %v3402_v2 = vpack.c.bf16 %v1103_v56, %v1102_v48 }
 0x139   : > { %v3507_v45 = vpop.eup %3506  ;;  %v582_v28 = vsel %vm581_vm12, %v579_v63, %v576_v59  ;;  %v629_v5 = vsel %vm405_vm13, %v4024_v46, %v613_v3 }
 0x13a   : > { %v614_v55 = vmul.f32 0.5, %v582_v28  ;;  %v585_v1 = vmul.f32 0.6931472, %v3507_v45  ;;  %3204 = vmatprep.mubr.msk.f32.mxu1 %vm646_vm1, %v629_v5  ;;  %3391 = vmatprep.subr.bf16.mxu1 %v3390_v11 }
 0x13b   : > { %3393 = vmatpush3.bf16.msra.mxu1 %v3390_v11 }
 0x13c   : > { %v630_v23 = vsel %vm406_vm14, %v4020_v40, %v614_v55  ;;  %v591_v58 = vsel %vm590_vm15, %v588_v8, %v585_v1  ;;  %v3509_v25 = vpop.eup %3508 }
 0x13d   : > { %3205 = vmatmul.mubr.msk.f32.gmra.mrb[12].mxu1 %vm646_vm1, %v630_v23  ;;  %v615_v53 = vmul.f32 0.5, %v591_v58  ;;  %v594_v46 = vmul.f32 0.6931472, %v3509_v25 }
 0x13f   : > { %v631_v13 = vsel %vm407_vm0, %v4042_v9, %v615_v53  ;;  %v600_v51 = vsel %vm599_vm2, %v597_v44, %v594_v46  ;;  %v1098_v9 = vld [vmem:[%s5841_s1 + $0xa0] sm:$0xff] }
 0x140   : > { %3207 = vmatprep.mubr.msk.f32.mxu1 %vm646_vm1, %v631_v13  ;;  %v616_v7 = vmul.f32 0.5, %v600_v51 }
 0x142   : > { %v632_v40 = vsel %vm408_vm3, %v4037_v0, %v616_v7  ;;  %v3394_v0 = vpack.c.bf16 %v1099_v12, %v1098_v9 }
 0x143   : > { %3208 = vmatmul.mubr.msk.f32.gmra.mrb[14].mxu1 %vm646_vm1, %v632_v40 }
 0x144   : > { %3395 = vmatprep.subr.bf16.mxu1 %v3394_v0 }
 0x145   : > { %3397 = vmatpush3.bf16.msra.mxu1 %v3394_v0 }
 0x146   : > { %3399 = vmatprep.subr.bf16.mxu1 %v3398_v15 }
 0x149   : > { %3401 = vmatpush3.bf16.msra.mxu1 %v3398_v15 }
 0x14a   : > { %3403 = vmatprep.subr.bf16.mxu1 %v3402_v2 }
 0x14d   : > { %3405 = vmatpush3.bf16.msra.mxu1 %v3402_v2 }
 0x1ed   : > { %v3188_v26 = vpop.f32.mrb[0].mxu1 }
 0x1ee   : > { %v4294_v27 = vadd.f32 %v3188_v26, %v4291_v43  ;;  %v761_v4 = vpop.f32.mrb[1].mxu1 }
 0x1ef   : > { %v4297_v10 = vadd.f32 %v4291_v43, %v761_v4 }
 0x1f0   : > { %v4300_v29 = vmul.f32 2.0, %v4294_v27 }
 0x1f1   : > { %v4303_v41 = vmul.f32 2.0, %v4297_v10 }
 0x1f2   : > { %v873_v39 = vmin.f32 %v4300_v29, 20.0  ;;  %vm857_vm6 = vcmp.gt.f32.partialorder %v4300_v29, 20.0 }
 0x1f3   : > { %v872_v24 = vmin.f32 %v4303_v41, 20.0  ;;  %vm856_vm5 = vcmp.gt.f32.partialorder %v4303_v41, 20.0 }
 0x1f4   : > { %v890_v18 = vmul.f32 1.442695, %v873_v39 }
 0x1f5   : > { %v888_v35 = vmul.f32 1.442695, %v872_v24 }
 0x1f6   : > { %3510 = vpow2.f32 %v890_v18 }
 0x1f7   : > { %3512 = vpow2.f32 %v888_v35 }
 0x1f9   : > { %v3191_v36 = vpop.f32.mrb[2].mxu1 }
 0x1fa   : > { %v4308_v54 = vadd.f32 %v3191_v36, %v4291_v43  ;;  %v771_v21 = vpop.f32.mrb[3].mxu1 }
 0x1fb   : > { %v4311_v62 = vadd.f32 %v4291_v43, %v771_v21 }
 0x1fc   : > { %v4314_v57 = vmul.f32 2.0, %v4308_v54 }
 0x1fd   : > { %v4317_v22 = vmul.f32 2.0, %v4311_v62  ;;  %v3194_v37 = vpop.f32.mrb[4].mxu1 }
 0x1fe   : > { %v875_v38 = vmin.f32 %v4314_v57, 20.0  ;;  %v4321_v33 = vadd.f32 %v3194_v37, %v4291_v43  ;;  %v781_v14 = vpop.f32.mrb[5].mxu1  ;;  %vm859_vm8 = vcmp.gt.f32.partialorder %v4314_v57, 20.0 }
 0x1ff   : > { %v874_v42 = vmin.f32 %v4317_v22, 20.0  ;;  %v4325_v31 = vadd.f32 %v4291_v43, %v781_v14  ;;  %vm858_vm9 = vcmp.gt.f32.partialorder %v4317_v22, 20.0 }
 0x200   : > { %v894_v32 = vmul.f32 1.442695, %v875_v38  ;;  %v3511_v50 = vpop.eup %3510  ;;  %v4328_v47 = vmul.f32 2.0, %v4321_v33 }
 0x201   : > { %v892_v30 = vmul.f32 1.442695, %v874_v42  ;;  %v4331_v49 = vmul.f32 2.0, %v4325_v31  ;;  %v3197_v52 = vpop.f32.mrb[6].mxu1  ;;  %v929_v19 = vadd.f32 1.0, %v3511_v50  ;;  %v4333_v63 = vpop.eup %3512  ;;  %v932_v58 = vmul.f32 -0.5, %v3511_v50 }
 0x202   : > { %3514 = vpow2.f32 %v894_v32  ;;  %v791_v59 = vpop.f32.mrb[7].mxu1  ;;  %v877_v3 = vmin.f32 %v4328_v47, 20.0  ;;  %v4338_v45 = vadd.f32 %v3197_v52, %v4291_v43  ;;  %v920_v55 = vadd.f32 1.0, %v4333_v63 }
 0x203   : > { %3516 = vpow2.f32 %v892_v30  ;;  %v876_v34 = vmin.f32 %v4331_v49, 20.0  ;;  %v4341_v28 = vadd.f32 %v4291_v43, %v791_v59  ;;  %v923_v13 = vmul.f32 -0.5, %v4333_v63 }
 0x204   : > { %3518 = vlog2.f32 %v929_v19  ;;  %v4345_v1 = vmul.f32 2.0, %v4338_v45  ;;  %v898_v53 = vmul.f32 1.442695, %v877_v3  ;;  %v933_v20 = vadd.f32 1.0, %v932_v58 }
 0x205   : > { %v896_v8 = vmul.f32 1.442695, %v876_v34  ;;  %v3200_v5 = vpop.f32.mrb[8].mxu1  ;;  %v4348_v60 = vmul.f32 2.0, %v4341_v28  ;;  %v935_v9 = vand.u32 2147483647, %v3511_v50 }
 0x206   : > { %v4351_v61 = vadd.f32 %v3200_v5, %v4291_v43  ;;  %v801_v23 = vpop.f32.mrb[9].mxu1  ;;  %v879_v46 = vmin.f32 %v4345_v1, 20.0  ;;  %v924_v56 = vadd.f32 1.0, %v923_v13  ;;  %v934_v35 = vmul.f32 %v3511_v50, %v933_v20 }
 0x207   : > { %v4354_v25 = vadd.f32 %v4291_v43, %v801_v23  ;;  %3520 = vpow2.f32 %v896_v8  ;;  %v878_v51 = vmin.f32 %v4348_v60, 20.0  ;;  %vm4382_vm4 = vcmp.lt.f32.partialorder %v935_v9, 0.0004427343 }
 0x208   : > { %v4358_v44 = vmul.f32 2.0, %v4351_v61  ;;  %3522 = vlog2.f32 %v920_v55  ;;  %v902_v0 = vmul.f32 1.442695, %v879_v46  ;;  %v925_v14 = vmul.f32 %v4333_v63, %v924_v56 }
 0x209   : > { %v4363_v7 = vmul.f32 2.0, %v4354_v25  ;;  %v3203_v40 = vpop.f32.mrb[10].mxu1  ;;  %3524 = vpow2.f32 %v898_v53  ;;  %v900_v26 = vmul.f32 1.442695, %v878_v51  ;;  %v926_v42 = vand.u32 2147483647, %v4333_v63 }
 0x20a   : > { %v811_v11 = vpop.f32.mrb[11].mxu1  ;;  %v4370_v6 = vadd.f32 %v3203_v40, %v4291_v43  ;;  %v881_v48 = vmin.f32 %v4358_v44, 20.0  ;;  %3526 = vpow2.f32 %v902_v0  ;;  %vm860_vm12 = vcmp.gt.f32.partialorder %v4331_v49, 20.0 }
 0x20b   : > { %v4373_v16 = vadd.f32 %v4291_v43, %v811_v11  ;;  %v880_v4 = vmin.f32 %v4363_v7, 20.0  ;;  %vm927_vm7 = vcmp.lt.f32.partialorder %v926_v42, 0.0004427343  ;;  %vm861_vm13 = vcmp.gt.f32.partialorder %v4328_v47, 20.0 }
 0x20c   : > { %v4365_v17 = vpop.eup %3514  ;;  %v4388_v21 = vmul.f32 2.0, %v4370_v6  ;;  %v906_v37 = vmul.f32 1.442695, %v881_v48  ;;  %vm862_vm0 = vcmp.gt.f32.partialorder %v4348_v60, 20.0  ;;  %vm863_vm3 = vcmp.gt.f32.partialorder %v4345_v1, 20.0 }
 0x20d   : > { %v4367_v12 = vpop.eup %3516  ;;  %v4379_v24 = vmul.f32 2.0, %v4373_v16  ;;  %v947_v18 = vadd.f32 1.0, %v4365_v17  ;;  %v904_v50 = vmul.f32 1.442695, %v880_v4  ;;  %v950_v23 = vmul.f32 -0.5, %v4365_v17 }
 0x20e   : > { %v3519_v15 = vpop.eup %3518  ;;  %v938_v2 = vadd.f32 1.0, %v4367_v12  ;;  %v941_v19 = vmul.f32 -0.5, %v4367_v12  ;;  %v883_v63 = vmin.f32 %v4388_v21, 20.0  ;;  %v944_v53 = vand.u32 2147483647, %v4367_v12 }
 0x20f   : > { %v931_v39 = vmul.f32 0.6931472, %v3519_v15  ;;  %v882_v3 = vmin.f32 %v4379_v24, 20.0 }
 0x210   : > { %v3206_v38 = vpop.f32.mrb[12].mxu1  ;;  %3528 = vlog2.f32 %v938_v2  ;;  %v942_v0 = vadd.f32 1.0, %v941_v19  ;;  %v910_v15 = vmul.f32 1.442695, %v883_v63  ;;  %v951_v2 = vadd.f32 1.0, %v950_v23 }
 0x211   : > { %v4393_v32 = vpop.eup %3520  ;;  %3530 = vpow2.f32 %v900_v26  ;;  %v4396_v30 = vadd.f32 %v3206_v38, %v4291_v43  ;;  %v821_v52 = vpop.f32.mrb[13].mxu1  ;;  %v937_v34 = vsel %vm4382_vm4, %v934_v35, %v931_v39  ;;  %v908_v20 = vmul.f32 1.442695, %v882_v3 }
 0x212   : > { %v3523_v59 = vpop.eup %3522  ;;  %v4403_v8 = vadd.f32 %v4291_v43, %v821_v52  ;;  %3532 = vlog2.f32 %v947_v18  ;;  %v1065_v13 = vmul.f32 0.5, %v937_v34  ;;  %v956_v40 = vadd.f32 1.0, %v4393_v32 }
 0x213   : > { %v4407_v5 = vmul.f32 2.0, %v4396_v30  ;;  %v922_v55 = vmul.f32 0.6931472, %v3523_v59  ;;  %3534 = vpow2.f32 %v906_v37  ;;  %v4414_v46 = vpop.eup %3524  ;;  %v959_v18 = vmul.f32 -0.5, %v4393_v32 }
 0x214   : > { %v4411_v58 = vmul.f32 2.0, %v4403_v8  ;;  %3536 = vpow2.f32 %v904_v50  ;;  %v965_v35 = vadd.f32 1.0, %v4414_v46  ;;  %v4427_v36 = vpop.eup %3526  ;;  %v1081_v37 = vsel %vm857_vm6, %v4294_v27, %v1065_v13 }
 0x215   : > { %v928_v51 = vsel %vm927_vm7, %v925_v14, %v922_v55  ;;  %v885_v48 = vmin.f32 %v4407_v5, 20.0  ;;  %3538 = vlog2.f32 %v956_v40  ;;  %v943_v42 = vmul.f32 %v4367_v12, %v942_v0 }
 0x216   : > { %v884_v9 = vmin.f32 %v4411_v58, 20.0  ;;  %v1064_v11 = vmul.f32 0.5, %v928_v51  ;;  %v3209_v56 = vpop.f32.mrb[14].mxu1  ;;  %3540 = vpow2.f32 %v908_v20  ;;  %vm4441_vm10 = vcmp.lt.f32.partialorder %v944_v53, 0.0004427343 }
 0x217   : > { %v4420_v26 = vadd.f32 %v3209_v56, %v4291_v43  ;;  %v831_v4 = vpop.f32.mrb[15].mxu1  ;;  %3542 = vlog2.f32 %v965_v35  ;;  %v914_v59 = vmul.f32 1.442695, %v885_v48  ;;  %v952_v34 = vmul.f32 %v4365_v17, %v951_v2 }
 0x218   : > { %v1080_v39 = vsel %vm856_vm5, %v4297_v10, %v1064_v11  ;;  %v4435_v38 = vadd.f32 %v4291_v43, %v831_v4  ;;  %v953_v10 = vand.u32 2147483647, %v4365_v17  ;;  %v912_v14 = vmul.f32 1.442695, %v884_v9 }
 0x219   : > { %3226 = vmatprep.mubr.msk.f32.mxu1 %vm646_vm1, %v1080_v39  ;;  %v4448_v43 = vmul.f32 2.0, %v4420_v26  ;;  %3544 = vpow2.f32 %v910_v15  ;;  %v960_v12 = vadd.f32 1.0, %v959_v18  ;;  %v968_v23 = vmul.f32 -0.5, %v4414_v46 }
 0x21a   : > { %v3529_v41 = vpop.eup %3528  ;;  %3227 = vmatmul.mubr.msk.f32.vlgmr.msra.gmra.mrb[16].mxu1 %vm646_vm1, %v1081_v37  ;;  %v4451_v50 = vmul.f32 2.0, %v4435_v38  ;;  %3546 = vpow2.f32 %v912_v14  ;;  %vm954_vm11 = vcmp.lt.f32.partialorder %v953_v10, 0.0004427343  ;;  %v962_v9 = vand.u32 2147483647, %v4393_v32 }
 0x21b   : > { %v4445_v29 = vpop.eup %3530  ;;  %v940_v52 = vmul.f32 0.6931472, %v3529_v41  ;;  %v887_v17 = vmin.f32 %v4448_v43, 20.0  ;;  %v971_v11 = vand.u32 2147483647, %v4414_v46  ;;  %v983_v56 = vadd.f32 1.0, %v4427_v36 }
 0x21c   : > { %v3533_v19 = vpop.eup %3532  ;;  %v886_v3 = vmin.f32 %v4451_v50, 20.0  ;;  %v974_v51 = vadd.f32 1.0, %v4445_v29  ;;  %3548 = vpow2.f32 %v914_v59  ;;  %v961_v4 = vmul.f32 %v4393_v32, %v960_v12 }
 0x21d   : > { %v946_v63 = vsel %vm4441_vm10, %v943_v42, %v940_v52  ;;  %v949_v55 = vmul.f32 0.6931472, %v3533_v19  ;;  %v4458_v53 = vpop.eup %3534  ;;  %v969_v39 = vadd.f32 1.0, %v968_v23  ;;  %vm963_vm14 = vcmp.lt.f32.partialorder %v962_v9, 0.0004427343 }
 0x21e   : > { %v1066_v13 = vmul.f32 0.5, %v946_v63  ;;  %v4461_v40 = vpop.eup %3536  ;;  %v916_v0 = vmul.f32 1.442695, %v886_v3  ;;  %3550 = vlog2.f32 %v974_v51  ;;  %vm4479_vm15 = vcmp.lt.f32.partialorder %v971_v11, 0.0004427343 }
 0x21f   : > { %v955_v20 = vsel %vm954_vm11, %v952_v34, %v949_v55  ;;  %v3539_v2 = vpop.eup %3538  ;;  %3552 = vlog2.f32 %v983_v56  ;;  %v992_v32 = vadd.f32 1.0, %v4461_v40  ;;  %v918_v10 = vmul.f32 1.442695, %v887_v17 }
 0x220   : > { %v1082_v15 = vsel %vm858_vm9, %v4311_v62, %v1066_v13  ;;  %v1067_v48 = vmul.f32 0.5, %v955_v20  ;;  %v958_v22 = vmul.f32 0.6931472, %v3539_v2  ;;  %v977_v62 = vmul.f32 -0.5, %v4445_v29  ;;  %v4484_v37 = vpop.eup %3540 }
 0x221   : > { %3229 = vmatprep.mubr.msk.f32.mxu1 %vm646_vm1, %v1082_v15  ;;  %3554 = vpow2.f32 %v916_v0  ;;  %v3543_v41 = vpop.eup %3542  ;;  %v980_v42 = vand.u32 2147483647, %v4445_v29  ;;  %v1001_v27 = vadd.f32 1.0, %v4458_v53  ;;  %v970_v59 = vmul.f32 %v4414_v46, %v969_v39 }
 0x222   : > { %v1083_v18 = vsel %vm859_vm8, %v4308_v54, %v1067_v48  ;;  %v964_v57 = vsel %vm963_vm14, %v961_v4, %v958_v22  ;;  %v986_v54 = vmul.f32 -0.5, %v4427_v36  ;;  %3556 = vlog2.f32 %v992_v32 }
 0x223   : > { %3230 = vmatmul.mubr.msk.f32.gmra.mrb[18].mxu1 %vm646_vm1, %v1083_v18  ;;  %v1068_v14 = vmul.f32 0.5, %v964_v57  ;;  %v4489_v52 = vpop.eup %3544  ;;  %v967_v19 = vmul.f32 0.6931472, %v3543_v41  ;;  %v978_v34 = vadd.f32 1.0, %v977_v62  ;;  %v995_v12 = vmul.f32 -0.5, %v4461_v40 }
 0x224   : > { %3558 = vlog2.f32 %v1001_v27  ;;  %v1004_v63 = vmul.f32 -0.5, %v4458_v53  ;;  %v1010_v55 = vadd.f32 1.0, %v4484_v37  ;;  %v4498_v23 = vpop.eup %3546  ;;  %v987_v13 = vadd.f32 1.0, %v986_v54 }
 0x225   : > { %v1084_v3 = vsel %vm860_vm12, %v4325_v31, %v1068_v14  ;;  %3560 = vpow2.f32 %v918_v10  ;;  %v973_v46 = vsel %vm4479_vm15, %v970_v59, %v967_v19  ;;  %v989_v51 = vand.u32 2147483647, %v4427_v36 }
 0x226   : > { %3232 = vmatprep.mubr.msk.f32.mxu1 %vm646_vm1, %v1084_v3  ;;  %v1069_v49 = vmul.f32 0.5, %v973_v46  ;;  %vm4505_vm2 = vcmp.lt.f32.partialorder %v980_v42, 0.0004427343  ;;  %v998_v17 = vand.u32 2147483647, %v4461_v40  ;;  %3562 = vlog2.f32 %v1010_v55  ;;  %v4514_v15 = vpop.eup %3548 }
 0x227   : > { %v979_v20 = vmul.f32 %v4445_v29, %v978_v34  ;;  %v996_v9 = vadd.f32 1.0, %v995_v12  ;;  %v1007_v11 = vand.u32 2147483647, %v4458_v53  ;;  %v1019_v0 = vadd.f32 1.0, %v4489_v52 }
 0x228   : > { %v1085_v48 = vsel %vm861_vm13, %v4321_v33, %v1069_v49  ;;  %v1005_v56 = vadd.f32 1.0, %v1004_v63  ;;  %v1013_v2 = vmul.f32 -0.5, %v4484_v37  ;;  %v1028_v4 = vadd.f32 1.0, %v4498_v23  ;;  %v3551_v39 = vpop.eup %3550 }
 0x229   : > { %vm864_vm4 = vcmp.gt.f32.partialorder %v4363_v7, 20.0  ;;  %3233 = vmatmul.mubr.msk.f32.gmra.mrb[20].mxu1 %vm646_vm1, %v1085_v48  ;;  %v988_v29 = vmul.f32 %v4427_v36, %v987_v13  ;;  %vm4524_vm5 = vcmp.lt.f32.partialorder %v989_v51, 0.0004427343  ;;  %v1016_v22 = vand.u32 2147483647, %v4484_v37  ;;  %v3553_v33 = vpop.eup %3552 }
 0x22a   : > { %3564 = vlog2.f32 %v1019_v0  ;;  %v976_v47 = vmul.f32 0.6931472, %v3551_v39  ;;  %vm4529_vm6 = vcmp.lt.f32.partialorder %v998_v17, 0.0004427343  ;;  %v1022_v35 = vmul.f32 -0.5, %v4489_v52 }
 0x22b   : > { %3566 = vlog2.f32 %v1028_v4  ;;  %v4534_v32 = vpop.eup %3554  ;;  %vm865_vm7 = vcmp.gt.f32.partialorder %v4358_v44, 20.0  ;;  %v985_v36 = vmul.f32 0.6931472, %v3553_v33  ;;  %v997_v10 = vmul.f32 %v4461_v40, %v996_v9 }
 0x22c   : > { %vm4538_vm8 = vcmp.lt.f32.partialorder %v1007_v11, 0.0004427343  ;;  %v1037_v54 = vadd.f32 1.0, %v4514_v15  ;;  %v3557_v41 = vpop.eup %3556  ;;  %v982_v14 = vsel %vm4505_vm2, %v979_v20, %v976_v47  ;;  %v1006_v42 = vmul.f32 %v4458_v53, %v1005_v56 }
 0x22d   : > { %v1014_v27 = vadd.f32 1.0, %v1013_v2  ;;  %v1031_v19 = vmul.f32 -0.5, %v4498_v23  ;;  %v1070_v59 = vmul.f32 0.5, %v982_v14  ;;  %v991_v34 = vsel %vm4524_vm5, %v988_v29, %v985_v36 }
 0x22e   : > { %v994_v40 = vmul.f32 0.6931472, %v3557_v41  ;;  %vm4549_vm9 = vcmp.lt.f32.partialorder %v1016_v22, 0.0004427343  ;;  %v3559_v3 = vpop.eup %3558  ;;  %v1071_v63 = vmul.f32 0.5, %v991_v34  ;;  %v1023_v55 = vadd.f32 1.0, %v1022_v35 }
 0x22f   : > { %v1025_v46 = vand.u32 2147483647, %v4489_v52  ;;  %3568 = vlog2.f32 %v1037_v54  ;;  %v4554_v13 = vpop.eup %3560  ;;  %v1086_v53 = vsel %vm862_vm0, %v4341_v28, %v1070_v59  ;;  %v1003_v49 = vmul.f32 0.6931472, %v3559_v3 }
 0x230   : > { %v1000_v51 = vsel %vm4529_vm6, %v997_v10, %v994_v40  ;;  %v1046_v31 = vadd.f32 1.0, %v4534_v32  ;;  %v3563_v17 = vpop.eup %3562  ;;  %3235 = vmatprep.mubr.msk.f32.mxu1 %vm646_vm1, %v1086_v53  ;;  %v1087_v20 = vsel %vm863_vm3, %v4338_v45, %v1071_v63  ;;  %v1015_v11 = vmul.f32 %v4484_v37, %v1014_v27  ;;  %v1579_v53 = vld [vmem:[%s5841_s1 + $0xe8] sm:$0xff] }
 0x231   : > { %v1072_v9 = vmul.f32 0.5, %v1000_v51  ;;  %v1032_v0 = vadd.f32 1.0, %v1031_v19  ;;  %3236 = vmatmul.mubr.msk.f32.gmra.mrb[22].mxu1 %vm646_vm1, %v1087_v20  ;;  %v1009_v28 = vsel %vm4538_vm8, %v1006_v42, %v1003_v49  ;;  %v1012_v60 = vmul.f32 0.6931472, %v3563_v17  ;;  %v1581_v51 = vld [vmem:[%s5841_s1 + $0xf8] sm:$0xff]  ;;  %v1582_v49 = vld [vmem:[%s5841_s1 + $0x100] sm:$0xff] }
 0x232   : > { %v1040_v48 = vmul.f32 -0.5, %v4514_v15  ;;  %3570 = vlog2.f32 %v1046_v31  ;;  %v1073_v2 = vmul.f32 0.5, %v1009_v28  ;;  %v1034_v45 = vand.u32 2147483647, %v4498_v23  ;;  %v1583_v17 = vld [vmem:[%s5841_s1 + $0x108] sm:$0xff]  ;;  %v1584_v20 = vld [vmem:[%s5841_s1 + $0x110] sm:$0xff] }
 0x233   : > { %v1088_v56 = vsel %vm864_vm4, %v4354_v25, %v1072_v9  ;;  %v1055_v1 = vadd.f32 1.0, %v4554_v13  ;;  %vm866_vm10 = vcmp.gt.f32.partialorder %v4379_v24, 20.0  ;;  %v1018_v4 = vsel %vm4549_vm9, %v1015_v11, %v1012_v60  ;;  %v4644_v11 = vld [vmem:[%s5841_s1 + $0xd2] ss:$0 sm:$0xff] }
 0x234   : > { %v3565_v37 = vpop.eup %3564  ;;  %3238 = vmatprep.mubr.msk.f32.mxu1 %vm646_vm1, %v1088_v56  ;;  %v1024_v39 = vmul.f32 %v4489_v52, %v1023_v55  ;;  %vm4581_vm11 = vcmp.lt.f32.partialorder %v1025_v46, 0.0004427343  ;;  %v1089_v7 = vsel %vm865_vm7, %v4351_v61, %v1073_v2  ;;  %v1074_v18 = vmul.f32 0.5, %v1018_v4 }
 0x235   : > { %v3567_v25 = vpop.eup %3566  ;;  %v1021_v22 = vmul.f32 0.6931472, %v3565_v37  ;;  %v1049_v24 = vmul.f32 -0.5, %v4534_v32  ;;  %3239 = vmatmul.mubr.msk.f32.gmra.mrb[24].mxu1 %vm646_vm1, %v1089_v7  ;;  %v1033_v47 = vmul.f32 %v4498_v23, %v1032_v0  ;;  %v1041_v62 = vadd.f32 1.0, %v1040_v48 }
 0x236   : > { %v1030_v33 = vmul.f32 0.6931472, %v3567_v25  ;;  %3572 = vlog2.f32 %v1055_v1  ;;  %v1090_v52 = vsel %vm866_vm10, %v4373_v16, %v1074_v18  ;;  %vm1035_vm12 = vcmp.lt.f32.partialorder %v1034_v45, 0.0004427343 }
 0x237   : > { %v1027_v35 = vsel %vm4581_vm11, %v1024_v39, %v1021_v22  ;;  %v1043_v44 = vand.u32 2147483647, %v4514_v15  ;;  %vm867_vm13 = vcmp.gt.f32.partialorder %v4388_v21, 20.0  ;;  %3241 = vmatprep.mubr.msk.f32.mxu1 %vm646_vm1, %v1090_v52  ;;  %vm868_vm14 = vcmp.gt.f32.partialorder %v4411_v58, 20.0  ;;  %v1406_v52 = vld [vmem:[%s3861_s3 + $0x98] sm:$0xff] }
 0x238   : > { %v1075_v61 = vmul.f32 0.5, %v1027_v35  ;;  %v1036_v36 = vsel %vm1035_vm12, %v1033_v47, %v1030_v33  ;;  %v1050_v57 = vadd.f32 1.0, %v1049_v24  ;;  %v1058_v54 = vmul.f32 -0.5, %v4554_v13 }
 0x239   : > { %v3569_v10 = vpop.eup %3568  ;;  %v1076_v23 = vmul.f32 0.5, %v1036_v36  ;;  %v1042_v14 = vmul.f32 %v4514_v15, %v1041_v62  ;;  %v1052_v42 = vand.u32 2147483647, %v4534_v32  ;;  %vm1044_vm15 = vcmp.lt.f32.partialorder %v1043_v44, 0.0004427343 }
 0x23a   : > { %v1091_v16 = vsel %vm867_vm13, %v4370_v6, %v1075_v61  ;;  %v1039_v41 = vmul.f32 0.6931472, %v3569_v10  ;;  %v1051_v34 = vmul.f32 %v4534_v32, %v1050_v57  ;;  %v1059_v40 = vadd.f32 1.0, %v1058_v54 }
 0x23b   : > { %3242 = vmatmul.mubr.msk.f32.gmra.mrb[26].mxu1 %vm646_vm1, %v1091_v16  ;;  %v1092_v21 = vsel %vm868_vm14, %v4403_v8, %v1076_v23  ;;  %vm869_vm0 = vcmp.gt.f32.partialorder %v4407_v5, 20.0  ;;  %vm1053_vm2 = vcmp.lt.f32.partialorder %v1052_v42, 0.0004427343  ;;  %v1061_v6 = vand.u32 2147483647, %v4554_v13 }
 0x23c   : > { %v3571_v27 = vpop.eup %3570  ;;  %3244 = vmatprep.mubr.msk.f32.mxu1 %vm646_vm1, %v1092_v21  ;;  %v1045_v58 = vsel %vm1044_vm15, %v1042_v14, %v1039_v41  ;;  %vm870_vm3 = vcmp.gt.f32.partialorder %v4451_v50, 20.0  ;;  %v1060_v55 = vmul.f32 %v4554_v13, %v1059_v40  ;;  %vm871_vm5 = vcmp.gt.f32.partialorder %v4448_v43, 20.0  ;;  %v1577_v50 = vld [vmem:[%s5841_s1 + $0xd8] sm:$0xff]  ;;  %v1578_v13 = vld [vmem:[%s5841_s1 + $0xe0] sm:$0xff] }
 0x23d   : > { %v1077_v19 = vmul.f32 0.5, %v1045_v58  ;;  %v1048_v59 = vmul.f32 0.6931472, %v3571_v27  ;;  %vm1062_vm4 = vcmp.lt.f32.partialorder %v1061_v6, 0.0004427343  ;;  %v3414_v31 = vpack.c.bf16 %v1582_v49, %v1581_v51 }
 0x23e   : > { %v3418_v9 = vpack.c.bf16 %v1584_v20, %v1583_v17  ;;  %v1302_v45 = vlaneseq }
 0x23f   : > { %v1093_v15 = vsel %vm869_vm0, %v4396_v30, %v1077_v19  ;;  %v1054_v12 = vsel %vm1053_vm2, %v1051_v34, %v1048_v59 }
 0x240   : > { %v3573_v3 = vpop.eup %3572  ;;  %3245 = vmatmul.mubr.msk.f32.gmra.mrb[28].mxu1 %vm646_vm1, %v1093_v15  ;;  %v1078_v8 = vmul.f32 0.5, %v1054_v12  ;;  %v4648_v4 = vand.u32 127, %v1302_v45 }
 0x241   : > { %v1057_v63 = vmul.f32 0.6931472, %v3573_v3 }
 0x242   : > { %v1094_v32 = vsel %vm870_vm3, %v4435_v38, %v1078_v8  ;;  %v3406_v38 = vpack.c.bf16 %v1578_v13, %v1577_v50  ;;  %v1308_v22 = vand.u32 31, %v4648_v4  ;;  %vm1413_vm6 = vcmp.ge.s32.totalorder %v4648_v4, 16 }
 0x243   : > { %3247 = vmatprep.mubr.msk.f32.mxu1 %vm646_vm1, %v1094_v32  ;;  %v1063_v5 = vsel %vm1062_vm4, %v1060_v55, %v1057_v63  ;;  %vm1414_vm7 = vcmp.lt.s32.totalorder %v4648_v4, 32  ;;  %vm1544_vm12 = vcmp.lt.s32.totalorder %v4648_v4, 16 }
 0x244   : > { %v1079_v46 = vmul.f32 0.5, %v1063_v5  ;;  %3407 = vmatprep.subr.bf16.mxu0 %v3406_v38  ;;  %vm4655_vm8 = vcmp.ge.s32.totalorder %v1308_v22, 16  ;;  %vm4666_vm9 = vmand %vm1413_vm6, %vm1414_vm7 }
 0x245   : > { %3409 = vmatpush3.bf16.msra.mxu0 %v3406_v38 }
 0x246   : > { %v1095_v30 = vsel %vm871_vm5, %v4420_v26, %v1079_v46  ;;  %v1580_v26 = vld [vmem:[%s5841_s1 + $0xf0] sm:$0xff] }
 0x247   : > { %3248 = vmatmul.mubr.msk.f32.gmra.mrb[30].mxu1 %vm646_vm1, %v1095_v30  ;;  %v3410_v43 = vpack.c.bf16 %v1580_v26, %v1579_v53 }
 0x249   : > { %3411 = vmatprep.subr.bf16.mxu0 %v3410_v43 }
 0x24a   : > { %3413 = vmatpush3.bf16.msra.mxu0 %v3410_v43 }
 0x24b   : > { %3415 = vmatprep.subr.bf16.mxu0 %v3414_v31 }
 0x24e   : > { %3417 = vmatpush3.bf16.msra.mxu0 %v3414_v31 }
 0x24f   : > { %3419 = vmatprep.subr.bf16.mxu0 %v3418_v9 }
 0x252   : > { %3421 = vmatpush3.bf16.msra.mxu0 %v3418_v9  ;;  %v1398_v9 = vld [vmem:[%s3861_s3 + $0x18] sm:$0xff] }
 0x2ed   : > { %v3228_v0 = vpop.f32.mrb[16].mxu1 }
 0x2ee   : > { %v1229_v28 = vadd.f32 %v3228_v0, %v4644_v11  ;;  %v1223_v60 = vpop.f32.mrb[17].mxu1 }
 0x2ef   : > { %v1224_v48 = vadd.f32 %v4644_v11, %v1223_v60 }
 0x2f0   : > { %v1318_v56 = vmin.f32 %v1229_v28, 80.0 }
 0x2f1   : > { %v1317_v2 = vmin.f32 %v1224_v48, 80.0 }
 0x2f2   : > { %v1335_v1 = vmul.f32 1.442695, %v1318_v56 }
 0x2f3   : > { %v1333_v37 = vmul.f32 1.442695, %v1317_v2 }
 0x2f4   : > { %3574 = vpow2.f32 %v1335_v1 }
 0x2f5   : > { %3576 = vpow2.f32 %v1333_v37 }
 0x2f6   : > { %v3231_v39 = vpop.f32.mrb[18].mxu1 }
 0x2f7   : > { %v1239_v29 = vadd.f32 %v3231_v39, %v4644_v11  ;;  %v1233_v25 = vpop.f32.mrb[19].mxu1 }
 0x2f8   : > { %v1234_v7 = vadd.f32 %v4644_v11, %v1233_v25 }
 0x2f9   : > { %v1320_v18 = vmin.f32 %v1239_v29, 80.0 }
 0x2fa   : > { %v1319_v24 = vmin.f32 %v1234_v7, 80.0 }
 0x2fb   : > { %v1339_v33 = vmul.f32 1.442695, %v1320_v18 }
 0x2fc   : > { %v1337_v47 = vmul.f32 1.442695, %v1319_v24  ;;  %v3234_v36 = vpop.f32.mrb[20].mxu1 }
 0x2fd   : > { %3578 = vpow2.f32 %v1339_v33  ;;  %v4671_v23 = vadd.f32 %v3234_v36, %v4644_v11  ;;  %v1243_v57 = vpop.f32.mrb[21].mxu1  ;;  %v1397_v33 = vld [vmem:[%s3861_s3 + $0x8] sm:$0xff] }
 0x2fe   : > { %v3575_v62 = vpop.eup %3574  ;;  %3580 = vpow2.f32 %v1337_v47  ;;  %v4678_v16 = vadd.f32 %v4644_v11, %v1243_v57 }
 0x2ff   : > { %v3577_v35 = vpop.eup %3576  ;;  %v1366_v44 = vadd.f32 1e-06, %v3575_v62  ;;  %v1322_v42 = vmin.f32 %v4671_v23, 80.0 }
 0x300   : > { %v1365_v10 = vadd.f32 1e-06, %v3577_v35  ;;  %v1321_v58 = vmin.f32 %v4678_v16, 80.0 }
 0x301   : > { %v4675_v54 = vsel %vm4655_vm8, %v1366_v44, %v1229_v28  ;;  %v1343_v27 = vmul.f32 1.442695, %v1322_v42 }
 0x302   : > { %v1417_v41 = vsel %vm4666_vm9, %v4675_v54, 1.0  ;;  %2798 = vst.msk [vmem:[%s4664_s18 + $0x18] sm:$0xff] %vm646_vm1, %v4675_v54  ;;  %v4688_v14 = vsel %vm4655_vm8, %v1365_v10, %v1224_v48  ;;  %v1341_v19 = vmul.f32 1.442695, %v1321_v58 }
 0x303   : > { %3582 = vrsqrt.f32 %v1417_v41  ;;  %2797 = vst.msk [vmem:[%s4664_s18 + $0x8] sm:$0xff] %vm646_vm1, %v4688_v14  ;;  %v4697_v21 = vsel %vm4666_vm9, %v4688_v14, 1.0  ;;  %vm1441_vm10 = vcmp.eq.f32.partialorder %v1417_v41, inf  ;;  %vm1443_vm11 = vcmp.eq.f32.partialorder %v1417_v41, 0.0 }
 0x304   : > { %3584 = vrsqrt.f32 %v4697_v21  ;;  %v3237_v34 = vpop.f32.mrb[22].mxu1  ;;  %v1444_v32 = vand.u32 2147483648, %v1417_v41  ;;  %vm1434_vm13 = vcmp.eq.f32.partialorder %v4697_v21, inf  ;;  %vm1436_vm14 = vcmp.eq.f32.partialorder %v4697_v21, 0.0 }
 0x305   : > { %3586 = vpow2.f32 %v1343_v27  ;;  %v4702_v15 = vadd.f32 %v3237_v34, %v4644_v11  ;;  %v1253_v12 = vpop.f32.mrb[23].mxu1  ;;  %v1437_v28 = vand.u32 2147483648, %v4697_v21 }
 0x306   : > { %3588 = vpow2.f32 %v1341_v19  ;;  %v4705_v8 = vadd.f32 %v4644_v11, %v1253_v12 }
 0x307   : > { %v3579_v59 = vpop.eup %3578  ;;  %v1324_v55 = vmin.f32 %v4702_v15, 80.0 }
 0x308   : > { %v3581_v40 = vpop.eup %3580  ;;  %v1368_v6 = vadd.f32 1e-06, %v3579_v59  ;;  %v1323_v30 = vmin.f32 %v4705_v8, 80.0  ;;  %v3240_v50 = vpop.f32.mrb[24].mxu1 }
 0x309   : > { %v1367_v3 = vadd.f32 1e-06, %v3581_v40  ;;  %v1347_v38 = vmul.f32 1.442695, %v1324_v55  ;;  %v4736_v53 = vadd.f32 %v3240_v50, %v4644_v11  ;;  %v1263_v26 = vpop.f32.mrb[25].mxu1 }
 0x30a   : > { %v4709_v63 = vsel %vm4655_vm8, %v1368_v6, %v1239_v29  ;;  %v1345_v51 = vmul.f32 1.442695, %v1323_v30  ;;  %v4740_v49 = vadd.f32 %v4644_v11, %v1263_v26  ;;  %v1400_v30 = vld [vmem:[%s3861_s3 + $0x38] sm:$0xff] }
 0x30b   : > { %v4716_v5 = vsel %vm4666_vm9, %v4709_v63, 1.0  ;;  %2800 = vst.msk [vmem:[%s4664_s18 + $0x38] sm:$0xff] %vm646_vm1, %v4709_v63  ;;  %v4723_v46 = vsel %vm4655_vm8, %v1367_v3, %v1234_v7  ;;  %v1326_v17 = vmin.f32 %v4736_v53, 80.0 }
 0x30c   : > { %3590 = vrsqrt.f32 %v4716_v5  ;;  %v4730_v13 = vsel %vm4666_vm9, %v4723_v46, 1.0  ;;  %2799 = vst.msk [vmem:[%s4664_s18 + $0x28] sm:$0xff] %vm646_vm1, %v4723_v46  ;;  %v1325_v0 = vmin.f32 %v4740_v49, 80.0  ;;  %vm1455_vm15 = vcmp.eq.f32.partialorder %v4716_v5, inf }
 0x30d   : > { %v3583_v43 = vpop.eup %3582  ;;  %3592 = vrsqrt.f32 %v4730_v13  ;;  %v1451_v60 = vand.u32 2147483648, %v4730_v13  ;;  %v1351_v2 = vmul.f32 1.442695, %v1326_v17  ;;  %vm1448_vm0 = vcmp.eq.f32.partialorder %v4730_v13, inf }
 0x30e   : > { %v1440_v31 = vmul.f32 %v3583_v43, %v1417_v41  ;;  %3594 = vpow2.f32 %v1347_v38  ;;  %v3585_v20 = vpop.eup %3584  ;;  %v3243_v45 = vpop.f32.mrb[26].mxu1  ;;  %v1349_v29 = vmul.f32 1.442695, %v1325_v0  ;;  %vm1450_vm2 = vcmp.eq.f32.partialorder %v4730_v13, 0.0 }
 0x30f   : > { %3596 = vpow2.f32 %v1345_v51  ;;  %v3587_v48 = vpop.eup %3586  ;;  %v1433_v1 = vmul.f32 %v3585_v20, %v4697_v21  ;;  %v4754_v25 = vadd.f32 %v3243_v45, %v4644_v11  ;;  %v1273_v7 = vpop.f32.mrb[27].mxu1  ;;  %vm1457_vm3 = vcmp.eq.f32.partialorder %v4716_v5, 0.0 }
 0x310   : > { %v1442_v56 = vsel %vm1441_vm10, %v1417_v41, %v1440_v31  ;;  %v1370_v39 = vadd.f32 1e-06, %v3587_v48  ;;  %v3589_v18 = vpop.eup %3588  ;;  %3598 = vpow2.f32 %v1351_v2  ;;  %v4758_v24 = vadd.f32 %v4644_v11, %v1273_v7 }
 0x311   : > { %v1445_v37 = vsel %vm1443_vm11, %v1444_v32, %v1442_v56  ;;  %v1435_v47 = vsel %vm1434_vm13, %v4697_v21, %v1433_v1  ;;  %v1369_v35 = vadd.f32 1e-06, %v3589_v18  ;;  %3600 = vpow2.f32 %v1349_v29 }
 0x312   : > { %v1546_v22 = vmul.f32 %v1445_v37, %v1398_v9  ;;  %v4768_v62 = vsel %vm4655_vm8, %v1370_v39, %v4671_v23  ;;  %v1328_v44 = vmin.f32 %v4754_v25, 80.0  ;;  %v1327_v10 = vmin.f32 %v4758_v24, 80.0 }
 0x313   : > { %v4774_v36 = vsel %vm4666_vm9, %v4768_v62, 1.0  ;;  %2802 = vst.msk [vmem:[%s4664_s18 + $0x58] sm:$0xff] %vm646_vm1, %v4768_v62  ;;  %v1438_v57 = vsel %vm1436_vm14, %v1437_v28, %v1435_v47  ;;  %v4787_v23 = vsel %vm4655_vm8, %v1369_v35, %v4678_v16  ;;  %v3246_v42 = vpop.f32.mrb[28].mxu1  ;;  %v1458_v50 = vand.u32 2147483648, %v4716_v5 }
 0x314   : > { %3602 = vrsqrt.f32 %v4774_v36  ;;  %v1355_v41 = vmul.f32 1.442695, %v1328_v44  ;;  %v1545_v27 = vmul.f32 %v1438_v57, %v1397_v33  ;;  %v1562_v19 = vsel %vm1544_vm12, %v4675_v54, %v1546_v22  ;;  %2801 = vst.msk [vmem:[%s4664_s18 + $0x48] sm:$0xff] %vm646_vm1, %v4787_v23  ;;  %v1283_v34 = vpop.f32.mrb[29].mxu1 }
 0x315   : > { %v4795_v21 = vsel %vm4666_vm9, %v4787_v23, 1.0  ;;  %v1353_v59 = vmul.f32 1.442695, %v1327_v10  ;;  %v4801_v16 = vadd.f32 %v3246_v42, %v4644_v11  ;;  %v4805_v54 = vadd.f32 %v4644_v11, %v1283_v34 }
 0x316   : > { %v3591_v58 = vpop.eup %3590  ;;  %3604 = vrsqrt.f32 %v4795_v21  ;;  %v1561_v6 = vsel %vm1544_vm12, %v4688_v14, %v1545_v27  ;;  %v1399_v14 = vld [vmem:[%s3861_s3 + $0x28] sm:$0xff]  ;;  %vm1462_vm4 = vcmp.eq.f32.partialorder %v4795_v21, inf  ;;  %vm1464_vm5 = vcmp.eq.f32.partialorder %v4795_v21, 0.0 }
 0x317   : > { %v3593_v40 = vpop.eup %3592  ;;  %v1454_v12 = vmul.f32 %v3591_v58, %v4716_v5  ;;  %3606 = vpow2.f32 %v1355_v41  ;;  %v1330_v55 = vmin.f32 %v4801_v16, 80.0  ;;  %3266 = vmatprep.mubr.msk.f32.mxu0 %vm646_vm1, %v1561_v6  ;;  %v1329_v43 = vmin.f32 %v4805_v54, 80.0 }
 0x318   : > { %v3595_v3 = vpop.eup %3594  ;;  %v1447_v32 = vmul.f32 %v3593_v40, %v4730_v13  ;;  %3608 = vpow2.f32 %v1353_v59  ;;  %3267 = vmatmul.mubr.msk.f32.vlgmr.msra.gmra.mrb[16].mxu0 %vm646_vm1, %v1562_v19  ;;  %v1465_v10 = vand.u32 2147483648, %v4795_v21  ;;  %v1401_v59 = vld [vmem:[%s3861_s3 + $0x48] sm:$0xff]  ;;  %vm1469_vm6 = vcmp.eq.f32.partialorder %v4774_v36, inf }
 0x319   : > { %v3597_v38 = vpop.eup %3596  ;;  %v1372_v26 = vadd.f32 1e-06, %v3595_v3  ;;  %v1456_v51 = vsel %vm1455_vm15, %v4716_v5, %v1454_v12  ;;  %v1359_v17 = vmul.f32 1.442695, %v1330_v55  ;;  %v1357_v28 = vmul.f32 1.442695, %v1329_v43 }
 0x31a   : > { %v1371_v31 = vadd.f32 1e-06, %v3597_v38  ;;  %v1449_v20 = vsel %vm1448_vm0, %v4730_v13, %v1447_v32  ;;  %v1459_v9 = vsel %vm1457_vm3, %v1458_v50, %v1456_v51  ;;  %v3599_v2 = vpop.eup %3598  ;;  %v3249_v13 = vpop.f32.mrb[30].mxu1  ;;  %vm1471_vm7 = vcmp.eq.f32.partialorder %v4774_v36, 0.0  ;;  %v1402_v55 = vld [vmem:[%s3861_s3 + $0x58] sm:$0xff] }
 0x31b   : > { %v4830_v0 = vsel %vm4655_vm8, %v1372_v26, %v4702_v15  ;;  %v1452_v48 = vsel %vm1450_vm2, %v1451_v60, %v1449_v20  ;;  %v1548_v56 = vmul.f32 %v1459_v9, %v1400_v30  ;;  %3610 = vpow2.f32 %v1359_v17  ;;  %v3601_v45 = vpop.eup %3600 }
 0x31c   : > { %v4840_v5 = vsel %vm4666_vm9, %v4830_v0, 1.0  ;;  %2804 = vst.msk [vmem:[%s4664_s18 + $0x78] sm:$0xff] %vm646_vm1, %v4830_v0  ;;  %v4848_v15 = vsel %vm4655_vm8, %v1371_v31, %v4705_v8  ;;  %v1547_v60 = vmul.f32 %v1452_v48, %v1399_v14  ;;  %v1374_v37 = vadd.f32 1e-06, %v3599_v2  ;;  %v1293_v8 = vpop.f32.mrb[31].mxu1 }
 0x31d   : > { %3612 = vrsqrt.f32 %v4840_v5  ;;  %v4854_v1 = vsel %vm4666_vm9, %v4848_v15, 1.0  ;;  %2803 = vst.msk [vmem:[%s4664_s18 + $0x68] sm:$0xff] %vm646_vm1, %v4848_v15  ;;  %v4860_v39 = vadd.f32 %v3249_v13, %v4644_v11  ;;  %v1373_v29 = vadd.f32 1e-06, %v3601_v45 }
 0x31e   : > { %3614 = vrsqrt.f32 %v4854_v1  ;;  %v4864_v7 = vadd.f32 %v4644_v11, %v1293_v8  ;;  %v1563_v18 = vsel %vm1544_vm12, %v4723_v46, %v1547_v60  ;;  %v3603_v22 = vpop.eup %3602  ;;  %v4872_v33 = vsel %vm4655_vm8, %v1374_v37, %v4736_v53  ;;  %v1404_v60 = vld [vmem:[%s3861_s3 + $0x78] sm:$0xff] }
 0x31f   : > { %3616 = vpow2.f32 %v1357_v28  ;;  %v1332_v47 = vmin.f32 %v4860_v39, 80.0  ;;  %3269 = vmatprep.mubr.msk.f32.mxu0 %vm646_vm1, %v1563_v18  ;;  %v1564_v11 = vsel %vm1544_vm12, %v4709_v63, %v1548_v56  ;;  %v4882_v46 = vsel %vm4666_vm9, %v4872_v33, 1.0  ;;  %2806 = vst.msk [vmem:[%s4664_s18 + $0x98] sm:$0xff] %vm646_vm1, %v4872_v33  ;;  %v1403_v56 = vld [vmem:[%s3861_s3 + $0x68] sm:$0xff] }
 0x320   : > { %v4890_v53 = vsel %vm4655_vm8, %v1373_v29, %v4740_v49  ;;  %v1331_v35 = vmin.f32 %v4864_v7, 80.0  ;;  %3270 = vmatmul.mubr.msk.f32.gmra.mrb[18].mxu0 %vm646_vm1, %v1564_v11  ;;  %v3605_v63 = vpop.eup %3604  ;;  %3618 = vrsqrt.f32 %v4882_v46  ;;  %v1468_v27 = vmul.f32 %v3603_v22, %v4774_v36 }
 0x321   : > { %v4899_v44 = vsel %vm4666_vm9, %v4890_v53, 1.0  ;;  %2805 = vst.msk [vmem:[%s4664_s18 + $0x88] sm:$0xff] %vm646_vm1, %v4890_v53  ;;  %v1363_v49 = vmul.f32 1.442695, %v1332_v47  ;;  %v3607_v57 = vpop.eup %3606  ;;  %v1461_v42 = vmul.f32 %v3605_v63, %v4795_v21  ;;  %v1472_v32 = vand.u32 2147483648, %v4774_v36 }
 0x322   : > { %3620 = vrsqrt.f32 %v4899_v44  ;;  %v1361_v41 = vmul.f32 1.442695, %v1331_v35  ;;  %v3609_v58 = vpop.eup %3608  ;;  %v1376_v19 = vadd.f32 1e-06, %v3607_v57  ;;  %v1470_v6 = vsel %vm1469_vm6, %v4774_v36, %v1468_v27 }
 0x323   : > { %3622 = vpow2.f32 %v1363_v49  ;;  %v1375_v34 = vadd.f32 1e-06, %v3609_v58  ;;  %v1463_v40 = vsel %vm1462_vm4, %v4795_v21, %v1461_v42  ;;  %vm1476_vm10 = vcmp.eq.f32.partialorder %v4854_v1, inf  ;;  %v1405_v49 = vld [vmem:[%s3861_s3 + $0x88] sm:$0xff] }
 0x324   : > { %3624 = vpow2.f32 %v1361_v41  ;;  %v4918_v12 = vsel %vm4655_vm8, %v1376_v19, %v4754_v25  ;;  %v1466_v3 = vsel %vm1464_vm5, %v1465_v10, %v1463_v40  ;;  %vm1478_vm11 = vcmp.eq.f32.partialorder %v4854_v1, 0.0 }
 0x325   : > { %v3611_v30 = vpop.eup %3610  ;;  %v4928_v50 = vsel %vm4666_vm9, %v4918_v12, 1.0  ;;  %2808 = vst.msk [vmem:[%s4664_s18 + $0xb8] sm:$0xff] %vm646_vm1, %v4918_v12  ;;  %v4936_v25 = vsel %vm4655_vm8, %v1375_v34, %v4758_v24  ;;  %v1549_v21 = vmul.f32 %v1466_v3, %v1401_v59  ;;  %v1473_v24 = vsel %vm1471_vm7, %v1472_v32, %v1470_v6 }
 0x326   : > { %3626 = vrsqrt.f32 %v4928_v50  ;;  %v4943_v26 = vsel %vm4666_vm9, %v4936_v25, 1.0  ;;  %2807 = vst.msk [vmem:[%s4664_s18 + $0xa8] sm:$0xff] %vm646_vm1, %v4936_v25  ;;  %v1378_v43 = vadd.f32 1e-06, %v3611_v30  ;;  %v1550_v31 = vmul.f32 %v1473_v24, %v1402_v55  ;;  %v1407_v55 = vld [vmem:[%s3861_s3 + $0xa8] sm:$0xff] }
 0x327   : > { %v3613_v38 = vpop.eup %3612  ;;  %3628 = vrsqrt.f32 %v4943_v26  ;;  %v1565_v51 = vsel %vm1544_vm12, %v4787_v23, %v1549_v21  ;;  %v1479_v17 = vand.u32 2147483648, %v4854_v1  ;;  %vm1483_vm13 = vcmp.eq.f32.partialorder %v4840_v5, inf }
 0x328   : > { %v3615_v14 = vpop.eup %3614  ;;  %v4958_v9 = vsel %vm4655_vm8, %v1378_v43, %v4801_v16  ;;  %3272 = vmatprep.mubr.msk.f32.mxu0 %vm646_vm1, %v1565_v51  ;;  %v1482_v28 = vmul.f32 %v3613_v38, %v4840_v5  ;;  %v1566_v16 = vsel %vm1544_vm12, %v4768_v62, %v1550_v31  ;;  %vm1485_vm14 = vcmp.eq.f32.partialorder %v4840_v5, 0.0 }
 0x329   : > { %v3617_v20 = vpop.eup %3616  ;;  %v1475_v36 = vmul.f32 %v3615_v14, %v4854_v1  ;;  %v4967_v23 = vsel %vm4666_vm9, %v4958_v9, 1.0  ;;  %2810 = vst.msk [vmem:[%s4664_s18 + $0xd8] sm:$0xff] %vm646_vm1, %v4958_v9  ;;  %3273 = vmatmul.mubr.msk.f32.gmra.mrb[20].mxu0 %vm646_vm1, %v1566_v16  ;;  %v1486_v37 = vand.u32 2147483648, %v4840_v5  ;;  %vm1490_vm15 = vcmp.eq.f32.partialorder %v4899_v44, inf  ;;  %v1410_v16 = vld [vmem:[%s3861_s3 + $0xd8] sm:$0xff] }
 0x32a   : > { %v1377_v48 = vadd.f32 1e-06, %v3617_v20  ;;  %v3619_v2 = vpop.eup %3618  ;;  %3630 = vrsqrt.f32 %v4967_v23  ;;  %v1484_v45 = vsel %vm1483_vm13, %v4840_v5, %v1482_v28  ;;  %vm1492_vm0 = vcmp.eq.f32.partialorder %v4899_v44, 0.0 }
 0x32b   : > { %v1477_v13 = vsel %vm1476_vm10, %v4854_v1, %v1475_v36  ;;  %v1493_v10 = vand.u32 2147483648, %v4899_v44  ;;  %v1496_v42 = vmul.f32 %v3619_v2, %v4882_v46  ;;  %vm1497_vm2 = vcmp.eq.f32.partialorder %v4882_v46, inf }
 0x32c   : > { %v3621_v62 = vpop.eup %3620  ;;  %v4988_v8 = vsel %vm4655_vm8, %v1377_v48, %v4805_v54  ;;  %v1480_v29 = vsel %vm1478_vm11, %v1479_v17, %v1477_v13  ;;  %v1487_v54 = vsel %vm1485_vm14, %v1486_v37, %v1484_v45  ;;  %v1507_v32 = vand.u32 2147483648, %v4943_v26 }
 0x32d   : > { %v3623_v18 = vpop.eup %3622  ;;  %v4997_v22 = vsel %vm4666_vm9, %v4988_v8, 1.0  ;;  %2809 = vst.msk [vmem:[%s4664_s18 + $0xc8] sm:$0xff] %vm646_vm1, %v4988_v8  ;;  %v1551_v47 = vmul.f32 %v1480_v29, %v1403_v56  ;;  %v1489_v1 = vmul.f32 %v3621_v62, %v4899_v44  ;;  %v1552_v63 = vmul.f32 %v1487_v54, %v1404_v60 }
 0x32e   : > { %v3625_v11 = vpop.eup %3624  ;;  %3632 = vrsqrt.f32 %v4997_v22  ;;  %v1380_v35 = vadd.f32 1e-06, %v3623_v18  ;;  %vm1506_vm3 = vcmp.eq.f32.partialorder %v4943_v26, 0.0  ;;  %vm1511_vm4 = vcmp.eq.f32.partialorder %v4928_v50, inf }
 0x32f   : > { %v1379_v57 = vadd.f32 1e-06, %v3625_v11  ;;  %v1567_v41 = vsel %vm1544_vm12, %v4848_v15, %v1551_v47  ;;  %v1491_v5 = vsel %vm1490_vm15, %v4899_v44, %v1489_v1  ;;  %v1568_v58 = vsel %vm1544_vm12, %v4830_v0, %v1552_v63  ;;  %v1411_v1 = vld [vmem:[%s3861_s3 + $0xe8] sm:$0xff] }
 0x330   : > { %v5018_v27 = vsel %vm4655_vm8, %v1380_v35, %v4860_v39  ;;  %3275 = vmatprep.mubr.msk.f32.mxu0 %vm646_vm1, %v1567_v41  ;;  %v1494_v15 = vsel %vm1492_vm0, %v1493_v10, %v1491_v5  ;;  %v3627_v19 = vpop.eup %3626  ;;  %v1498_v44 = vsel %vm1497_vm2, %v4882_v46, %v1496_v42  ;;  %v1514_v14 = vand.u32 2147483648, %v4928_v50  ;;  %v2039_v42 = vld [vmem:[%s5841_s1 + $0x118] sm:$0xff] }
 0x331   : > { %v5030_v59 = vsel %vm4666_vm9, %v5018_v27, 1.0  ;;  %2812 = vst.msk [vmem:[%s4664_s18 + $0xf8] sm:$0xff] %vm646_vm1, %v5018_v27  ;;  %v5038_v39 = vsel %vm4655_vm8, %v1379_v57, %v4864_v7  ;;  %3276 = vmatmul.mubr.msk.f32.gmra.mrb[22].mxu0 %vm646_vm1, %v1568_v58  ;;  %v1553_v0 = vmul.f32 %v1494_v15, %v1405_v49  ;;  %v3629_v34 = vpop.eup %3628  ;;  %v1500_v7 = vand.u32 2147483648, %v4882_v46  ;;  %v2040_v58 = vld [vmem:[%s5841_s1 + $0x120] sm:$0xff] }
 0x332   : > { %3634 = vrsqrt.f32 %v5030_v59  ;;  %v5046_v40 = vsel %vm4666_vm9, %v5038_v39, 1.0  ;;  %2811 = vst.msk [vmem:[%s4664_s18 + $0xe8] sm:$0xff] %vm646_vm1, %v5038_v39  ;;  %vm1499_vm8 = vcmp.eq.f32.partialorder %v4882_v46, 0.0  ;;  %v1503_v3 = vmul.f32 %v3629_v34, %v4943_v26 }
 0x333   : > { %3636 = vrsqrt.f32 %v5046_v40  ;;  %v1569_v6 = vsel %vm1544_vm12, %v4890_v53, %v1553_v0  ;;  %v1501_v61 = vsel %vm1499_vm8, %v1500_v7, %v1498_v44  ;;  %vm1504_vm9 = vcmp.eq.f32.partialorder %v4943_v26, inf  ;;  %v1408_v53 = vld [vmem:[%s3861_s3 + $0xb8] sm:$0xff] }
 0x334   : > { %3278 = vmatprep.mubr.msk.f32.mxu0 %vm646_vm1, %v1569_v6  ;;  %v1510_v30 = vmul.f32 %v3627_v19, %v4928_v50  ;;  %v3631_v21 = vpop.eup %3630  ;;  %v1554_v38 = vmul.f32 %v1501_v61, %v1406_v52  ;;  %v1505_v43 = vsel %vm1504_vm9, %v4943_v26, %v1503_v3  ;;  %vm1513_vm5 = vcmp.eq.f32.partialorder %v4928_v50, 0.0  ;;  %v2041_v19 = vld [vmem:[%s5841_s1 + $0x128] sm:$0xff] }
 0x335   : > { %v1508_v46 = vsel %vm1506_vm3, %v1507_v32, %v1505_v43  ;;  %v1524_v20 = vmul.f32 %v3631_v21, %v4967_v23  ;;  %vm1525_vm6 = vcmp.eq.f32.partialorder %v4967_v23, inf  ;;  %vm1518_vm7 = vcmp.eq.f32.partialorder %v4997_v22, inf }
 0x336   : > { %v1512_v24 = vsel %vm1511_vm4, %v4928_v50, %v1510_v30  ;;  %v1570_v51 = vsel %vm1544_vm12, %v4872_v33, %v1554_v38  ;;  %v1555_v31 = vmul.f32 %v1508_v46, %v1407_v55  ;;  %v1528_v33 = vand.u32 2147483648, %v4967_v23  ;;  %v1409_v50 = vld [vmem:[%s3861_s3 + $0xc8] sm:$0xff] }
 0x337   : > { %3279 = vmatmul.mubr.msk.f32.gmra.mrb[24].mxu0 %vm646_vm1, %v1570_v51  ;;  %v1515_v26 = vsel %vm1513_vm5, %v1514_v14, %v1512_v24  ;;  %v1521_v56 = vand.u32 2147483648, %v4997_v22  ;;  %v1526_v2 = vsel %vm1525_vm6, %v4967_v23, %v1524_v20  ;;  %vm1527_vm10 = vcmp.eq.f32.partialorder %v4967_v23, 0.0 }
 0x338   : > { %v3633_v17 = vpop.eup %3632  ;;  %v1571_v36 = vsel %vm1544_vm12, %v4936_v25, %v1555_v31  ;;  %v1556_v28 = vmul.f32 %v1515_v26, %v1408_v53  ;;  %vm1520_vm11 = vcmp.eq.f32.partialorder %v4997_v22, 0.0  ;;  %v1529_v60 = vsel %vm1527_vm10, %v1528_v33, %v1526_v2 }
 0x339   : > { %v1517_v48 = vmul.f32 %v3633_v17, %v4997_v22  ;;  %3281 = vmatprep.mubr.msk.f32.mxu0 %vm646_vm1, %v1571_v36  ;;  %v1558_v62 = vmul.f32 %v1529_v60, %v1410_v16  ;;  %vm1532_vm13 = vcmp.eq.f32.partialorder %v5046_v40, inf  ;;  %vm1539_vm14 = vcmp.eq.f32.partialorder %v5030_v59, inf }
 0x33a   : > { %v1572_v25 = vsel %vm1544_vm12, %v4918_v12, %v1556_v28  ;;  %v1412_v12 = vld [vmem:[%s3861_s3 + $0xf8] sm:$0xff]  ;;  %v1542_v54 = vand.u32 2147483648, %v5030_v59  ;;  %v1535_v11 = vand.u32 2147483648, %v5046_v40  ;;  %vm1541_vm15 = vcmp.eq.f32.partialorder %v5030_v59, 0.0 }
 0x33b   : > { %v1519_v13 = vsel %vm1518_vm7, %v4997_v22, %v1517_v48  ;;  %3282 = vmatmul.mubr.msk.f32.gmra.mrb[26].mxu0 %vm646_vm1, %v1572_v25  ;;  %v1574_v63 = vsel %vm1544_vm12, %v4958_v9, %v1558_v62  ;;  %vm1534_vm0 = vcmp.eq.f32.partialorder %v5046_v40, 0.0  ;;  %v3422_v15 = vpack.c.bf16 %v2040_v58, %v2039_v42 }
 0x33c   : > { %v3635_v45 = vpop.eup %3634  ;;  %v1522_v37 = vsel %vm1520_vm11, %v1521_v56, %v1519_v13 }
 0x33d   : > { %v3637_v29 = vpop.eup %3636  ;;  %v1557_v18 = vmul.f32 %v1522_v37, %v1409_v50  ;;  %v1538_v47 = vmul.f32 %v3635_v45, %v5030_v59  ;;  %3423 = vmatprep.subr.bf16.mxu1 %v3422_v15 }
 0x33e   : > { %v1531_v23 = vmul.f32 %v3637_v29, %v5046_v40  ;;  %3425 = vmatpush3.bf16.msra.mxu1 %v3422_v15 }
 0x33f   : > { %v1573_v22 = vsel %vm1544_vm12, %v4988_v8, %v1557_v18  ;;  %v1540_v35 = vsel %vm1539_vm14, %v5030_v59, %v1538_v47 }
 0x340   : > { %3284 = vmatprep.mubr.msk.f32.mxu0 %vm646_vm1, %v1573_v22  ;;  %v1533_v49 = vsel %vm1532_vm13, %v5046_v40, %v1531_v23  ;;  %v1543_v10 = vsel %vm1541_vm15, %v1542_v54, %v1540_v35 }
 0x341   : > { %3285 = vmatmul.mubr.msk.f32.gmra.mrb[28].mxu0 %vm646_vm1, %v1574_v63  ;;  %v1536_v8 = vsel %vm1534_vm0, %v1535_v11, %v1533_v49  ;;  %v1560_v57 = vmul.f32 %v1543_v10, %v1412_v12 }
 0x342   : > { %v1559_v41 = vmul.f32 %v1536_v8, %v1411_v1 }
 0x343   : > { %v1576_v9 = vsel %vm1544_vm12, %v5018_v27, %v1560_v57  ;;  %v2042_v27 = vld [vmem:[%s5841_s1 + $0x130] sm:$0xff] }
 0x344   : > { %v1575_v5 = vsel %vm1544_vm12, %v5038_v39, %v1559_v41  ;;  %v3426_v59 = vpack.c.bf16 %v2042_v27, %v2041_v19  ;;  %v5138_v39 = vld [vmem:[%s5841_s1 + $0x138] ss:$0 sm:$0xff] }
 0x345   : > { %3287 = vmatprep.mubr.msk.f32.mxu0 %vm646_vm1, %v1575_v5 }
 0x346   : > { %3288 = vmatmul.mubr.msk.f32.gmra.mrb[30].mxu0 %vm646_vm1, %v1576_v9  ;;  %3427 = vmatprep.subr.bf16.mxu1 %v3426_v59  ;;  %vm2048_vm1 = vcmask 261120  }
 0x347   : > { %3429 = vmatpush3.bf16.msra.mxu1 %v3426_v59 }
 0x3eb   : > { %v3268_v0 = vpop.f32.mrb[16].mxu0 }
 0x3ec   : > { %v5141_v44 = vadd.f32 %v3268_v0, %v5138_v39  ;;  %v1704_v34 = vpop.f32.mrb[17].mxu0 }
 0x3ed   : > { %v5144_v40 = vadd.f32 %v5138_v39, %v1704_v34 }
 0x3ee   : > { %v5147_v52 = vmul.f32 2.0, %v5141_v44 }
 0x3ef   : > { %v5150_v7 = vmul.f32 2.0, %v5144_v40 }
 0x3f0   : > { %v1816_v6 = vmin.f32 %v5147_v52, 20.0  ;;  %vm1800_vm12 = vcmp.gt.f32.partialorder %v5147_v52, 20.0 }
 0x3f1   : > { %v1815_v3 = vmin.f32 %v5150_v7, 20.0  ;;  %vm1799_vm8 = vcmp.gt.f32.partialorder %v5150_v7, 20.0 }
 0x3f2   : > { %v1833_v61 = vmul.f32 1.442695, %v1816_v6 }
 0x3f3   : > { %v3271_v55 = vpop.f32.mrb[18].mxu0  ;;  %v1831_v32 = vmul.f32 1.442695, %v1815_v3 }
 0x3f4   : > { %v5155_v30 = vadd.f32 %v3271_v55, %v5138_v39  ;;  %v1714_v21 = vpop.f32.mrb[19].mxu0  ;;  %3638 = vpow2.f32 %v1833_v61 }
 0x3f5   : > { %v5158_v38 = vadd.f32 %v5138_v39, %v1714_v21  ;;  %3640 = vpow2.f32 %v1831_v32 }
 0x3f6   : > { %v5161_v43 = vmul.f32 2.0, %v5155_v30 }
 0x3f7   : > { %v5164_v46 = vmul.f32 2.0, %v5158_v38 }
 0x3f8   : > { %v1818_v53 = vmin.f32 %v5161_v43, 20.0  ;;  %vm1802_vm6 = vcmp.gt.f32.partialorder %v5161_v43, 20.0 }
 0x3f9   : > { %v1817_v24 = vmin.f32 %v5164_v46, 20.0  ;;  %vm1801_vm5 = vcmp.gt.f32.partialorder %v5164_v46, 20.0 }
 0x3fa   : > { %v1837_v14 = vmul.f32 1.442695, %v1818_v53 }
 0x3fb   : > { %v1835_v51 = vmul.f32 1.442695, %v1817_v24 }
 0x3fc   : > { %3642 = vpow2.f32 %v1837_v14  ;;  %v3274_v31 = vpop.f32.mrb[20].mxu0 }
 0x3fd   : > { %3644 = vpow2.f32 %v1835_v51  ;;  %v5169_v26 = vadd.f32 %v3274_v31, %v5138_v39  ;;  %v1724_v20 = vpop.f32.mrb[21].mxu0 }
 0x3fe   : > { %v3639_v17 = vpop.eup %3638  ;;  %v5172_v48 = vadd.f32 %v5138_v39, %v1724_v20 }
 0x3ff   : > { %v3641_v36 = vpop.eup %3640  ;;  %v1872_v28 = vadd.f32 1.0, %v3639_v17  ;;  %v5175_v33 = vmul.f32 2.0, %v5169_v26  ;;  %v1875_v56 = vmul.f32 -0.5, %v3639_v17  ;;  %v1878_v23 = vand.u32 2147483647, %v3639_v17 }
 0x400   : > { %v1863_v16 = vadd.f32 1.0, %v3641_v36  ;;  %v5178_v50 = vmul.f32 2.0, %v5172_v48  ;;  %v1866_v45 = vmul.f32 -0.5, %v3641_v36  ;;  %v1869_v63 = vand.u32 2147483647, %v3641_v36 }
 0x401   : > { %3646 = vlog2.f32 %v1872_v28  ;;  %v1820_v62 = vmin.f32 %v5175_v33, 20.0  ;;  %v1876_v22 = vadd.f32 1.0, %v1875_v56  ;;  %vm5198_vm2 = vcmp.lt.f32.partialorder %v1878_v23, 0.0004427343 }
 0x402   : > { %3648 = vlog2.f32 %v1863_v16  ;;  %v1819_v2 = vmin.f32 %v5178_v50, 20.0  ;;  %v1867_v35 = vadd.f32 1.0, %v1866_v45  ;;  %vm5212_vm9 = vcmp.lt.f32.partialorder %v1869_v63, 0.0004427343 }
 0x403   : > { %v1841_v49 = vmul.f32 1.442695, %v1820_v62  ;;  %v1877_v42 = vmul.f32 %v3639_v17, %v1876_v22  ;;  %vm1803_vm10 = vcmp.gt.f32.partialorder %v5178_v50, 20.0  ;;  %vm1804_vm11 = vcmp.gt.f32.partialorder %v5175_v33, 20.0 }
 0x404   : > { %v3277_v25 = vpop.f32.mrb[22].mxu0  ;;  %v1839_v29 = vmul.f32 1.442695, %v1819_v2  ;;  %v1868_v6 = vmul.f32 %v3641_v36, %v1867_v35 }
 0x405   : > { %v5182_v13 = vadd.f32 %v3277_v25, %v5138_v39  ;;  %v1734_v60 = vpop.f32.mrb[23].mxu0 }
 0x406   : > { %v5184_v37 = vpop.eup %3642  ;;  %v5188_v18 = vadd.f32 %v5138_v39, %v1734_v60  ;;  %3650 = vpow2.f32 %v1839_v29 }
 0x407   : > { %v3645_v47 = vpop.eup %3644  ;;  %v5191_v12 = vmul.f32 2.0, %v5182_v13  ;;  %v1890_v54 = vadd.f32 1.0, %v5184_v37  ;;  %v1893_v27 = vmul.f32 -0.5, %v5184_v37  ;;  %v1896_v23 = vand.u32 2147483647, %v5184_v37 }
 0x408   : > { %v5195_v1 = vmul.f32 2.0, %v5188_v18  ;;  %v1881_v11 = vadd.f32 1.0, %v3645_v47  ;;  %v1884_v10 = vmul.f32 -0.5, %v3645_v47  ;;  %v1887_v19 = vand.u32 2147483647, %v3645_v47 }
 0x409   : > { %3652 = vlog2.f32 %v1890_v54  ;;  %v1822_v57 = vmin.f32 %v5191_v12, 20.0  ;;  %v1894_v28 = vadd.f32 1.0, %v1893_v27  ;;  %vm1897_vm4 = vcmp.lt.f32.partialorder %v1896_v23, 0.0004427343 }
 0x40a   : > { %3654 = vlog2.f32 %v1881_v11  ;;  %v1821_v41 = vmin.f32 %v5195_v1, 20.0  ;;  %v3280_v5 = vpop.f32.mrb[24].mxu0  ;;  %v1885_v32 = vadd.f32 1.0, %v1884_v10  ;;  %vm5227_vm3 = vcmp.lt.f32.partialorder %v1887_v19, 0.0004427343 }
 0x40b   : > { %v3647_v9 = vpop.eup %3646  ;;  %v5206_v58 = vadd.f32 %v3280_v5, %v5138_v39  ;;  %v1744_v15 = vpop.f32.mrb[25].mxu0  ;;  %3656 = vpow2.f32 %v1841_v49  ;;  %v1845_v53 = vmul.f32 1.442695, %v1822_v57  ;;  %v1895_v8 = vmul.f32 %v5184_v37, %v1894_v28 }
 0x40c   : > { %v3649_v59 = vpop.eup %3648  ;;  %v1874_v0 = vmul.f32 0.6931472, %v3647_v9  ;;  %v5210_v34 = vadd.f32 %v5138_v39, %v1744_v15  ;;  %v1843_v24 = vmul.f32 1.442695, %v1821_v41  ;;  %v1886_v29 = vmul.f32 %v3645_v47, %v1885_v32 }
 0x40d   : > { %v5217_v61 = vmul.f32 2.0, %v5206_v58  ;;  %v1865_v55 = vmul.f32 0.6931472, %v3649_v59  ;;  %vm1805_vm14 = vcmp.gt.f32.partialorder %v5195_v1, 20.0 }
 0x40e   : > { %v1880_v21 = vsel %vm5198_vm2, %v1877_v42, %v1874_v0  ;;  %v5222_v14 = vmul.f32 2.0, %v5210_v34  ;;  %v3283_v51 = vpop.f32.mrb[26].mxu0  ;;  %3658 = vpow2.f32 %v1843_v24 }
 0x40f   : > { %v2008_v31 = vmul.f32 0.5, %v1880_v21  ;;  %v5225_v17 = vadd.f32 %v3283_v51, %v5138_v39  ;;  %v1754_v20 = vpop.f32.mrb[27].mxu0  ;;  %v1824_v16 = vmin.f32 %v5217_v61, 20.0  ;;  %v1871_v25 = vsel %vm5212_vm9, %v1868_v6, %v1865_v55 }
 0x410   : > { %v1823_v56 = vmin.f32 %v5222_v14, 20.0  ;;  %v5234_v2 = vadd.f32 %v5138_v39, %v1754_v20  ;;  %v5238_v60 = vpop.eup %3650  ;;  %v2007_v62 = vmul.f32 0.5, %v1871_v25  ;;  %3660 = vpow2.f32 %v1845_v53 }
 0x411   : > { %v5241_v45 = vmul.f32 2.0, %v5225_v17  ;;  %v1899_v35 = vadd.f32 1.0, %v5238_v60  ;;  %v2024_v49 = vsel %vm1800_vm12, %v5141_v44, %v2008_v31  ;;  %v1849_v57 = vmul.f32 1.442695, %v1824_v16 }
 0x412   : > { %v1847_v22 = vmul.f32 1.442695, %v1823_v56  ;;  %v5245_v11 = vmul.f32 2.0, %v5234_v2  ;;  %v2023_v47 = vsel %vm1799_vm8, %v5144_v40, %v2007_v62  ;;  %v1902_v51 = vmul.f32 -0.5, %v5238_v60 }
 0x413   : > { %v3653_v54 = vpop.eup %3652  ;;  %v1826_v41 = vmin.f32 %v5241_v45, 20.0  ;;  %3298 = vmatprep.mubr.msk.f32.mxu1 %vm2048_vm1, %v2023_v47  ;;  %vm1806_vm12 = vcmp.gt.f32.partialorder %v5191_v12, 20.0  ;;  %vm1807_vm2 = vcmp.gt.f32.partialorder %v5222_v14, 20.0 }
 0x414   : > { %v3655_v63 = vpop.eup %3654  ;;  %v3286_v10 = vpop.f32.mrb[28].mxu0  ;;  %v1825_v5 = vmin.f32 %v5245_v11, 20.0  ;;  %3662 = vpow2.f32 %v1847_v22  ;;  %3299 = vmatmul.mubr.msk.f32.vlgmr.msra.gmra.mrb[32].mxu1 %vm2048_vm1, %v2024_v49  ;;  %v1892_v52 = vmul.f32 0.6931472, %v3653_v54  ;;  %v1903_v62 = vadd.f32 1.0, %v1902_v51 }
 0x415   : > { %v5258_v9 = vadd.f32 %v3286_v10, %v5138_v39  ;;  %v1764_v42 = vpop.f32.mrb[29].mxu0  ;;  %v1883_v40 = vmul.f32 0.6931472, %v3655_v63  ;;  %3664 = vlog2.f32 %v1899_v35  ;;  %v5268_v15 = vpop.eup %3656  ;;  %v1853_v0 = vmul.f32 1.442695, %v1826_v41 }
 0x416   : > { %v5262_v44 = vadd.f32 %v5138_v39, %v1764_v42  ;;  %v1851_v7 = vmul.f32 1.442695, %v1825_v5  ;;  %v1898_v59 = vsel %vm1897_vm4, %v1895_v8, %v1892_v52  ;;  %3666 = vpow2.f32 %v1849_v57 }
 0x417   : > { %v5266_v37 = vmul.f32 2.0, %v5258_v9  ;;  %v1889_v27 = vsel %vm5227_vm3, %v1886_v29, %v1883_v40  ;;  %v2010_v24 = vmul.f32 0.5, %v1898_v59  ;;  %v1911_v23 = vmul.f32 -0.5, %v5268_v15 }
 0x418   : > { %v5272_v19 = vmul.f32 2.0, %v5262_v44  ;;  %v2009_v55 = vmul.f32 0.5, %v1889_v27  ;;  %3668 = vpow2.f32 %v1851_v7  ;;  %v5294_v56 = vpop.eup %3658  ;;  %v1904_v8 = vmul.f32 %v5238_v60, %v1903_v62 }
 0x419   : > { %v1828_v6 = vmin.f32 %v5266_v37, 20.0  ;;  %v3289_v3 = vpop.f32.mrb[30].mxu0  ;;  %v2026_v16 = vsel %vm1802_vm6, %v5155_v30, %v2010_v24  ;;  %3670 = vpow2.f32 %v1853_v0  ;;  %v1905_v30 = vand.u32 2147483647, %v5238_v60 }
 0x41a   : > { %v1827_v32 = vmin.f32 %v5272_v19, 20.0  ;;  %v5279_v21 = vadd.f32 %v3289_v3, %v5138_v39  ;;  %v1774_v53 = vpop.f32.mrb[31].mxu0  ;;  %v2025_v20 = vsel %vm1801_vm5, %v5158_v38, %v2009_v55  ;;  %v5301_v38 = vpop.eup %3660  ;;  %v1917_v35 = vadd.f32 1.0, %v5294_v56 }
 0x41b   : > { %v5284_v31 = vadd.f32 %v5138_v39, %v1774_v53  ;;  %3301 = vmatprep.mubr.msk.f32.mxu1 %vm2048_vm1, %v2025_v20  ;;  %v1857_v43 = vmul.f32 1.442695, %v1828_v6  ;;  %v1908_v39 = vadd.f32 1.0, %v5268_v15  ;;  %v1926_v10 = vadd.f32 1.0, %v5301_v38 }
 0x41c   : > { %v1855_v36 = vmul.f32 1.442695, %v1827_v32  ;;  %v5290_v28 = vmul.f32 2.0, %v5279_v21  ;;  %3302 = vmatmul.mubr.msk.f32.gmra.mrb[34].mxu1 %vm2048_vm1, %v2026_v16  ;;  %vm1906_vm7 = vcmp.lt.f32.partialorder %v1905_v30, 0.0004427343  ;;  %v1912_v41 = vadd.f32 1.0, %v1911_v23 }
 0x41d   : > { %v5297_v25 = vmul.f32 2.0, %v5284_v31  ;;  %v1920_v5 = vmul.f32 -0.5, %v5294_v56  ;;  %v1914_v40 = vand.u32 2147483647, %v5268_v15  ;;  %v1929_v60 = vmul.f32 -0.5, %v5301_v38 }
 0x41e   : > { %3672 = vpow2.f32 %v1855_v36  ;;  %v1830_v46 = vmin.f32 %v5290_v28, 20.0  ;;  %v5307_v54 = vpop.eup %3662  ;;  %v1923_v59 = vand.u32 2147483647, %v5294_v56  ;;  %v1932_v50 = vand.u32 2147483647, %v5301_v38 }
 0x41f   : > { %v1829_v29 = vmin.f32 %v5297_v25, 20.0  ;;  %3674 = vlog2.f32 %v1908_v39  ;;  %v3665_v63 = vpop.eup %3664  ;;  %v1935_v52 = vadd.f32 1.0, %v5307_v54  ;;  %v1938_v0 = vmul.f32 -0.5, %v5307_v54 }
 0x420   : > { %v1861_v22 = vmul.f32 1.442695, %v1830_v46  ;;  %3676 = vpow2.f32 %v1857_v43  ;;  %v1901_v47 = vmul.f32 0.6931472, %v3665_v63  ;;  %v5312_v57 = vpop.eup %3666  ;;  %v1921_v32 = vadd.f32 1.0, %v1920_v5 }
 0x421   : > { %v1859_v49 = vmul.f32 1.442695, %v1829_v29  ;;  %v1944_v6 = vadd.f32 1.0, %v5312_v57  ;;  %v1947_v53 = vmul.f32 -0.5, %v5312_v57  ;;  %v1913_v51 = vmul.f32 %v5268_v15, %v1912_v41 }
 0x422   : > { %3678 = vpow2.f32 %v1861_v22  ;;  %v1907_v42 = vsel %vm1906_vm7, %v1904_v8, %v1901_v47  ;;  %v5317_v7 = vpop.eup %3668  ;;  %vm5334_vm13 = vcmp.lt.f32.partialorder %v1914_v40, 0.0004427343  ;;  %v1941_v43 = vand.u32 2147483647, %v5307_v54 }
 0x423   : > { %3680 = vpow2.f32 %v1859_v49  ;;  %v2011_v27 = vmul.f32 0.5, %v1907_v42  ;;  %v5325_v3 = vpop.eup %3670  ;;  %v1953_v36 = vadd.f32 1.0, %v5317_v7  ;;  %v1950_v39 = vand.u32 2147483647, %v5312_v57 }
 0x424   : > { %3682 = vlog2.f32 %v1917_v35  ;;  %v1956_v46 = vmul.f32 -0.5, %v5317_v7  ;;  %v1939_v29 = vadd.f32 1.0, %v1938_v0  ;;  %v1962_v15 = vadd.f32 1.0, %v5325_v3 }
 0x425   : > { %3684 = vlog2.f32 %v1926_v10  ;;  %v2027_v55 = vsel %vm1803_vm10, %v5172_v48, %v2011_v27  ;;  %v1930_v48 = vadd.f32 1.0, %v1929_v60  ;;  %v1922_v23 = vmul.f32 %v5294_v56, %v1921_v32 }
 0x426   : > { %3686 = vlog2.f32 %v1935_v52  ;;  %3304 = vmatprep.mubr.msk.f32.mxu1 %vm2048_vm1, %v2027_v55  ;;  %vm5347_vm15 = vcmp.lt.f32.partialorder %v1923_v59, 0.0004427343  ;;  %vm5351_vm0 = vcmp.lt.f32.partialorder %v1932_v50, 0.0004427343  ;;  %v1948_v63 = vadd.f32 1.0, %v1947_v53 }
 0x427   : > { %3688 = vlog2.f32 %v1944_v6  ;;  %v1959_v47 = vand.u32 2147483647, %v5317_v7  ;;  %v1931_v5 = vmul.f32 %v5301_v38, %v1930_v48  ;;  %vm5366_vm8 = vcmp.lt.f32.partialorder %v1941_v43, 0.0004427343 }
 0x428   : > { %v5330_v24 = vpop.eup %3672  ;;  %3690 = vlog2.f32 %v1953_v36  ;;  %v1957_v40 = vadd.f32 1.0, %v1956_v46  ;;  %v1940_v27 = vmul.f32 %v5307_v54, %v1939_v29  ;;  %vm5371_vm9 = vcmp.lt.f32.partialorder %v1950_v39, 0.0004427343 }
 0x429   : > { %v3675_v16 = vpop.eup %3674  ;;  %3692 = vlog2.f32 %v1962_v15  ;;  %v1971_v56 = vadd.f32 1.0, %v5330_v24  ;;  %v1949_v55 = vmul.f32 %v5312_v57, %v1948_v63  ;;  %v1965_v32 = vmul.f32 -0.5, %v5325_v3 }
 0x42a   : > { %v1910_v62 = vmul.f32 0.6931472, %v3675_v16  ;;  %v5343_v30 = vpop.eup %3676  ;;  %vm1808_vm3 = vcmp.gt.f32.partialorder %v5217_v61, 20.0  ;;  %vm5383_vm4 = vcmp.lt.f32.partialorder %v1959_v47, 0.0004427343  ;;  %vm1809_vm5 = vcmp.gt.f32.partialorder %v5245_v11, 20.0 }
 0x42b   : > { %3694 = vlog2.f32 %v1971_v56  ;;  %v1980_v59 = vadd.f32 1.0, %v5343_v30  ;;  %v1958_v57 = vmul.f32 %v5317_v7, %v1957_v40  ;;  %v1974_v20 = vmul.f32 -0.5, %v5330_v24 }
 0x42c   : > { %v5355_v49 = vpop.eup %3678  ;;  %v1916_v10 = vsel %vm5334_vm13, %v1913_v51, %v1910_v62  ;;  %v1968_v51 = vand.u32 2147483647, %v5325_v3  ;;  %v1983_v43 = vmul.f32 -0.5, %v5343_v30  ;;  %v1966_v15 = vadd.f32 1.0, %v1965_v32 }
 0x42d   : > { %v5362_v8 = vpop.eup %3680  ;;  %v2012_v41 = vmul.f32 0.5, %v1916_v10  ;;  %3696 = vlog2.f32 %v1980_v59  ;;  %v1977_v63 = vand.u32 2147483647, %v5330_v24  ;;  %v1975_v56 = vadd.f32 1.0, %v1974_v20 }
 0x42e   : > { %v3683_v52 = vpop.eup %3682  ;;  %v1989_v39 = vadd.f32 1.0, %v5362_v8  ;;  %v1998_v42 = vadd.f32 1.0, %v5355_v49  ;;  %v1967_v40 = vmul.f32 %v5325_v3, %v1966_v15  ;;  %vm1969_vm6 = vcmp.lt.f32.partialorder %v1968_v51, 0.0004427343 }
 0x42f   : > { %v3685_v0 = vpop.eup %3684  ;;  %v2028_v38 = vsel %vm1804_vm11, %v5169_v26, %v2012_v41  ;;  %v1919_v6 = vmul.f32 0.6931472, %v3683_v52  ;;  %v1992_v52 = vmul.f32 -0.5, %v5362_v8  ;;  %v1986_v14 = vand.u32 2147483647, %v5343_v30 }
 0x430   : > { %v3687_v50 = vpop.eup %3686  ;;  %3305 = vmatmul.mubr.msk.f32.gmra.mrb[36].mxu1 %vm2048_vm1, %v2028_v38  ;;  %v1928_v54 = vmul.f32 0.6931472, %v3685_v0  ;;  %3698 = vlog2.f32 %v1989_v39  ;;  %v1976_v38 = vmul.f32 %v5330_v24, %v1975_v56  ;;  %vm1978_vm7 = vcmp.lt.f32.partialorder %v1977_v63, 0.0004427343  ;;  %v2500_v39 = vld [vmem:[%s5841_s1 + $0x150] sm:$0xff] }
 0x431   : > { %v1925_v26 = vsel %vm5347_vm15, %v1922_v23, %v1919_v6  ;;  %v1937_v33 = vmul.f32 0.6931472, %v3687_v50  ;;  %v3689_v36 = vpop.eup %3688  ;;  %3700 = vlog2.f32 %v1998_v42  ;;  %vm1810_vm10 = vcmp.gt.f32.partialorder %v5241_v45, 20.0 }
 0x432   : > { %v2013_v16 = vmul.f32 0.5, %v1925_v26  ;;  %v1934_v48 = vsel %vm5351_vm0, %v1931_v5, %v1928_v54  ;;  %v1946_v29 = vmul.f32 0.6931472, %v3689_v36  ;;  %v3691_v23 = vpop.eup %3690  ;;  %v1984_v5 = vadd.f32 1.0, %v1983_v43 }
 0x433   : > { %v2014_v46 = vmul.f32 0.5, %v1934_v48  ;;  %v1943_v62 = vsel %vm5366_vm8, %v1940_v27, %v1937_v33  ;;  %v1955_v47 = vmul.f32 0.6931472, %v3691_v23  ;;  %v3693_v41 = vpop.eup %3692  ;;  %v2001_v54 = vmul.f32 -0.5, %v5355_v49 }
 0x434   : > { %v2029_v7 = vsel %vm1805_vm14, %v5188_v18, %v2013_v16  ;;  %v2015_v22 = vmul.f32 0.5, %v1943_v62  ;;  %v1952_v10 = vsel %vm5371_vm9, %v1949_v55, %v1946_v29  ;;  %v1964_v12 = vmul.f32 0.6931472, %v3693_v41 }
 0x435   : > { %3307 = vmatprep.mubr.msk.f32.mxu1 %vm2048_vm1, %v2029_v7  ;;  %v2030_v35 = vsel %vm1806_vm12, %v5182_v13, %v2014_v46  ;;  %v2016_v1 = vmul.f32 0.5, %v1952_v10  ;;  %v1961_v13 = vsel %vm5383_vm4, %v1958_v57, %v1955_v47  ;;  %v3695_v27 = vpop.eup %3694  ;;  %v1985_v32 = vmul.f32 %v5343_v30, %v1984_v5  ;;  %v5465_v46 = vld [vmem:[%s5841_s1 + $0x139] ss:$0 sm:$0xff] }
 0x436   : > { %3308 = vmatmul.mubr.msk.f32.gmra.mrb[38].mxu1 %vm2048_vm1, %v2030_v35  ;;  %v2031_v18 = vsel %vm1807_vm2, %v5210_v34, %v2015_v22  ;;  %v2017_v60 = vmul.f32 0.5, %v1961_v13  ;;  %v1970_v59 = vsel %vm1969_vm6, %v1967_v40, %v1964_v12  ;;  %v1973_v0 = vmul.f32 0.6931472, %v3695_v27 }
 0x437   : > { %3310 = vmatprep.mubr.msk.f32.mxu1 %vm2048_vm1, %v2031_v18  ;;  %v2032_v34 = vsel %vm1808_vm3, %v5206_v58, %v2016_v1  ;;  %v3697_v6 = vpop.eup %3696  ;;  %v2018_v55 = vmul.f32 0.5, %v1970_v59  ;;  %v1993_v58 = vadd.f32 1.0, %v1992_v52  ;;  %vm1987_vm11 = vcmp.lt.f32.partialorder %v1986_v14, 0.0004427343 }
 0x438   : > { %v2033_v3 = vsel %vm1809_vm5, %v5234_v2, %v2017_v60  ;;  %v1979_v50 = vsel %vm1978_vm7, %v1976_v38, %v1973_v0  ;;  %v1982_v61 = vmul.f32 0.6931472, %v3697_v6  ;;  %v1995_v53 = vand.u32 2147483647, %v5362_v8 }
 0x439   : > { %v2019_v24 = vmul.f32 0.5, %v1979_v50  ;;  %vm1811_vm13 = vcmp.gt.f32.partialorder %v5272_v19, 20.0  ;;  %v2034_v2 = vsel %vm1810_vm10, %v5225_v17, %v2018_v55  ;;  %v1994_v45 = vmul.f32 %v5362_v8, %v1993_v58 }
 0x43a   : > { %3311 = vmatmul.mubr.msk.f32.gmra.mrb[40].mxu1 %vm2048_vm1, %v2032_v34  ;;  %v1988_v11 = vsel %vm1987_vm11, %v1985_v32, %v1982_v61  ;;  %v3699_v51 = vpop.eup %3698  ;;  %v2002_v57 = vadd.f32 1.0, %v2001_v54  ;;  %vm1812_vm14 = vcmp.gt.f32.partialorder %v5266_v37, 20.0  ;;  %vm1996_vm15 = vcmp.lt.f32.partialorder %v1995_v53, 0.0004427343 }
 0x43b   : > { %3313 = vmatprep.mubr.msk.f32.mxu1 %vm2048_vm1, %v2033_v3  ;;  %v2035_v30 = vsel %vm1811_vm13, %v5262_v44, %v2019_v24  ;;  %v2020_v26 = vmul.f32 0.5, %v1988_v11  ;;  %v1991_v33 = vmul.f32 0.6931472, %v3699_v51  ;;  %v2004_v19 = vand.u32 2147483647, %v5355_v49  ;;  %v3701_v36 = vpop.eup %3700 }
 0x43c   : > { %vm1813_vm0 = vcmp.gt.f32.partialorder %v5297_v25, 20.0  ;;  %v2000_v44 = vmul.f32 0.6931472, %v3701_v36  ;;  %v2003_v48 = vmul.f32 %v5355_v49, %v2002_v57  ;;  %vm1814_vm2 = vcmp.gt.f32.partialorder %v5290_v28, 20.0  ;;  %v2498_v25 = vld [vmem:[%s5841_s1 + $0x140] sm:$0xff]  ;;  %v2499_v49 = vld [vmem:[%s5841_s1 + $0x148] sm:$0xff] }
 0x43d   : > { %v2036_v17 = vsel %vm1812_vm14, %v5258_v9, %v2020_v26  ;;  %v1997_v20 = vsel %vm1996_vm15, %v1994_v45, %v1991_v33  ;;  %vm2005_vm12 = vcmp.lt.f32.partialorder %v2004_v19, 0.0004427343 }
 0x43e   : > { %3314 = vmatmul.mubr.msk.f32.gmra.mrb[42].mxu1 %vm2048_vm1, %v2034_v2  ;;  %v2021_v16 = vmul.f32 0.5, %v1997_v20  ;;  %v2006_v37 = vsel %vm2005_vm12, %v2003_v48, %v2000_v44 }
 0x43f   : > { %3316 = vmatprep.mubr.msk.f32.mxu1 %vm2048_vm1, %v2035_v30  ;;  %v2022_v43 = vmul.f32 0.5, %v2006_v37 }
 0x440   : > { %v2037_v8 = vsel %vm1813_vm0, %v5284_v31, %v2021_v16  ;;  %v3430_v31 = vpack.c.bf16 %v2499_v49, %v2498_v25 }
 0x441   : > { %v2038_v9 = vsel %vm1814_vm2, %v5279_v21, %v2022_v43  ;;  %v2501_v21 = vld [vmem:[%s5841_s1 + $0x158] sm:$0xff] }
 0x442   : > { %3317 = vmatmul.mubr.msk.f32.gmra.mrb[44].mxu1 %vm2048_vm1, %v2036_v17  ;;  %3431 = vmatprep.subr.bf16.mxu0 %v3430_v31  ;;  %v3434_v28 = vpack.c.bf16 %v2501_v21, %v2500_v39 }
 0x443   : > { %3319 = vmatprep.mubr.msk.f32.mxu1 %vm2048_vm1, %v2037_v8  ;;  %3433 = vmatpush3.bf16.msra.mxu0 %v3430_v31 }
 0x444   : > { %3435 = vmatprep.subr.bf16.mxu0 %v3434_v28 }
 0x446   : > { %3320 = vmatmul.mubr.msk.f32.gmra.mrb[46].mxu1 %vm2048_vm1, %v2038_v9 }
 0x447   : > { %3437 = vmatpush3.bf16.msra.mxu0 %v3434_v28 }
 0x4e7   : > { %v3300_v62 = vpop.f32.mrb[32].mxu1 }
 0x4e8   : > { %v5468_v29 = vadd.f32 %v3300_v62, %v5465_v46  ;;  %v2163_v15 = vpop.f32.mrb[33].mxu1 }
 0x4e9   : > { %v5471_v23 = vadd.f32 %v5465_v46, %v2163_v15 }
 0x4ea   : > { %v5474_v7 = vmul.f32 2.0, %v5468_v29 }
 0x4eb   : > { %v5477_v22 = vmul.f32 2.0, %v5471_v23 }
 0x4ec   : > { %v2275_v63 = vmin.f32 %v5474_v7, 20.0  ;;  %vm2259_vm8 = vcmp.gt.f32.partialorder %v5474_v7, 20.0 }
 0x4ed   : > { %v2274_v35 = vmin.f32 %v5477_v22, 20.0  ;;  %vm2258_vm9 = vcmp.gt.f32.partialorder %v5477_v22, 20.0 }
 0x4ee   : > { %v2292_v10 = vmul.f32 1.442695, %v2275_v63 }
 0x4ef   : > { %v3303_v47 = vpop.f32.mrb[34].mxu1  ;;  %v2290_v56 = vmul.f32 1.442695, %v2274_v35 }
 0x4f0   : > { %v5482_v41 = vadd.f32 %v3303_v47, %v5465_v46  ;;  %v2173_v18 = vpop.f32.mrb[35].mxu1  ;;  %3702 = vpow2.f32 %v2292_v10 }
 0x4f1   : > { %v5485_v1 = vadd.f32 %v5465_v46, %v2173_v18  ;;  %3704 = vpow2.f32 %v2290_v56 }
 0x4f2   : > { %v5488_v5 = vmul.f32 2.0, %v5482_v41 }
 0x4f3   : > { %v5491_v42 = vmul.f32 2.0, %v5485_v1 }
 0x4f4   : > { %v2277_v13 = vmin.f32 %v5488_v5, 20.0  ;;  %vm2261_vm7 = vcmp.gt.f32.partialorder %v5488_v5, 20.0 }
 0x4f5   : > { %v2276_v12 = vmin.f32 %v5491_v42, 20.0  ;;  %vm2260_vm10 = vcmp.gt.f32.partialorder %v5491_v42, 20.0 }
 0x4f6   : > { %v2296_v40 = vmul.f32 1.442695, %v2277_v13 }
 0x4f7   : > { %v2294_v52 = vmul.f32 1.442695, %v2276_v12 }
 0x4f8   : > { %3706 = vpow2.f32 %v2296_v40 }
 0x4f9   : > { %3708 = vpow2.f32 %v2294_v52 }
 0x4fa   : > { %v3703_v27 = vpop.eup %3702 }
 0x4fb   : > { %v3705_v60 = vpop.eup %3704  ;;  %v2331_v14 = vadd.f32 1.0, %v3703_v27  ;;  %v2334_v59 = vmul.f32 -0.5, %v3703_v27  ;;  %v2337_v61 = vand.u32 2147483647, %v3703_v27 }
 0x4fc   : > { %v2322_v34 = vadd.f32 1.0, %v3705_v60  ;;  %v2325_v0 = vmul.f32 -0.5, %v3705_v60  ;;  %v2328_v54 = vand.u32 2147483647, %v3705_v60 }
 0x4fd   : > { %3710 = vlog2.f32 %v2331_v14  ;;  %v2335_v53 = vadd.f32 1.0, %v2334_v59  ;;  %vm5516_vm3 = vcmp.lt.f32.partialorder %v2337_v61, 0.0004427343 }
 0x4fe   : > { %3712 = vlog2.f32 %v2322_v34  ;;  %v2326_v11 = vadd.f32 1.0, %v2325_v0  ;;  %vm5521_vm4 = vcmp.lt.f32.partialorder %v2328_v54, 0.0004427343 }
 0x4ff   : > { %v2336_v36 = vmul.f32 %v3703_v27, %v2335_v53 }
 0x500   : > { %v2327_v48 = vmul.f32 %v3705_v60, %v2326_v11 }
 0x502   : > { %v5495_v38 = vpop.eup %3706 }
 0x503   : > { %v3306_v6 = vpop.f32.mrb[36].mxu1  ;;  %v5497_v3 = vpop.eup %3708  ;;  %v2349_v50 = vadd.f32 1.0, %v5495_v38  ;;  %v2352_v9 = vmul.f32 -0.5, %v5495_v38  ;;  %v2355_v39 = vand.u32 2147483647, %v5495_v38 }
 0x504   : > { %v5500_v55 = vadd.f32 %v3306_v6, %v5465_v46  ;;  %v2183_v32 = vpop.f32.mrb[37].mxu1  ;;  %v2340_v24 = vadd.f32 1.0, %v5497_v3  ;;  %v2343_v56 = vmul.f32 -0.5, %v5497_v3  ;;  %v2346_v12 = vand.u32 2147483647, %v5497_v3 }
 0x505   : > { %v5504_v58 = vadd.f32 %v5465_v46, %v2183_v32  ;;  %3714 = vlog2.f32 %v2349_v50  ;;  %v2353_v40 = vadd.f32 1.0, %v2352_v9  ;;  %vm5559_vm5 = vcmp.lt.f32.partialorder %v2355_v39, 0.0004427343 }
 0x506   : > { %v5508_v2 = vmul.f32 2.0, %v5500_v55  ;;  %3716 = vlog2.f32 %v2340_v24  ;;  %v2344_v24 = vadd.f32 1.0, %v2343_v56  ;;  %vm2347_vm6 = vcmp.lt.f32.partialorder %v2346_v12, 0.0004427343 }
 0x507   : > { %v5511_v51 = vmul.f32 2.0, %v5504_v58  ;;  %v3711_v26 = vpop.eup %3710  ;;  %v2354_v53 = vmul.f32 %v5495_v38, %v2353_v40 }
 0x508   : > { %v2279_v30 = vmin.f32 %v5508_v2, 20.0  ;;  %v3713_v17 = vpop.eup %3712  ;;  %v2333_v20 = vmul.f32 0.6931472, %v3711_v26  ;;  %vm2263_vm13 = vcmp.gt.f32.partialorder %v5508_v2, 20.0 }
 0x509   : > { %v2278_v45 = vmin.f32 %v5511_v51, 20.0  ;;  %v3309_v57 = vpop.f32.mrb[38].mxu1  ;;  %v2324_v43 = vmul.f32 0.6931472, %v3713_v17  ;;  %vm2262_vm11 = vcmp.gt.f32.partialorder %v5511_v51, 20.0 }
 0x50a   : > { %v5526_v16 = vadd.f32 %v3309_v57, %v5465_v46  ;;  %v2193_v44 = vpop.f32.mrb[39].mxu1  ;;  %v2339_v25 = vsel %vm5516_vm3, %v2336_v36, %v2333_v20  ;;  %v2300_v49 = vmul.f32 1.442695, %v2279_v30  ;;  %v2345_v36 = vmul.f32 %v5497_v3, %v2344_v24 }
 0x50b   : > { %v2298_v8 = vmul.f32 1.442695, %v2278_v45  ;;  %v5529_v37 = vadd.f32 %v5465_v46, %v2193_v44  ;;  %v2467_v21 = vmul.f32 0.5, %v2339_v25  ;;  %v2330_v15 = vsel %vm5521_vm4, %v2327_v48, %v2324_v43 }
 0x50c   : > { %v5535_v31 = vmul.f32 2.0, %v5526_v16  ;;  %v2466_v47 = vmul.f32 0.5, %v2330_v15 }
 0x50d   : > { %3718 = vpow2.f32 %v2298_v8  ;;  %v5539_v28 = vmul.f32 2.0, %v5529_v37  ;;  %v3312_v62 = vpop.f32.mrb[40].mxu1  ;;  %v2483_v59 = vsel %vm2259_vm8, %v5468_v29, %v2467_v21 }
 0x50e   : > { %v2281_v63 = vmin.f32 %v5535_v31, 20.0  ;;  %v5545_v35 = vadd.f32 %v3312_v62, %v5465_v46  ;;  %v2203_v10 = vpop.f32.mrb[41].mxu1  ;;  %3720 = vpow2.f32 %v2300_v49  ;;  %v2482_v60 = vsel %vm2258_vm9, %v5471_v23, %v2466_v47 }
 0x50f   : > { %v2280_v18 = vmin.f32 %v5539_v28, 20.0  ;;  %v5550_v13 = vadd.f32 %v5465_v46, %v2203_v10  ;;  %v3715_v52 = vpop.eup %3714  ;;  %3330 = vmatprep.mubr.msk.f32.mxu0 %vm2048_vm1, %v2482_v60  ;;  %vm2264_vm0 = vcmp.gt.f32.partialorder %v5539_v28, 20.0  ;;  %vm2265_vm2 = vcmp.gt.f32.partialorder %v5535_v31, 20.0 }
 0x510   : > { %v5554_v27 = vmul.f32 2.0, %v5545_v35  ;;  %v3717_v34 = vpop.eup %3716  ;;  %v2351_v50 = vmul.f32 0.6931472, %v3715_v52  ;;  %v2304_v61 = vmul.f32 1.442695, %v2281_v63  ;;  %3331 = vmatmul.mubr.msk.f32.vlgmr.msra.gmra.mrb[32].mxu0 %vm2048_vm1, %v2483_v59 }
 0x511   : > { %v2302_v0 = vmul.f32 1.442695, %v2280_v18  ;;  %v5567_v6 = vmul.f32 2.0, %v5550_v13  ;;  %v3315_v32 = vpop.f32.mrb[42].mxu1  ;;  %v2342_v26 = vmul.f32 0.6931472, %v3717_v34 }
 0x512   : > { %v2283_v23 = vmin.f32 %v5554_v27, 20.0  ;;  %v5572_v22 = vadd.f32 %v3315_v32, %v5465_v46  ;;  %v2213_v54 = vpop.f32.mrb[43].mxu1  ;;  %v2357_v19 = vsel %vm5559_vm5, %v2354_v53, %v2351_v50 }
 0x513   : > { %3722 = vpow2.f32 %v2302_v0  ;;  %v2282_v29 = vmin.f32 %v5567_v6, 20.0  ;;  %v5577_v7 = vadd.f32 %v5465_v46, %v2213_v54  ;;  %v2348_v9 = vsel %vm2347_vm6, %v2345_v36, %v2342_v26 }
 0x514   : > { %v2308_v11 = vmul.f32 1.442695, %v2283_v23  ;;  %v5581_v30 = vmul.f32 2.0, %v5572_v22  ;;  %3724 = vpow2.f32 %v2304_v61  ;;  %v2469_v25 = vmul.f32 0.5, %v2357_v19 }
 0x515   : > { %v2306_v33 = vmul.f32 1.442695, %v2282_v29  ;;  %v5584_v45 = vmul.f32 2.0, %v5577_v7  ;;  %v3318_v57 = vpop.f32.mrb[44].mxu1  ;;  %v2468_v3 = vmul.f32 0.5, %v2348_v9  ;;  %vm2266_vm9 = vcmp.gt.f32.partialorder %v5567_v6, 20.0 }
 0x516   : > { %v2285_v17 = vmin.f32 %v5581_v30, 20.0  ;;  %v5590_v20 = vadd.f32 %v3318_v57, %v5465_v46  ;;  %v2223_v38 = vpop.f32.mrb[45].mxu1  ;;  %v2485_v18 = vsel %vm2261_vm7, %v5482_v41, %v2469_v25  ;;  %vm2267_vm6 = vcmp.gt.f32.partialorder %v5554_v27, 20.0 }
 0x517   : > { %v5593_v44 = vpop.eup %3718  ;;  %3726 = vpow2.f32 %v2306_v33  ;;  %v2284_v48 = vmin.f32 %v5584_v45, 20.0  ;;  %v5597_v8 = vadd.f32 %v5465_v46, %v2223_v38  ;;  %v2484_v47 = vsel %vm2260_vm10, %v5485_v1, %v2468_v3 }
 0x518   : > { %3728 = vpow2.f32 %v2308_v11  ;;  %v5600_v43 = vmul.f32 2.0, %v5590_v20  ;;  %v2358_v21 = vadd.f32 1.0, %v5593_v44  ;;  %v3721_v62 = vpop.eup %3720  ;;  %v2312_v15 = vmul.f32 1.442695, %v2285_v17  ;;  %3333 = vmatprep.mubr.msk.f32.mxu0 %vm2048_vm1, %v2484_v47 }
 0x519   : > { %v2310_v49 = vmul.f32 1.442695, %v2284_v48  ;;  %v5603_v39 = vmul.f32 2.0, %v5597_v8  ;;  %v3321_v56 = vpop.f32.mrb[46].mxu1  ;;  %3334 = vmatmul.mubr.msk.f32.gmra.mrb[34].mxu0 %vm2048_vm1, %v2485_v18  ;;  %v2361_v52 = vmul.f32 -0.5, %v5593_v44  ;;  %v2367_v60 = vadd.f32 1.0, %v3721_v62 }
 0x51a   : > { %v2287_v63 = vmin.f32 %v5600_v43, 20.0  ;;  %v5614_v5 = vadd.f32 %v3321_v56, %v5465_v46  ;;  %v2233_v42 = vpop.f32.mrb[47].mxu1  ;;  %v2370_v41 = vmul.f32 -0.5, %v3721_v62  ;;  %v2364_v29 = vand.u32 2147483647, %v5593_v44 }
 0x51b   : > { %3730 = vpow2.f32 %v2310_v49  ;;  %v2286_v10 = vmin.f32 %v5603_v39, 20.0  ;;  %v5619_v1 = vadd.f32 %v5465_v46, %v2233_v42  ;;  %v2362_v46 = vadd.f32 1.0, %v2361_v52 }
 0x51c   : > { %3732 = vlog2.f32 %v2358_v21  ;;  %v2316_v14 = vmul.f32 1.442695, %v2287_v63  ;;  %v5622_v34 = vmul.f32 2.0, %v5614_v5  ;;  %v2371_v11 = vadd.f32 1.0, %v2370_v41 }
 0x51d   : > { %v3723_v12 = vpop.eup %3722  ;;  %v2314_v40 = vmul.f32 1.442695, %v2286_v10  ;;  %3734 = vpow2.f32 %v2312_v15  ;;  %v5627_v0 = vmul.f32 2.0, %v5619_v1  ;;  %v2373_v57 = vand.u32 2147483647, %v3721_v62 }
 0x51e   : > { %v5624_v59 = vpop.eup %3724  ;;  %3736 = vlog2.f32 %v2367_v60  ;;  %v2376_v32 = vadd.f32 1.0, %v3723_v12  ;;  %v2379_v50 = vmul.f32 -0.5, %v3723_v12  ;;  %v2289_v23 = vmin.f32 %v5622_v34, 20.0 }
 0x51f   : > { %3738 = vpow2.f32 %v2314_v40  ;;  %v2288_v24 = vmin.f32 %v5627_v0, 20.0  ;;  %v2385_v26 = vadd.f32 1.0, %v5624_v59  ;;  %v2363_v36 = vmul.f32 %v5593_v44, %v2362_v46 }
 0x520   : > { %3740 = vlog2.f32 %v2376_v32  ;;  %v2320_v53 = vmul.f32 1.442695, %v2289_v23  ;;  %v2380_v19 = vadd.f32 1.0, %v2379_v50  ;;  %v2382_v9 = vand.u32 2147483647, %v3723_v12 }
 0x521   : > { %v5629_v61 = vpop.eup %3726  ;;  %3742 = vpow2.f32 %v2316_v14  ;;  %v2318_v33 = vmul.f32 1.442695, %v2288_v24  ;;  %v2388_v25 = vmul.f32 -0.5, %v5624_v59  ;;  %vm2365_vm14 = vcmp.lt.f32.partialorder %v2364_v29, 0.0004427343 }
 0x522   : > { %v5632_v54 = vpop.eup %3728  ;;  %v2394_v17 = vadd.f32 1.0, %v5629_v61  ;;  %3744 = vpow2.f32 %v2320_v53  ;;  %v2372_v21 = vmul.f32 %v3721_v62, %v2371_v11  ;;  %vm5647_vm15 = vcmp.lt.f32.partialorder %v2373_v57, 0.0004427343 }
 0x523   : > { %3746 = vpow2.f32 %v2318_v33  ;;  %v2403_v49 = vadd.f32 1.0, %v5632_v54  ;;  %v2381_v44 = vmul.f32 %v3723_v12, %v2380_v19  ;;  %v2397_v10 = vmul.f32 -0.5, %v5629_v61 }
 0x524   : > { %3748 = vlog2.f32 %v2385_v26  ;;  %v2391_v56 = vand.u32 2147483647, %v5624_v59  ;;  %vm5655_vm12 = vcmp.lt.f32.partialorder %v2382_v9, 0.0004427343  ;;  %v2389_v52 = vadd.f32 1.0, %v2388_v25 }
 0x525   : > { %v5638_v38 = vpop.eup %3730  ;;  %3750 = vlog2.f32 %v2394_v17  ;;  %v2406_v12 = vmul.f32 -0.5, %v5632_v54  ;;  %v2400_v41 = vand.u32 2147483647, %v5629_v61  ;;  %v2398_v46 = vadd.f32 1.0, %v2397_v10 }
 0x526   : > { %v3733_v48 = vpop.eup %3732  ;;  %3752 = vlog2.f32 %v2403_v49  ;;  %v2412_v18 = vadd.f32 1.0, %v5638_v38  ;;  %v2409_v24 = vand.u32 2147483647, %v5632_v54  ;;  %v2415_v29 = vmul.f32 -0.5, %v5638_v38 }
 0x527   : > { %v2360_v3 = vmul.f32 0.6931472, %v3733_v48  ;;  %v5645_v15 = vpop.eup %3734  ;;  %vm5676_vm8 = vcmp.lt.f32.partialorder %v2391_v56, 0.0004427343  ;;  %v2407_v57 = vadd.f32 1.0, %v2406_v12  ;;  %v2390_v48 = vmul.f32 %v5624_v59, %v2389_v52 }
 0x528   : > { %v3737_v62 = vpop.eup %3736  ;;  %3754 = vlog2.f32 %v2412_v18  ;;  %v2421_v32 = vadd.f32 1.0, %v5645_v15  ;;  %v2424_v33 = vmul.f32 -0.5, %v5645_v15  ;;  %v2418_v19 = vand.u32 2147483647, %v5638_v38 }
 0x529   : > { %v2366_v47 = vsel %vm2365_vm14, %v2363_v36, %v2360_v3  ;;  %v5660_v60 = vpop.eup %3738  ;;  %v2369_v14 = vmul.f32 0.6931472, %v3737_v62  ;;  %vm5687_vm3 = vcmp.lt.f32.partialorder %v2400_v41, 0.0004427343  ;;  %v2399_v63 = vmul.f32 %v5629_v61, %v2398_v46 }
 0x52a   : > { %v2470_v40 = vmul.f32 0.5, %v2366_v47  ;;  %v3741_v50 = vpop.eup %3740  ;;  %3756 = vlog2.f32 %v2421_v32  ;;  %v2430_v25 = vadd.f32 1.0, %v5660_v60  ;;  %v2416_v10 = vadd.f32 1.0, %v2415_v29 }
 0x52b   : > { %v5669_v53 = vpop.eup %3742  ;;  %v2375_v11 = vsel %vm5647_vm15, %v2372_v21, %v2369_v14  ;;  %v2378_v26 = vmul.f32 0.6931472, %v3741_v50  ;;  %vm5699_vm4 = vcmp.lt.f32.partialorder %v2409_v24, 0.0004427343  ;;  %v2408_v61 = vmul.f32 %v5632_v54, %v2407_v57 }
 0x52c   : > { %v2486_v23 = vsel %vm2262_vm11, %v5504_v58, %v2470_v40  ;;  %v2471_v51 = vmul.f32 0.5, %v2375_v11  ;;  %v5681_v17 = vpop.eup %3744  ;;  %3758 = vlog2.f32 %v2430_v25  ;;  %v2439_v56 = vadd.f32 1.0, %v5669_v53 }
 0x52d   : > { %3336 = vmatprep.mubr.msk.f32.mxu0 %vm2048_vm1, %v2486_v23  ;;  %v2384_v36 = vsel %vm5655_vm12, %v2381_v44, %v2378_v26  ;;  %v5692_v49 = vpop.eup %3746  ;;  %v2425_v44 = vadd.f32 1.0, %v2424_v33  ;;  %vm5708_vm5 = vcmp.lt.f32.partialorder %v2418_v19, 0.0004427343  ;;  %v2433_v52 = vmul.f32 -0.5, %v5660_v60 }
 0x52e   : > { %v2487_v3 = vsel %vm2263_vm13, %v5500_v55, %v2471_v51  ;;  %v2472_v21 = vmul.f32 0.5, %v2384_v36  ;;  %v3749_v47 = vpop.eup %3748  ;;  %3760 = vlog2.f32 %v2439_v56  ;;  %v2448_v12 = vadd.f32 1.0, %v5692_v49 }
 0x52f   : > { %3337 = vmatmul.mubr.msk.f32.gmra.mrb[36].mxu0 %vm2048_vm1, %v2487_v3  ;;  %v3751_v18 = vpop.eup %3750  ;;  %v2387_v2 = vmul.f32 0.6931472, %v3749_v47  ;;  %v2417_v14 = vmul.f32 %v5638_v38, %v2416_v10  ;;  %v2427_v54 = vand.u32 2147483647, %v5645_v15  ;;  %v2426_v23 = vmul.f32 %v5645_v15, %v2425_v44 }
 0x530   : > { %v2488_v55 = vsel %vm2264_vm0, %v5529_v37, %v2472_v21  ;;  %v3753_v40 = vpop.eup %3752  ;;  %v2396_v42 = vmul.f32 0.6931472, %v3751_v18  ;;  %3762 = vlog2.f32 %v2448_v12  ;;  %v2442_v11 = vmul.f32 -0.5, %v5669_v53 }
 0x531   : > { %3339 = vmatprep.mubr.msk.f32.mxu0 %vm2048_vm1, %v2488_v55  ;;  %v2393_v28 = vsel %vm5676_vm8, %v2390_v48, %v2387_v2  ;;  %v2405_v37 = vmul.f32 0.6931472, %v3753_v40  ;;  %v2434_v51 = vadd.f32 1.0, %v2433_v52  ;;  %v2451_v58 = vmul.f32 -0.5, %v5692_v49 }
 0x532   : > { %v3755_v41 = vpop.eup %3754  ;;  %v2473_v32 = vmul.f32 0.5, %v2393_v28  ;;  %v2402_v50 = vsel %vm5687_vm3, %v2399_v63, %v2396_v42  ;;  %v2457_v36 = vadd.f32 1.0, %v5681_v17  ;;  %vm2428_vm7 = vcmp.lt.f32.partialorder %v2427_v54, 0.0004427343 }
 0x533   : > { %v2474_v46 = vmul.f32 0.5, %v2402_v50  ;;  %v2411_v24 = vsel %vm5699_vm4, %v2408_v61, %v2405_v37  ;;  %v2414_v29 = vmul.f32 0.6931472, %v3755_v41  ;;  %v2436_v31 = vand.u32 2147483647, %v5660_v60 }
 0x534   : > { %v3757_v26 = vpop.eup %3756  ;;  %v2489_v38 = vsel %vm2265_vm2, %v5526_v16, %v2473_v32  ;;  %v2475_v33 = vmul.f32 0.5, %v2411_v24  ;;  %vm2268_vm10 = vcmp.gt.f32.partialorder %v5584_v45, 20.0  ;;  %v2443_v9 = vadd.f32 1.0, %v2442_v11 }
 0x535   : > { %3340 = vmatmul.mubr.msk.f32.gmra.mrb[38].mxu0 %vm2048_vm1, %v2489_v38  ;;  %v2490_v15 = vsel %vm2266_vm9, %v5550_v13, %v2474_v46  ;;  %v2420_v57 = vsel %vm5708_vm5, %v2417_v14, %v2414_v29  ;;  %v2423_v19 = vmul.f32 0.6931472, %v3757_v26  ;;  %3764 = vlog2.f32 %v2457_v36 }
 0x536   : > { %3342 = vmatprep.mubr.msk.f32.mxu0 %vm2048_vm1, %v2490_v15  ;;  %v2476_v16 = vmul.f32 0.5, %v2420_v57  ;;  %v3759_v13 = vpop.eup %3758  ;;  %v2491_v6 = vsel %vm2267_vm6, %v5545_v35, %v2475_v33  ;;  %v2445_v21 = vand.u32 2147483647, %v5669_v53  ;;  %v2435_v63 = vmul.f32 %v5660_v60, %v2434_v51 }
 0x537   : > { %v2429_v48 = vsel %vm2428_vm7, %v2426_v23, %v2423_v19  ;;  %v2432_v27 = vmul.f32 0.6931472, %v3759_v13  ;;  %v2452_v10 = vadd.f32 1.0, %v2451_v58  ;;  %vm2437_vm11 = vcmp.lt.f32.partialorder %v2436_v31, 0.0004427343 }
 0x538   : > { %v2492_v25 = vsel %vm2268_vm10, %v5577_v7, %v2476_v16  ;;  %v2477_v3 = vmul.f32 0.5, %v2429_v48  ;;  %v3761_v47 = vpop.eup %3760  ;;  %v2454_v45 = vand.u32 2147483647, %v5692_v49  ;;  %v2460_v59 = vmul.f32 -0.5, %v5681_v17 }
 0x539   : > { %3343 = vmatmul.mubr.msk.f32.gmra.mrb[40].mxu0 %vm2048_vm1, %v2491_v6  ;;  %vm2269_vm13 = vcmp.gt.f32.partialorder %v5581_v30, 20.0  ;;  %v2438_v35 = vsel %vm2437_vm11, %v2435_v63, %v2432_v27  ;;  %v2441_v7 = vmul.f32 0.6931472, %v3761_v47  ;;  %v2444_v44 = vmul.f32 %v5669_v53, %v2443_v9 }
 0x53a   : > { %3345 = vmatprep.mubr.msk.f32.mxu0 %vm2048_vm1, %v2492_v25  ;;  %v3763_v56 = vpop.eup %3762  ;;  %v2493_v18 = vsel %vm2269_vm13, %v5572_v22, %v2477_v3  ;;  %v2478_v55 = vmul.f32 0.5, %v2438_v35  ;;  %vm2446_vm14 = vcmp.lt.f32.partialorder %v2445_v21, 0.0004427343  ;;  %vm2270_vm15 = vcmp.gt.f32.partialorder %v5603_v39, 20.0 }
 0x53b   : > { %v2447_v60 = vsel %vm2446_vm14, %v2444_v44, %v2441_v7  ;;  %v2450_v2 = vmul.f32 0.6931472, %v3763_v56  ;;  %v2453_v61 = vmul.f32 %v5692_v49, %v2452_v10  ;;  %vm2455_vm0 = vcmp.lt.f32.partialorder %v2454_v45, 0.0004427343 }
 0x53c   : > { %v2494_v62 = vsel %vm2270_vm15, %v5597_v8, %v2478_v55  ;;  %v2479_v30 = vmul.f32 0.5, %v2447_v60  ;;  %v2461_v40 = vadd.f32 1.0, %v2460_v59  ;;  %vm2271_vm12 = vcmp.gt.f32.partialorder %v5600_v43, 20.0 }
 0x53d   : > { %3346 = vmatmul.mubr.msk.f32.gmra.mrb[42].mxu0 %vm2048_vm1, %v2493_v18  ;;  %v2456_v22 = vsel %vm2455_vm0, %v2453_v61, %v2450_v2  ;;  %v2463_v53 = vand.u32 2147483647, %v5681_v17  ;;  %vm2272_vm2 = vcmp.gt.f32.partialorder %v5627_v0, 20.0  ;;  %vm2273_vm9 = vcmp.gt.f32.partialorder %v5622_v34, 20.0  ;;  %v5770_v0 = vld [vmem:[%s5841_s1 + $0x160] ss:$0 sm:$0xff] }
 0x53e   : > { %3348 = vmatprep.mubr.msk.f32.mxu0 %vm2048_vm1, %v2494_v62  ;;  %v2495_v39 = vsel %vm2271_vm12, %v5590_v20, %v2479_v30  ;;  %v2480_v42 = vmul.f32 0.5, %v2456_v22  ;;  %v2462_v12 = vmul.f32 %v5681_v17, %v2461_v40 }
 0x53f   : > { %v3765_v52 = vpop.eup %3764  ;;  %vm2464_vm8 = vcmp.lt.f32.partialorder %v2463_v53, 0.0004427343 }
 0x540   : > { %v2496_v8 = vsel %vm2272_vm2, %v5619_v1, %v2480_v42  ;;  %v2459_v49 = vmul.f32 0.6931472, %v3765_v52 }
 0x541   : > { %3349 = vmatmul.mubr.msk.f32.gmra.mrb[44].mxu0 %vm2048_vm1, %v2495_v39 }
 0x542   : > { %3351 = vmatprep.mubr.msk.f32.mxu0 %vm2048_vm1, %v2496_v8  ;;  %v2465_v43 = vsel %vm2464_vm8, %v2462_v12, %v2459_v49 }
 0x543   : > { %v2481_v28 = vmul.f32 0.5, %v2465_v43 }
 0x545   : > { %v2497_v20 = vsel %vm2273_vm9, %v5614_v5, %v2481_v28 }
 0x546   : > { %3352 = vmatmul.mubr.msk.f32.gmra.mrb[46].mxu0 %vm2048_vm1, %v2497_v20  ;;  %vm2700_vm1 = vcmp.ge.s32.totalorder %v4648_v4, 64 }
 0x5e3   : > { %v3332_v1 = vpop.f32.mrb[32].mxu0 }
 0x5e4   : > { %v2627_v37 = vadd.f32 %v3332_v1, %v5770_v0  ;;  %v2621_v17 = vpop.f32.mrb[33].mxu0 }
 0x5e5   : > { %v2622_v14 = vadd.f32 %v5770_v0, %v2621_v17 }
 0x5e6   : > { %v2702_v54 = vmin.f32 %v2627_v37, 80.0 }
 0x5e7   : > { %v2701_v41 = vmin.f32 %v2622_v14, 80.0 }
 0x5e8   : > { %v2719_v32 = vmul.f32 1.442695, %v2702_v54 }
 0x5e9   : > { %v2717_v50 = vmul.f32 1.442695, %v2701_v41 }
 0x5ea   : > { %3766 = vpow2.f32 %v2719_v32 }
 0x5eb   : > { %3768 = vpow2.f32 %v2717_v50 }
 0x5ec   : > { %v3335_v5 = vpop.f32.mrb[34].mxu0 }
 0x5ed   : > { %v2637_v34 = vadd.f32 %v3335_v5, %v5770_v0  ;;  %v2631_v23 = vpop.f32.mrb[35].mxu0 }
 0x5ee   : > { %v2632_v46 = vadd.f32 %v5770_v0, %v2631_v23 }
 0x5ef   : > { %v2704_v24 = vmin.f32 %v2637_v34, 80.0 }
 0x5f0   : > { %v2703_v29 = vmin.f32 %v2632_v46, 80.0 }
 0x5f1   : > { %v2723_v11 = vmul.f32 1.442695, %v2704_v24 }
 0x5f2   : > { %v2721_v38 = vmul.f32 1.442695, %v2703_v29 }
 0x5f3   : > { %3770 = vpow2.f32 %v2723_v11 }
 0x5f4   : > { %v3767_v26 = vpop.eup %3766  ;;  %3772 = vpow2.f32 %v2721_v38 }
 0x5f5   : > { %v3769_v33 = vpop.eup %3768  ;;  %v2750_v51 = vadd.f32 1e-06, %v3767_v26 }
 0x5f6   : > { %v2749_v58 = vadd.f32 1e-06, %v3769_v33 }
 0x5f7   : > { %v2766_v15 = vsel %vm2700_vm1, %v2750_v51, %v2627_v37 }
 0x5f8   : > { %2782 = vst [vmem:[%s4664_s18 + $0x10] sm:$0xff] %v2766_v15  ;;  %v2765_v57 = vsel %vm2700_vm1, %v2749_v58, %v2622_v14 }
 0x5f9   : > { %2781 = vst [vmem:[%s4664_s18] sm:$0xff] %v2765_v57 }
 0x5fd   : > { %v3771_v19 = vpop.eup %3770 }
 0x5fe   : > { %v3773_v36 = vpop.eup %3772  ;;  %v2752_v16 = vadd.f32 1e-06, %v3771_v19 }
 0x5ff   : > { %v2751_v31 = vadd.f32 1e-06, %v3773_v36 }
 0x600   : > { %v2768_v48 = vsel %vm2700_vm1, %v2752_v16, %v2637_v34 }
 0x601   : > { %2784 = vst [vmem:[%s4664_s18 + $0x30] sm:$0xff] %v2768_v48  ;;  %v2767_v13 = vsel %vm2700_vm1, %v2751_v31, %v2632_v46 }
 0x602   : > { %v3338_v9 = vpop.f32.mrb[36].mxu0  ;;  %2783 = vst [vmem:[%s4664_s18 + $0x20] sm:$0xff] %v2767_v13 }
 0x603   : > { %v2647_v6 = vadd.f32 %v3338_v9, %v5770_v0  ;;  %v2641_v25 = vpop.f32.mrb[37].mxu0 }
 0x604   : > { %v2642_v3 = vadd.f32 %v5770_v0, %v2641_v25 }
 0x605   : > { %v2706_v21 = vmin.f32 %v2647_v6, 80.0 }
 0x606   : > { %v2705_v27 = vmin.f32 %v2642_v3, 80.0 }
 0x607   : > { %v2727_v63 = vmul.f32 1.442695, %v2706_v21 }
 0x608   : > { %v2725_v10 = vmul.f32 1.442695, %v2705_v27  ;;  %v3341_v47 = vpop.f32.mrb[38].mxu0 }
 0x609   : > { %3774 = vpow2.f32 %v2727_v63  ;;  %v2657_v45 = vadd.f32 %v3341_v47, %v5770_v0  ;;  %v2651_v59 = vpop.f32.mrb[39].mxu0 }
 0x60a   : > { %3776 = vpow2.f32 %v2725_v10  ;;  %v2652_v35 = vadd.f32 %v5770_v0, %v2651_v59 }
 0x60b   : > { %v2708_v7 = vmin.f32 %v2657_v45, 80.0 }
 0x60c   : > { %v2707_v44 = vmin.f32 %v2652_v35, 80.0  ;;  %v3344_v56 = vpop.f32.mrb[40].mxu0 }
 0x60d   : > { %v2731_v18 = vmul.f32 1.442695, %v2708_v7  ;;  %v2667_v55 = vadd.f32 %v3344_v56, %v5770_v0  ;;  %v2661_v60 = vpop.f32.mrb[41].mxu0 }
 0x60e   : > { %v2729_v2 = vmul.f32 1.442695, %v2707_v44  ;;  %v2662_v61 = vadd.f32 %v5770_v0, %v2661_v60 }
 0x60f   : > { %3778 = vpow2.f32 %v2731_v18  ;;  %v2710_v62 = vmin.f32 %v2667_v55, 80.0 }
 0x610   : > { %3780 = vpow2.f32 %v2729_v2  ;;  %v2709_v30 = vmin.f32 %v2662_v61, 80.0  ;;  %v3347_v40 = vpop.f32.mrb[42].mxu0 }
 0x611   : > { %v2735_v22 = vmul.f32 1.442695, %v2710_v62  ;;  %v2677_v53 = vadd.f32 %v3347_v40, %v5770_v0  ;;  %v2671_v39 = vpop.f32.mrb[43].mxu0 }
 0x612   : > { %v2733_v52 = vmul.f32 1.442695, %v2709_v30  ;;  %v2672_v8 = vadd.f32 %v5770_v0, %v2671_v39 }
 0x613   : > { %v3775_v42 = vpop.eup %3774  ;;  %3782 = vpow2.f32 %v2735_v22  ;;  %v2712_v43 = vmin.f32 %v2677_v53, 80.0 }
 0x614   : > { %v3777_v49 = vpop.eup %3776  ;;  %v2754_v12 = vadd.f32 1e-06, %v3775_v42  ;;  %3784 = vpow2.f32 %v2733_v52  ;;  %v2711_v20 = vmin.f32 %v2672_v8, 80.0  ;;  %v3350_v1 = vpop.f32.mrb[44].mxu0 }
 0x615   : > { %v2753_v28 = vadd.f32 1e-06, %v3777_v49  ;;  %v2739_v17 = vmul.f32 1.442695, %v2712_v43  ;;  %v2687_v14 = vadd.f32 %v3350_v1, %v5770_v0  ;;  %v2681_v54 = vpop.f32.mrb[45].mxu0 }
 0x616   : > { %v2770_v37 = vsel %vm2700_vm1, %v2754_v12, %v2647_v6  ;;  %v2737_v32 = vmul.f32 1.442695, %v2711_v20  ;;  %v2682_v50 = vadd.f32 %v5770_v0, %v2681_v54 }
 0x617   : > { %2786 = vst [vmem:[%s4664_s18 + $0x50] sm:$0xff] %v2770_v37  ;;  %v2769_v41 = vsel %vm2700_vm1, %v2753_v28, %v2642_v3  ;;  %3786 = vpow2.f32 %v2739_v17  ;;  %v2714_v5 = vmin.f32 %v2687_v14, 80.0 }
 0x618   : > { %2785 = vst [vmem:[%s4664_s18 + $0x40] sm:$0xff] %v2769_v41  ;;  %3788 = vpow2.f32 %v2737_v32  ;;  %v2713_v34 = vmin.f32 %v2682_v50, 80.0 }
 0x619   : > { %v3779_v23 = vpop.eup %3778  ;;  %v2743_v46 = vmul.f32 1.442695, %v2714_v5  ;;  %v3353_v38 = vpop.f32.mrb[46].mxu0 }
 0x61a   : > { %v3781_v24 = vpop.eup %3780  ;;  %v2756_v29 = vadd.f32 1e-06, %v3779_v23  ;;  %v2741_v11 = vmul.f32 1.442695, %v2713_v34  ;;  %v2697_v51 = vadd.f32 %v3353_v38, %v5770_v0  ;;  %v2691_v58 = vpop.f32.mrb[47].mxu0 }
 0x61b   : > { %v2755_v26 = vadd.f32 1e-06, %v3781_v24  ;;  %3790 = vpow2.f32 %v2743_v46  ;;  %v2692_v19 = vadd.f32 %v5770_v0, %v2691_v58 }
 0x61c   : > { %v2772_v33 = vsel %vm2700_vm1, %v2756_v29, %v2657_v45  ;;  %3792 = vpow2.f32 %v2741_v11  ;;  %v2716_v31 = vmin.f32 %v2697_v51, 80.0 }
 0x61d   : > { %v3783_v15 = vpop.eup %3782  ;;  %2788 = vst [vmem:[%s4664_s18 + $0x70] sm:$0xff] %v2772_v33  ;;  %v2771_v57 = vsel %vm2700_vm1, %v2755_v26, %v2652_v35  ;;  %v2715_v9 = vmin.f32 %v2692_v19, 80.0 }
 0x61e   : > { %v3785_v36 = vpop.eup %3784  ;;  %2787 = vst [vmem:[%s4664_s18 + $0x60] sm:$0xff] %v2771_v57  ;;  %v2758_v16 = vadd.f32 1e-06, %v3783_v15  ;;  %v2747_v6 = vmul.f32 1.442695, %v2716_v31 }
 0x61f   : > { %v2757_v48 = vadd.f32 1e-06, %v3785_v36  ;;  %v2745_v21 = vmul.f32 1.442695, %v2715_v9 }
 0x620   : > { %v2774_v13 = vsel %vm2700_vm1, %v2758_v16, %v2667_v55  ;;  %3794 = vpow2.f32 %v2747_v6 }
 0x621   : > { %v3787_v25 = vpop.eup %3786  ;;  %2790 = vst [vmem:[%s4664_s18 + $0x90] sm:$0xff] %v2774_v13  ;;  %v2773_v3 = vsel %vm2700_vm1, %v2757_v48, %v2662_v61  ;;  %3796 = vpow2.f32 %v2745_v21 }
 0x622   : > { %v3789_v0 = vpop.eup %3788  ;;  %2789 = vst [vmem:[%s4664_s18 + $0x80] sm:$0xff] %v2773_v3  ;;  %v2760_v27 = vadd.f32 1e-06, %v3787_v25 }
 0x623   : > { %v2759_v63 = vadd.f32 1e-06, %v3789_v0 }
 0x624   : > { %v2776_v10 = vsel %vm2700_vm1, %v2760_v27, %v2677_v53 }
 0x625   : > { %v3791_v47 = vpop.eup %3790  ;;  %2792 = vst [vmem:[%s4664_s18 + $0xb0] sm:$0xff] %v2776_v10  ;;  %v2775_v45 = vsel %vm2700_vm1, %v2759_v63, %v2672_v8 }
 0x626   : > { %v3793_v59 = vpop.eup %3792  ;;  %2791 = vst [vmem:[%s4664_s18 + $0xa0] sm:$0xff] %v2775_v45  ;;  %v2762_v35 = vadd.f32 1e-06, %v3791_v47 }
 0x627   : > { %v2761_v7 = vadd.f32 1e-06, %v3793_v59 }
 0x628   : > { %v2778_v44 = vsel %vm2700_vm1, %v2762_v35, %v2687_v14 }
 0x629   : > { %2794 = vst [vmem:[%s4664_s18 + $0xd0] sm:$0xff] %v2778_v44  ;;  %v2777_v56 = vsel %vm2700_vm1, %v2761_v7, %v2682_v50 }
 0x62a   : > { %2793 = vst [vmem:[%s4664_s18 + $0xc0] sm:$0xff] %v2777_v56  ;;  %v3795_v18 = vpop.eup %3794 }
 0x62b   : > { %v3797_v55 = vpop.eup %3796  ;;  %v2764_v60 = vadd.f32 1e-06, %v3795_v18 }
 0x62c   : > { %v2763_v2 = vadd.f32 1e-06, %v3797_v55 }
 0x62d   : > { %v2780_v61 = vsel %vm2700_vm1, %v2764_v60, %v2697_v51 }
 0x62e   : > { %2796 = vst [vmem:[%s4664_s18 + $0xf0] sm:$0xff] %v2780_v61  ;;  %v2779_v62 = vsel %vm2700_vm1, %v2763_v2, %v2692_v19 }
 0x62f   : > { %2795 = vst [vmem:[%s4664_s18 + $0xe0] sm:$0xff] %v2779_v62 }
 0x630 PF: > { %s12_s9 = sadd.s32 1, %s3804_s9  }
 0x631   : > { %p9_p4 = scmp.ge.s32.totalorder %s12_s9, 4  }
 0x633   :  { %11 = sbr.rel (!%p9_p4) target bundleno = 1 (0x1), region = 58 }

</bundles_post_ra>
